<compile_context>
chip_gen: v7x
topology: tpu7x:2x2x1
jax: 0.10.0
libtpu: 0.0.40
codegen_flags: <defaults>
</compile_context>

<pallas_src>
import math

import jax
import jax.numpy as jnp
from jax.experimental import pallas as pl
from jax.experimental.pallas import tpu as pltpu

LANE = 128


def _round_up(x, m):
    return ((x + m - 1) // m) * m


# ----------------------------- Pallas kernel --------------------------------

def autoencoder_kernel(x_ref,
                       wih_e_ref, whh_e_ref, b_e_ref,
                       wih_d_ref, whh_d_ref, b_d_ref,
                       wout_ref, bout_ref,
                       out_ref,
                       hdec_scratch):
    seq_len = x_ref.shape[0]
    lp = whh_e_ref.shape[0]          # padded encoder (latent) width, multiple of 128
    dp = whh_d_ref.shape[0]          # padded decoder (hidden) width, multiple of 128

    # Hoist weight loads out of the (unrolled) recurrences.
    wih_e = wih_e_ref[...]           # (n_features, 4*lp)
    whh_e = whh_e_ref[...]           # (lp, 4*lp)
    whh_d = whh_d_ref[...]           # (dp, 4*dp)

    def gates(pre, hp):
        # pre: (1, 4*hp); each gate block spans whole 128-lane vregs (no XLU).
        i = jax.nn.sigmoid(pre[:, 0 * hp:1 * hp])
        f = jax.nn.sigmoid(pre[:, 1 * hp:2 * hp])
        g = jnp.tanh(pre[:, 2 * hp:3 * hp])
        o = jax.nn.sigmoid(pre[:, 3 * hp:4 * hp])
        return i, f, g, o

    # ---------------- Encoder LSTM --------------------------------------------
    # Input projection for the whole sequence hoisted off the serial chain.
    # n_features == 1 -> rank-1 outer product: use a VPU broadcast-multiply
    # instead of a degenerate K=1 MXU matmul.
    x_proj = x_ref[...] * wih_e + b_e_ref[...]          # (seq_len, 4*lp)

    h = jnp.zeros((1, lp), jnp.float32)
    c = jnp.zeros((1, lp), jnp.float32)
    for t in range(seq_len):                            # fully unrolled (static trip count)
        pre = x_proj[t:t + 1, :] + jnp.dot(h, whh_e,
                                           preferred_element_type=jnp.float32)
        i, f, g, o = gates(pre, lp)
        c = f * c + i * g
        h = o * jnp.tanh(c)
    h_enc = h                                           # (1, lp); padded lanes are exact 0

    # ---------------- Decoder LSTM (same latent fed at every step) ------------
    x_contrib = (jnp.dot(h_enc, wih_d_ref[...],
                         preferred_element_type=jnp.float32)
                 + b_d_ref[...])                        # (1, 4*dp), hoisted

    h = jnp.zeros((1, dp), jnp.float32)
    c = jnp.zeros((1, dp), jnp.float32)
    for t in range(seq_len):                            # fully unrolled (static trip count)
        pre = x_contrib + jnp.dot(h, whh_d,
                                  preferred_element_type=jnp.float32)
        i, f, g, o = gates(pre, dp)
        c = f * c + i * g
        h = o * jnp.tanh(c)
        hdec_scratch[pl.ds(t, 1), :] = h                # lane-aligned (1, dp) row store

    # ---------------- Output Linear (n_features == 1) -------------------------
    # VPU multiply + lane reduce; avoids an N=1 MXU matmul round-trip.
    hdec = hdec_scratch[...]                            # (seq_len, dp)
    out_ref[...] = (jnp.sum(hdec * wout_ref[...], axis=-1, keepdims=True)
                    + bout_ref[...])


# ------------------------------- Wrapper -------------------------------------

def pad_params(params):
    """Re-lay LSTM/Linear params with each gate block zero-padded to 128 lanes."""
    latent = params["whh_e"].shape[0]
    hidden = params["whh_d"].shape[0]
    lp = _round_up(latent, LANE)
    dp = _round_up(hidden, LANE)

    def pad_gate_cols(w, h_real, h_pad):
        # (rows, 4*h_real) -> (rows, 4*h_pad), padding each of the 4 gate blocks.
        w4 = w.reshape(w.shape[0], 4, h_real)
        w4 = jnp.pad(w4, ((0, 0), (0, 0), (0, h_pad - h_real)))
        return w4.reshape(w.shape[0], 4 * h_pad)

    def pad_rows(w, rows_pad):
        return jnp.pad(w, ((0, rows_pad - w.shape[0]), (0, 0)))

    return {
        "wih_e": pad_gate_cols(params["wih_e"], latent, lp),                 # (n_feat, 4*lp)
        "whh_e": pad_rows(pad_gate_cols(params["whh_e"], latent, lp), lp),   # (lp, 4*lp)
        "b_e":   pad_gate_cols(params["b_e"], latent, lp),                   # (1, 4*lp)
        "wih_d": pad_rows(pad_gate_cols(params["wih_d"], hidden, dp), lp),   # (lp, 4*dp)
        "whh_d": pad_rows(pad_gate_cols(params["whh_d"], hidden, dp), dp),   # (dp, 4*dp)
        "b_d":   pad_gate_cols(params["b_d"], hidden, dp),                   # (1, 4*dp)
        "wout":  jnp.pad(params["wout"].T, ((0, 0), (0, dp - hidden))),      # (n_feat, dp)
        "bout":  params["bout"],                                             # (1, n_feat)
    }


def autoencoder_forward(x, padded):
    seq_len, n_features = x.shape
    # torch module semantics (hidden_n.reshape((n_features, latent_dim))) require this:
    assert n_features == 1
    dp = padded["whh_d"].shape[0]

    vmem = pl.BlockSpec(memory_space=pltpu.MemorySpace.VMEM)
    return pl.pallas_call(
        autoencoder_kernel,
        out_shape=jax.ShapeDtypeStruct((seq_len, n_features), jnp.float32),
        in_specs=[vmem] * 9,
        out_specs=vmem,
        scratch_shapes=[pltpu.VMEM((seq_len, dp), jnp.float32)],
    )(x,
      padded["wih_e"], padded["whh_e"], padded["b_e"],
      padded["wih_d"], padded["whh_d"], padded["b_d"],
      padded["wout"], padded["bout"])


# ------------------------- Deterministic parameter init ----------------------

def init_params(key, n_features, latent):
    hidden = 2 * latent
    ks = jax.random.split(key, 9)

    def u(k, shape, bound):
        return jax.random.uniform(k, shape, jnp.float32, -bound, bound)

    be = 1.0 / math.sqrt(latent)     # encoder LSTM init bound (PyTorch style)
    bd = 1.0 / math.sqrt(hidden)     # decoder LSTM init bound
    bl = 1.0 / math.sqrt(hidden)     # output Linear init bound

    return {
        # encoder LSTM (weights stored transposed: (in, 4*h), gate order i,f,g,o)
        "wih_e": u(ks[0], (n_features, 4 * latent), be),
        "whh_e": u(ks[1], (latent, 4 * latent), be),
        "b_e":   u(ks[2], (1, 4 * latent), be) + u(ks[3], (1, 4 * latent), be),
        # decoder LSTM
        "wih_d": u(ks[4], (latent, 4 * hidden), bd),
        "whh_d": u(ks[5], (hidden, 4 * hidden), bd),
        "b_d":   u(ks[6], (1, 4 * hidden), bd) + u(ks[7], (1, 4 * hidden), bd),
        # output Linear
        "wout":  u(ks[8], (hidden, n_features), bl),
        "bout":  jnp.zeros((1, n_features), jnp.float32),
    }


# ------------------------------ Pure-JAX reference ---------------------------

def autoencoder_reference(x, params):
    seq_len, n_features = x.shape
    latent = params["whh_e"].shape[0]
    hidden = params["whh_d"].shape[0]

    def gates(pre, hs):
        return (jax.nn.sigmoid(pre[:, 0 * hs:1 * hs]),
                jax.nn.sigmoid(pre[:, 1 * hs:2 * hs]),
                jnp.tanh(pre[:, 2 * hs:3 * hs]),
                jax.nn.sigmoid(pre[:, 3 * hs:4 * hs]))

    h = jnp.zeros((1, latent)); c = jnp.zeros((1, latent))
    for t in range(seq_len):
        pre = x[t:t + 1] @ params["wih_e"] + h @ params["whh_e"] + params["b_e"]
        i, f, g, o = gates(pre, latent)
        c = f * c + i * g
        h = o * jnp.tanh(c)
    h_enc = h

    xc = h_enc @ params["wih_d"] + params["b_d"]
    h = jnp.zeros((1, hidden)); c = jnp.zeros((1, hidden))
    hs = []
    for t in range(seq_len):
        pre = xc + h @ params["whh_d"]
        i, f, g, o = gates(pre, hidden)
        c = f * c + i * g
        h = o * jnp.tanh(c)
        hs.append(h)
    H = jnp.concatenate(hs, axis=0)
    return H @ params["wout"] + params["bout"]


# ----------------------------------- Main -------------------------------------

if __name__ == "__main__":
    # n_features must be 1 for the torch module's hidden_n.reshape((n_features, latent_dim))
    # to be valid; seq_len=8, latent_dim=20 (module default -> decoder hidden = 40).
    N_FEATURES = 1
    SEQ_LEN = 8
    LATENT = 20

    key = jax.random.PRNGKey(0)
    pkey, xkey = jax.random.split(key)
    params = init_params(pkey, N_FEATURES, LATENT)
    x = jax.random.normal(xkey, (SEQ_LEN, N_FEATURES), jnp.float32)

    padded = pad_params(params)     # one-time re-layout to the gate-padded kernel format

    out = autoencoder_forward(x, padded)
    out = jax.block_until_ready(out)

    ref = autoencoder_reference(x, params)
    assert out.shape == (SEQ_LEN, N_FEATURES)
    assert jnp.allclose(out, ref, atol=1e-5, rtol=1e-5), "Pallas output mismatch vs reference"

    print("KERNEL_OK")
</pallas_src>

<mosaic_0001>
module attributes {stable_mosaic.version = 11 : i64} {
  func.func @autoencoder_kernel(%arg0: memref<8x1xf32, #tpu.memory_space<vmem>>, %arg1: memref<1x512xf32, #tpu.memory_space<vmem>>, %arg2: memref<128x512xf32, #tpu.memory_space<vmem>>, %arg3: memref<1x512xf32, #tpu.memory_space<vmem>>, %arg4: memref<128x512xf32, #tpu.memory_space<vmem>>, %arg5: memref<128x512xf32, #tpu.memory_space<vmem>>, %arg6: memref<1x512xf32, #tpu.memory_space<vmem>>, %arg7: memref<1x128xf32, #tpu.memory_space<vmem>>, %arg8: memref<1x1xf32, #tpu.memory_space<vmem>>, %arg9: memref<8x1xf32, #tpu.memory_space<vmem>>, %arg10: memref<8x128xf32, #tpu.memory_space<vmem>>) attributes {dimension_semantics = [], scalar_prefetch = 0 : i64, scratch_operands = 1 : i64, tpu.core_type = #tpu.core_type<tc>} {
    %c0 = arith.constant 0 : index
    %c0_0 = arith.constant 0 : index
    %0 = vector.load %arg1[%c0, %c0_0] : memref<1x512xf32, #tpu.memory_space<vmem>>, vector<1x512xf32>
    %c0_1 = arith.constant 0 : index
    %c0_2 = arith.constant 0 : index
    %1 = vector.load %arg2[%c0_1, %c0_2] : memref<128x512xf32, #tpu.memory_space<vmem>>, vector<128x512xf32>
    %c0_3 = arith.constant 0 : index
    %c0_4 = arith.constant 0 : index
    %2 = vector.load %arg5[%c0_3, %c0_4] : memref<128x512xf32, #tpu.memory_space<vmem>>, vector<128x512xf32>
    %c0_5 = arith.constant 0 : index
    %c0_6 = arith.constant 0 : index
    %3 = vector.load %arg0[%c0_5, %c0_6] : memref<8x1xf32, #tpu.memory_space<vmem>>, vector<8x1xf32>
    %4 = vector.broadcast %3 : vector<8x1xf32> to vector<8x512xf32>
    %5 = vector.broadcast %0 : vector<1x512xf32> to vector<8x512xf32>
    %6 = arith.mulf %4, %5 : vector<8x512xf32>
    %c0_7 = arith.constant 0 : index
    %c0_8 = arith.constant 0 : index
    %7 = vector.load %arg3[%c0_7, %c0_8] : memref<1x512xf32, #tpu.memory_space<vmem>>, vector<1x512xf32>
    %8 = vector.broadcast %7 : vector<1x512xf32> to vector<8x512xf32>
    %9 = arith.addf %6, %8 : vector<8x512xf32>
    %cst = arith.constant 0.000000e+00 : f32
    %10 = vector.broadcast %cst : f32 to vector<1x128xf32>
    %cst_9 = arith.constant 0.000000e+00 : f32
    %11 = vector.broadcast %cst_9 : f32 to vector<1x128xf32>
    %12 = vector.extract_strided_slice %9 {offsets = [0, 0], sizes = [1, 512], strides = [1, 1]} : vector<8x512xf32> to vector<1x512xf32>
    %cst_10 = arith.constant dense<0.000000e+00> : vector<1x512xf32>
    %13 = tpu.matmul %10, %1, %cst_10 {dimension_numbers = #tpu.dot_dimension_numbers<[1], [0], [0], [1], [0, 0, 1, 1], [], []>} : vector<1x128xf32>, vector<128x512xf32>, vector<1x512xf32> -> vector<1x512xf32>
    %14 = arith.addf %12, %13 : vector<1x512xf32>
    %15 = vector.extract_strided_slice %14 {offsets = [0, 0], sizes = [1, 128], strides = [1, 1]} : vector<1x512xf32> to vector<1x128xf32>
    %16 = arith.negf %15 : vector<1x128xf32>
    %17 = math.exp %16 : vector<1x128xf32>
    %cst_11 = arith.constant 1.000000e+00 : f32
    %18 = vector.broadcast %cst_11 : f32 to vector<1x128xf32>
    %19 = arith.addf %18, %17 : vector<1x128xf32>
    %20 = arith.divf %18, %19 : vector<1x128xf32>
    %21 = vector.extract_strided_slice %14 {offsets = [0, 128], sizes = [1, 128], strides = [1, 1]} : vector<1x512xf32> to vector<1x128xf32>
    %22 = arith.negf %21 : vector<1x128xf32>
    %23 = math.exp %22 : vector<1x128xf32>
    %cst_12 = arith.constant 1.000000e+00 : f32
    %24 = vector.broadcast %cst_12 : f32 to vector<1x128xf32>
    %25 = arith.addf %24, %23 : vector<1x128xf32>
    %26 = arith.divf %24, %25 : vector<1x128xf32>
    %27 = vector.extract_strided_slice %14 {offsets = [0, 256], sizes = [1, 128], strides = [1, 1]} : vector<1x512xf32> to vector<1x128xf32>
    %28 = math.tanh %27 : vector<1x128xf32>
    %29 = vector.extract_strided_slice %14 {offsets = [0, 384], sizes = [1, 128], strides = [1, 1]} : vector<1x512xf32> to vector<1x128xf32>
    %30 = arith.negf %29 : vector<1x128xf32>
    %31 = math.exp %30 : vector<1x128xf32>
    %cst_13 = arith.constant 1.000000e+00 : f32
    %32 = vector.broadcast %cst_13 : f32 to vector<1x128xf32>
    %33 = arith.addf %32, %31 : vector<1x128xf32>
    %34 = arith.divf %32, %33 : vector<1x128xf32>
    %35 = arith.mulf %26, %11 : vector<1x128xf32>
    %36 = arith.mulf %20, %28 : vector<1x128xf32>
    %37 = arith.addf %35, %36 : vector<1x128xf32>
    %38 = math.tanh %37 : vector<1x128xf32>
    %39 = arith.mulf %34, %38 : vector<1x128xf32>
    %40 = vector.extract_strided_slice %9 {offsets = [1, 0], sizes = [1, 512], strides = [1, 1]} : vector<8x512xf32> to vector<1x512xf32>
    %cst_14 = arith.constant dense<0.000000e+00> : vector<1x512xf32>
    %41 = tpu.matmul %39, %1, %cst_14 {dimension_numbers = #tpu.dot_dimension_numbers<[1], [0], [0], [1], [0, 0, 1, 1], [], []>} : vector<1x128xf32>, vector<128x512xf32>, vector<1x512xf32> -> vector<1x512xf32>
    %42 = arith.addf %40, %41 : vector<1x512xf32>
    %43 = vector.extract_strided_slice %42 {offsets = [0, 0], sizes = [1, 128], strides = [1, 1]} : vector<1x512xf32> to vector<1x128xf32>
    %44 = arith.negf %43 : vector<1x128xf32>
    %45 = math.exp %44 : vector<1x128xf32>
    %cst_15 = arith.constant 1.000000e+00 : f32
    %46 = vector.broadcast %cst_15 : f32 to vector<1x128xf32>
    %47 = arith.addf %46, %45 : vector<1x128xf32>
    %48 = arith.divf %46, %47 : vector<1x128xf32>
    %49 = vector.extract_strided_slice %42 {offsets = [0, 128], sizes = [1, 128], strides = [1, 1]} : vector<1x512xf32> to vector<1x128xf32>
    %50 = arith.negf %49 : vector<1x128xf32>
    %51 = math.exp %50 : vector<1x128xf32>
    %cst_16 = arith.constant 1.000000e+00 : f32
    %52 = vector.broadcast %cst_16 : f32 to vector<1x128xf32>
    %53 = arith.addf %52, %51 : vector<1x128xf32>
    %54 = arith.divf %52, %53 : vector<1x128xf32>
    %55 = vector.extract_strided_slice %42 {offsets = [0, 256], sizes = [1, 128], strides = [1, 1]} : vector<1x512xf32> to vector<1x128xf32>
    %56 = math.tanh %55 : vector<1x128xf32>
    %57 = vector.extract_strided_slice %42 {offsets = [0, 384], sizes = [1, 128], strides = [1, 1]} : vector<1x512xf32> to vector<1x128xf32>
    %58 = arith.negf %57 : vector<1x128xf32>
    %59 = math.exp %58 : vector<1x128xf32>
    %cst_17 = arith.constant 1.000000e+00 : f32
    %60 = vector.broadcast %cst_17 : f32 to vector<1x128xf32>
    %61 = arith.addf %60, %59 : vector<1x128xf32>
    %62 = arith.divf %60, %61 : vector<1x128xf32>
    %63 = arith.mulf %54, %37 : vector<1x128xf32>
    %64 = arith.mulf %48, %56 : vector<1x128xf32>
    %65 = arith.addf %63, %64 : vector<1x128xf32>
    %66 = math.tanh %65 : vector<1x128xf32>
    %67 = arith.mulf %62, %66 : vector<1x128xf32>
    %68 = vector.extract_strided_slice %9 {offsets = [2, 0], sizes = [1, 512], strides = [1, 1]} : vector<8x512xf32> to vector<1x512xf32>
    %cst_18 = arith.constant dense<0.000000e+00> : vector<1x512xf32>
    %69 = tpu.matmul %67, %1, %cst_18 {dimension_numbers = #tpu.dot_dimension_numbers<[1], [0], [0], [1], [0, 0, 1, 1], [], []>} : vector<1x128xf32>, vector<128x512xf32>, vector<1x512xf32> -> vector<1x512xf32>
    %70 = arith.addf %68, %69 : vector<1x512xf32>
    %71 = vector.extract_strided_slice %70 {offsets = [0, 0], sizes = [1, 128], strides = [1, 1]} : vector<1x512xf32> to vector<1x128xf32>
    %72 = arith.negf %71 : vector<1x128xf32>
    %73 = math.exp %72 : vector<1x128xf32>
    %cst_19 = arith.constant 1.000000e+00 : f32
    %74 = vector.broadcast %cst_19 : f32 to vector<1x128xf32>
    %75 = arith.addf %74, %73 : vector<1x128xf32>
    %76 = arith.divf %74, %75 : vector<1x128xf32>
    %77 = vector.extract_strided_slice %70 {offsets = [0, 128], sizes = [1, 128], strides = [1, 1]} : vector<1x512xf32> to vector<1x128xf32>
    %78 = arith.negf %77 : vector<1x128xf32>
    %79 = math.exp %78 : vector<1x128xf32>
    %cst_20 = arith.constant 1.000000e+00 : f32
    %80 = vector.broadcast %cst_20 : f32 to vector<1x128xf32>
    %81 = arith.addf %80, %79 : vector<1x128xf32>
    %82 = arith.divf %80, %81 : vector<1x128xf32>
    %83 = vector.extract_strided_slice %70 {offsets = [0, 256], sizes = [1, 128], strides = [1, 1]} : vector<1x512xf32> to vector<1x128xf32>
    %84 = math.tanh %83 : vector<1x128xf32>
    %85 = vector.extract_strided_slice %70 {offsets = [0, 384], sizes = [1, 128], strides = [1, 1]} : vector<1x512xf32> to vector<1x128xf32>
    %86 = arith.negf %85 : vector<1x128xf32>
    %87 = math.exp %86 : vector<1x128xf32>
    %cst_21 = arith.constant 1.000000e+00 : f32
    %88 = vector.broadcast %cst_21 : f32 to vector<1x128xf32>
    %89 = arith.addf %88, %87 : vector<1x128xf32>
    %90 = arith.divf %88, %89 : vector<1x128xf32>
    %91 = arith.mulf %82, %65 : vector<1x128xf32>
    %92 = arith.mulf %76, %84 : vector<1x128xf32>
    %93 = arith.addf %91, %92 : vector<1x128xf32>
    %94 = math.tanh %93 : vector<1x128xf32>
    %95 = arith.mulf %90, %94 : vector<1x128xf32>
    %96 = vector.extract_strided_slice %9 {offsets = [3, 0], sizes = [1, 512], strides = [1, 1]} : vector<8x512xf32> to vector<1x512xf32>
    %cst_22 = arith.constant dense<0.000000e+00> : vector<1x512xf32>
    %97 = tpu.matmul %95, %1, %cst_22 {dimension_numbers = #tpu.dot_dimension_numbers<[1], [0], [0], [1], [0, 0, 1, 1], [], []>} : vector<1x128xf32>, vector<128x512xf32>, vector<1x512xf32> -> vector<1x512xf32>
    %98 = arith.addf %96, %97 : vector<1x512xf32>
    %99 = vector.extract_strided_slice %98 {offsets = [0, 0], sizes = [1, 128], strides = [1, 1]} : vector<1x512xf32> to vector<1x128xf32>
    %100 = arith.negf %99 : vector<1x128xf32>
    %101 = math.exp %100 : vector<1x128xf32>
    %cst_23 = arith.constant 1.000000e+00 : f32
    %102 = vector.broadcast %cst_23 : f32 to vector<1x128xf32>
    %103 = arith.addf %102, %101 : vector<1x128xf32>
    %104 = arith.divf %102, %103 : vector<1x128xf32>
    %105 = vector.extract_strided_slice %98 {offsets = [0, 128], sizes = [1, 128], strides = [1, 1]} : vector<1x512xf32> to vector<1x128xf32>
    %106 = arith.negf %105 : vector<1x128xf32>
    %107 = math.exp %106 : vector<1x128xf32>
    %cst_24 = arith.constant 1.000000e+00 : f32
    %108 = vector.broadcast %cst_24 : f32 to vector<1x128xf32>
    %109 = arith.addf %108, %107 : vector<1x128xf32>
    %110 = arith.divf %108, %109 : vector<1x128xf32>
    %111 = vector.extract_strided_slice %98 {offsets = [0, 256], sizes = [1, 128], strides = [1, 1]} : vector<1x512xf32> to vector<1x128xf32>
    %112 = math.tanh %111 : vector<1x128xf32>
    %113 = vector.extract_strided_slice %98 {offsets = [0, 384], sizes = [1, 128], strides = [1, 1]} : vector<1x512xf32> to vector<1x128xf32>
    %114 = arith.negf %113 : vector<1x128xf32>
    %115 = math.exp %114 : vector<1x128xf32>
    %cst_25 = arith.constant 1.000000e+00 : f32
    %116 = vector.broadcast %cst_25 : f32 to vector<1x128xf32>
    %117 = arith.addf %116, %115 : vector<1x128xf32>
    %118 = arith.divf %116, %117 : vector<1x128xf32>
    %119 = arith.mulf %110, %93 : vector<1x128xf32>
    %120 = arith.mulf %104, %112 : vector<1x128xf32>
    %121 = arith.addf %119, %120 : vector<1x128xf32>
    %122 = math.tanh %121 : vector<1x128xf32>
    %123 = arith.mulf %118, %122 : vector<1x128xf32>
    %124 = vector.extract_strided_slice %9 {offsets = [4, 0], sizes = [1, 512], strides = [1, 1]} : vector<8x512xf32> to vector<1x512xf32>
    %cst_26 = arith.constant dense<0.000000e+00> : vector<1x512xf32>
    %125 = tpu.matmul %123, %1, %cst_26 {dimension_numbers = #tpu.dot_dimension_numbers<[1], [0], [0], [1], [0, 0, 1, 1], [], []>} : vector<1x128xf32>, vector<128x512xf32>, vector<1x512xf32> -> vector<1x512xf32>
    %126 = arith.addf %124, %125 : vector<1x512xf32>
    %127 = vector.extract_strided_slice %126 {offsets = [0, 0], sizes = [1, 128], strides = [1, 1]} : vector<1x512xf32> to vector<1x128xf32>
    %128 = arith.negf %127 : vector<1x128xf32>
    %129 = math.exp %128 : vector<1x128xf32>
    %cst_27 = arith.constant 1.000000e+00 : f32
    %130 = vector.broadcast %cst_27 : f32 to vector<1x128xf32>
    %131 = arith.addf %130, %129 : vector<1x128xf32>
    %132 = arith.divf %130, %131 : vector<1x128xf32>
    %133 = vector.extract_strided_slice %126 {offsets = [0, 128], sizes = [1, 128], strides = [1, 1]} : vector<1x512xf32> to vector<1x128xf32>
    %134 = arith.negf %133 : vector<1x128xf32>
    %135 = math.exp %134 : vector<1x128xf32>
    %cst_28 = arith.constant 1.000000e+00 : f32
    %136 = vector.broadcast %cst_28 : f32 to vector<1x128xf32>
    %137 = arith.addf %136, %135 : vector<1x128xf32>
    %138 = arith.divf %136, %137 : vector<1x128xf32>
    %139 = vector.extract_strided_slice %126 {offsets = [0, 256], sizes = [1, 128], strides = [1, 1]} : vector<1x512xf32> to vector<1x128xf32>
    %140 = math.tanh %139 : vector<1x128xf32>
    %141 = vector.extract_strided_slice %126 {offsets = [0, 384], sizes = [1, 128], strides = [1, 1]} : vector<1x512xf32> to vector<1x128xf32>
    %142 = arith.negf %141 : vector<1x128xf32>
    %143 = math.exp %142 : vector<1x128xf32>
    %cst_29 = arith.constant 1.000000e+00 : f32
    %144 = vector.broadcast %cst_29 : f32 to vector<1x128xf32>
    %145 = arith.addf %144, %143 : vector<1x128xf32>
    %146 = arith.divf %144, %145 : vector<1x128xf32>
    %147 = arith.mulf %138, %121 : vector<1x128xf32>
    %148 = arith.mulf %132, %140 : vector<1x128xf32>
    %149 = arith.addf %147, %148 : vector<1x128xf32>
    %150 = math.tanh %149 : vector<1x128xf32>
    %151 = arith.mulf %146, %150 : vector<1x128xf32>
    %152 = vector.extract_strided_slice %9 {offsets = [5, 0], sizes = [1, 512], strides = [1, 1]} : vector<8x512xf32> to vector<1x512xf32>
    %cst_30 = arith.constant dense<0.000000e+00> : vector<1x512xf32>
    %153 = tpu.matmul %151, %1, %cst_30 {dimension_numbers = #tpu.dot_dimension_numbers<[1], [0], [0], [1], [0, 0, 1, 1], [], []>} : vector<1x128xf32>, vector<128x512xf32>, vector<1x512xf32> -> vector<1x512xf32>
    %154 = arith.addf %152, %153 : vector<1x512xf32>
    %155 = vector.extract_strided_slice %154 {offsets = [0, 0], sizes = [1, 128], strides = [1, 1]} : vector<1x512xf32> to vector<1x128xf32>
    %156 = arith.negf %155 : vector<1x128xf32>
    %157 = math.exp %156 : vector<1x128xf32>
    %cst_31 = arith.constant 1.000000e+00 : f32
    %158 = vector.broadcast %cst_31 : f32 to vector<1x128xf32>
    %159 = arith.addf %158, %157 : vector<1x128xf32>
    %160 = arith.divf %158, %159 : vector<1x128xf32>
    %161 = vector.extract_strided_slice %154 {offsets = [0, 128], sizes = [1, 128], strides = [1, 1]} : vector<1x512xf32> to vector<1x128xf32>
    %162 = arith.negf %161 : vector<1x128xf32>
    %163 = math.exp %162 : vector<1x128xf32>
    %cst_32 = arith.constant 1.000000e+00 : f32
    %164 = vector.broadcast %cst_32 : f32 to vector<1x128xf32>
    %165 = arith.addf %164, %163 : vector<1x128xf32>
    %166 = arith.divf %164, %165 : vector<1x128xf32>
    %167 = vector.extract_strided_slice %154 {offsets = [0, 256], sizes = [1, 128], strides = [1, 1]} : vector<1x512xf32> to vector<1x128xf32>
    %168 = math.tanh %167 : vector<1x128xf32>
    %169 = vector.extract_strided_slice %154 {offsets = [0, 384], sizes = [1, 128], strides = [1, 1]} : vector<1x512xf32> to vector<1x128xf32>
    %170 = arith.negf %169 : vector<1x128xf32>
    %171 = math.exp %170 : vector<1x128xf32>
    %cst_33 = arith.constant 1.000000e+00 : f32
    %172 = vector.broadcast %cst_33 : f32 to vector<1x128xf32>
    %173 = arith.addf %172, %171 : vector<1x128xf32>
    %174 = arith.divf %172, %173 : vector<1x128xf32>
    %175 = arith.mulf %166, %149 : vector<1x128xf32>
    %176 = arith.mulf %160, %168 : vector<1x128xf32>
    %177 = arith.addf %175, %176 : vector<1x128xf32>
    %178 = math.tanh %177 : vector<1x128xf32>
    %179 = arith.mulf %174, %178 : vector<1x128xf32>
    %180 = vector.extract_strided_slice %9 {offsets = [6, 0], sizes = [1, 512], strides = [1, 1]} : vector<8x512xf32> to vector<1x512xf32>
    %cst_34 = arith.constant dense<0.000000e+00> : vector<1x512xf32>
    %181 = tpu.matmul %179, %1, %cst_34 {dimension_numbers = #tpu.dot_dimension_numbers<[1], [0], [0], [1], [0, 0, 1, 1], [], []>} : vector<1x128xf32>, vector<128x512xf32>, vector<1x512xf32> -> vector<1x512xf32>
    %182 = arith.addf %180, %181 : vector<1x512xf32>
    %183 = vector.extract_strided_slice %182 {offsets = [0, 0], sizes = [1, 128], strides = [1, 1]} : vector<1x512xf32> to vector<1x128xf32>
    %184 = arith.negf %183 : vector<1x128xf32>
    %185 = math.exp %184 : vector<1x128xf32>
    %cst_35 = arith.constant 1.000000e+00 : f32
    %186 = vector.broadcast %cst_35 : f32 to vector<1x128xf32>
    %187 = arith.addf %186, %185 : vector<1x128xf32>
    %188 = arith.divf %186, %187 : vector<1x128xf32>
    %189 = vector.extract_strided_slice %182 {offsets = [0, 128], sizes = [1, 128], strides = [1, 1]} : vector<1x512xf32> to vector<1x128xf32>
    %190 = arith.negf %189 : vector<1x128xf32>
    %191 = math.exp %190 : vector<1x128xf32>
    %cst_36 = arith.constant 1.000000e+00 : f32
    %192 = vector.broadcast %cst_36 : f32 to vector<1x128xf32>
    %193 = arith.addf %192, %191 : vector<1x128xf32>
    %194 = arith.divf %192, %193 : vector<1x128xf32>
    %195 = vector.extract_strided_slice %182 {offsets = [0, 256], sizes = [1, 128], strides = [1, 1]} : vector<1x512xf32> to vector<1x128xf32>
    %196 = math.tanh %195 : vector<1x128xf32>
    %197 = vector.extract_strided_slice %182 {offsets = [0, 384], sizes = [1, 128], strides = [1, 1]} : vector<1x512xf32> to vector<1x128xf32>
    %198 = arith.negf %197 : vector<1x128xf32>
    %199 = math.exp %198 : vector<1x128xf32>
    %cst_37 = arith.constant 1.000000e+00 : f32
    %200 = vector.broadcast %cst_37 : f32 to vector<1x128xf32>
    %201 = arith.addf %200, %199 : vector<1x128xf32>
    %202 = arith.divf %200, %201 : vector<1x128xf32>
    %203 = arith.mulf %194, %177 : vector<1x128xf32>
    %204 = arith.mulf %188, %196 : vector<1x128xf32>
    %205 = arith.addf %203, %204 : vector<1x128xf32>
    %206 = math.tanh %205 : vector<1x128xf32>
    %207 = arith.mulf %202, %206 : vector<1x128xf32>
    %208 = vector.extract_strided_slice %9 {offsets = [7, 0], sizes = [1, 512], strides = [1, 1]} : vector<8x512xf32> to vector<1x512xf32>
    %cst_38 = arith.constant dense<0.000000e+00> : vector<1x512xf32>
    %209 = tpu.matmul %207, %1, %cst_38 {dimension_numbers = #tpu.dot_dimension_numbers<[1], [0], [0], [1], [0, 0, 1, 1], [], []>} : vector<1x128xf32>, vector<128x512xf32>, vector<1x512xf32> -> vector<1x512xf32>
    %210 = arith.addf %208, %209 : vector<1x512xf32>
    %211 = vector.extract_strided_slice %210 {offsets = [0, 0], sizes = [1, 128], strides = [1, 1]} : vector<1x512xf32> to vector<1x128xf32>
    %212 = arith.negf %211 : vector<1x128xf32>
    %213 = math.exp %212 : vector<1x128xf32>
    %cst_39 = arith.constant 1.000000e+00 : f32
    %214 = vector.broadcast %cst_39 : f32 to vector<1x128xf32>
    %215 = arith.addf %214, %213 : vector<1x128xf32>
    %216 = arith.divf %214, %215 : vector<1x128xf32>
    %217 = vector.extract_strided_slice %210 {offsets = [0, 128], sizes = [1, 128], strides = [1, 1]} : vector<1x512xf32> to vector<1x128xf32>
    %218 = arith.negf %217 : vector<1x128xf32>
    %219 = math.exp %218 : vector<1x128xf32>
    %cst_40 = arith.constant 1.000000e+00 : f32
    %220 = vector.broadcast %cst_40 : f32 to vector<1x128xf32>
    %221 = arith.addf %220, %219 : vector<1x128xf32>
    %222 = arith.divf %220, %221 : vector<1x128xf32>
    %223 = vector.extract_strided_slice %210 {offsets = [0, 256], sizes = [1, 128], strides = [1, 1]} : vector<1x512xf32> to vector<1x128xf32>
    %224 = math.tanh %223 : vector<1x128xf32>
    %225 = vector.extract_strided_slice %210 {offsets = [0, 384], sizes = [1, 128], strides = [1, 1]} : vector<1x512xf32> to vector<1x128xf32>
    %226 = arith.negf %225 : vector<1x128xf32>
    %227 = math.exp %226 : vector<1x128xf32>
    %cst_41 = arith.constant 1.000000e+00 : f32
    %228 = vector.broadcast %cst_41 : f32 to vector<1x128xf32>
    %229 = arith.addf %228, %227 : vector<1x128xf32>
    %230 = arith.divf %228, %229 : vector<1x128xf32>
    %231 = arith.mulf %222, %205 : vector<1x128xf32>
    %232 = arith.mulf %216, %224 : vector<1x128xf32>
    %233 = arith.addf %231, %232 : vector<1x128xf32>
    %234 = math.tanh %233 : vector<1x128xf32>
    %235 = arith.mulf %230, %234 : vector<1x128xf32>
    %c0_42 = arith.constant 0 : index
    %c0_43 = arith.constant 0 : index
    %236 = vector.load %arg4[%c0_42, %c0_43] : memref<128x512xf32, #tpu.memory_space<vmem>>, vector<128x512xf32>
    %cst_44 = arith.constant dense<0.000000e+00> : vector<1x512xf32>
    %237 = tpu.matmul %235, %236, %cst_44 {dimension_numbers = #tpu.dot_dimension_numbers<[1], [0], [0], [1], [0, 0, 1, 1], [], []>} : vector<1x128xf32>, vector<128x512xf32>, vector<1x512xf32> -> vector<1x512xf32>
    %c0_45 = arith.constant 0 : index
    %c0_46 = arith.constant 0 : index
    %238 = vector.load %arg6[%c0_45, %c0_46] : memref<1x512xf32, #tpu.memory_space<vmem>>, vector<1x512xf32>
    %239 = arith.addf %237, %238 : vector<1x512xf32>
    %cst_47 = arith.constant 0.000000e+00 : f32
    %240 = vector.broadcast %cst_47 : f32 to vector<1x128xf32>
    %cst_48 = arith.constant 0.000000e+00 : f32
    %241 = vector.broadcast %cst_48 : f32 to vector<1x128xf32>
    %cst_49 = arith.constant dense<0.000000e+00> : vector<1x512xf32>
    %242 = tpu.matmul %240, %2, %cst_49 {dimension_numbers = #tpu.dot_dimension_numbers<[1], [0], [0], [1], [0, 0, 1, 1], [], []>} : vector<1x128xf32>, vector<128x512xf32>, vector<1x512xf32> -> vector<1x512xf32>
    %243 = arith.addf %239, %242 : vector<1x512xf32>
    %244 = vector.extract_strided_slice %243 {offsets = [0, 0], sizes = [1, 128], strides = [1, 1]} : vector<1x512xf32> to vector<1x128xf32>
    %245 = arith.negf %244 : vector<1x128xf32>
    %246 = math.exp %245 : vector<1x128xf32>
    %cst_50 = arith.constant 1.000000e+00 : f32
    %247 = vector.broadcast %cst_50 : f32 to vector<1x128xf32>
    %248 = arith.addf %247, %246 : vector<1x128xf32>
    %249 = arith.divf %247, %248 : vector<1x128xf32>
    %250 = vector.extract_strided_slice %243 {offsets = [0, 128], sizes = [1, 128], strides = [1, 1]} : vector<1x512xf32> to vector<1x128xf32>
    %251 = arith.negf %250 : vector<1x128xf32>
    %252 = math.exp %251 : vector<1x128xf32>
    %cst_51 = arith.constant 1.000000e+00 : f32
    %253 = vector.broadcast %cst_51 : f32 to vector<1x128xf32>
    %254 = arith.addf %253, %252 : vector<1x128xf32>
    %255 = arith.divf %253, %254 : vector<1x128xf32>
    %256 = vector.extract_strided_slice %243 {offsets = [0, 256], sizes = [1, 128], strides = [1, 1]} : vector<1x512xf32> to vector<1x128xf32>
    %257 = math.tanh %256 : vector<1x128xf32>
    %258 = vector.extract_strided_slice %243 {offsets = [0, 384], sizes = [1, 128], strides = [1, 1]} : vector<1x512xf32> to vector<1x128xf32>
    %259 = arith.negf %258 : vector<1x128xf32>
    %260 = math.exp %259 : vector<1x128xf32>
    %cst_52 = arith.constant 1.000000e+00 : f32
    %261 = vector.broadcast %cst_52 : f32 to vector<1x128xf32>
    %262 = arith.addf %261, %260 : vector<1x128xf32>
    %263 = arith.divf %261, %262 : vector<1x128xf32>
    %264 = arith.mulf %255, %241 : vector<1x128xf32>
    %265 = arith.mulf %249, %257 : vector<1x128xf32>
    %266 = arith.addf %264, %265 : vector<1x128xf32>
    %267 = math.tanh %266 : vector<1x128xf32>
    %268 = arith.mulf %263, %267 : vector<1x128xf32>
    %c0_53 = arith.constant 0 : index
    %c0_54 = arith.constant 0 : index
    %269 = vector.load %arg10[%c0_53, %c0_54] : memref<8x128xf32, #tpu.memory_space<vmem>>, vector<1x128xf32>
    tpu.vector_store %arg10[%c0_53, %c0_54], %268 {strides = array<i32>} : memref<8x128xf32, #tpu.memory_space<vmem>>, vector<1x128xf32>,
    %cst_55 = arith.constant dense<0.000000e+00> : vector<1x512xf32>
    %270 = tpu.matmul %268, %2, %cst_55 {dimension_numbers = #tpu.dot_dimension_numbers<[1], [0], [0], [1], [0, 0, 1, 1], [], []>} : vector<1x128xf32>, vector<128x512xf32>, vector<1x512xf32> -> vector<1x512xf32>
    %271 = arith.addf %239, %270 : vector<1x512xf32>
    %272 = vector.extract_strided_slice %271 {offsets = [0, 0], sizes = [1, 128], strides = [1, 1]} : vector<1x512xf32> to vector<1x128xf32>
    %273 = arith.negf %272 : vector<1x128xf32>
    %274 = math.exp %273 : vector<1x128xf32>
    %cst_56 = arith.constant 1.000000e+00 : f32
    %275 = vector.broadcast %cst_56 : f32 to vector<1x128xf32>
    %276 = arith.addf %275, %274 : vector<1x128xf32>
    %277 = arith.divf %275, %276 : vector<1x128xf32>
    %278 = vector.extract_strided_slice %271 {offsets = [0, 128], sizes = [1, 128], strides = [1, 1]} : vector<1x512xf32> to vector<1x128xf32>
    %279 = arith.negf %278 : vector<1x128xf32>
    %280 = math.exp %279 : vector<1x128xf32>
    %cst_57 = arith.constant 1.000000e+00 : f32
    %281 = vector.broadcast %cst_57 : f32 to vector<1x128xf32>
    %282 = arith.addf %281, %280 : vector<1x128xf32>
    %283 = arith.divf %281, %282 : vector<1x128xf32>
    %284 = vector.extract_strided_slice %271 {offsets = [0, 256], sizes = [1, 128], strides = [1, 1]} : vector<1x512xf32> to vector<1x128xf32>
    %285 = math.tanh %284 : vector<1x128xf32>
    %286 = vector.extract_strided_slice %271 {offsets = [0, 384], sizes = [1, 128], strides = [1, 1]} : vector<1x512xf32> to vector<1x128xf32>
    %287 = arith.negf %286 : vector<1x128xf32>
    %288 = math.exp %287 : vector<1x128xf32>
    %cst_58 = arith.constant 1.000000e+00 : f32
    %289 = vector.broadcast %cst_58 : f32 to vector<1x128xf32>
    %290 = arith.addf %289, %288 : vector<1x128xf32>
    %291 = arith.divf %289, %290 : vector<1x128xf32>
    %292 = arith.mulf %283, %266 : vector<1x128xf32>
    %293 = arith.mulf %277, %285 : vector<1x128xf32>
    %294 = arith.addf %292, %293 : vector<1x128xf32>
    %295 = math.tanh %294 : vector<1x128xf32>
    %296 = arith.mulf %291, %295 : vector<1x128xf32>
    %c1 = arith.constant 1 : index
    %c0_59 = arith.constant 0 : index
    %297 = vector.load %arg10[%c1, %c0_59] : memref<8x128xf32, #tpu.memory_space<vmem>>, vector<1x128xf32>
    tpu.vector_store %arg10[%c1, %c0_59], %296 {strides = array<i32>} : memref<8x128xf32, #tpu.memory_space<vmem>>, vector<1x128xf32>,
    %cst_60 = arith.constant dense<0.000000e+00> : vector<1x512xf32>
    %298 = tpu.matmul %296, %2, %cst_60 {dimension_numbers = #tpu.dot_dimension_numbers<[1], [0], [0], [1], [0, 0, 1, 1], [], []>} : vector<1x128xf32>, vector<128x512xf32>, vector<1x512xf32> -> vector<1x512xf32>
    %299 = arith.addf %239, %298 : vector<1x512xf32>
    %300 = vector.extract_strided_slice %299 {offsets = [0, 0], sizes = [1, 128], strides = [1, 1]} : vector<1x512xf32> to vector<1x128xf32>
    %301 = arith.negf %300 : vector<1x128xf32>
    %302 = math.exp %301 : vector<1x128xf32>
    %cst_61 = arith.constant 1.000000e+00 : f32
    %303 = vector.broadcast %cst_61 : f32 to vector<1x128xf32>
    %304 = arith.addf %303, %302 : vector<1x128xf32>
    %305 = arith.divf %303, %304 : vector<1x128xf32>
    %306 = vector.extract_strided_slice %299 {offsets = [0, 128], sizes = [1, 128], strides = [1, 1]} : vector<1x512xf32> to vector<1x128xf32>
    %307 = arith.negf %306 : vector<1x128xf32>
    %308 = math.exp %307 : vector<1x128xf32>
    %cst_62 = arith.constant 1.000000e+00 : f32
    %309 = vector.broadcast %cst_62 : f32 to vector<1x128xf32>
    %310 = arith.addf %309, %308 : vector<1x128xf32>
    %311 = arith.divf %309, %310 : vector<1x128xf32>
    %312 = vector.extract_strided_slice %299 {offsets = [0, 256], sizes = [1, 128], strides = [1, 1]} : vector<1x512xf32> to vector<1x128xf32>
    %313 = math.tanh %312 : vector<1x128xf32>
    %314 = vector.extract_strided_slice %299 {offsets = [0, 384], sizes = [1, 128], strides = [1, 1]} : vector<1x512xf32> to vector<1x128xf32>
    %315 = arith.negf %314 : vector<1x128xf32>
    %316 = math.exp %315 : vector<1x128xf32>
    %cst_63 = arith.constant 1.000000e+00 : f32
    %317 = vector.broadcast %cst_63 : f32 to vector<1x128xf32>
    %318 = arith.addf %317, %316 : vector<1x128xf32>
    %319 = arith.divf %317, %318 : vector<1x128xf32>
    %320 = arith.mulf %311, %294 : vector<1x128xf32>
    %321 = arith.mulf %305, %313 : vector<1x128xf32>
    %322 = arith.addf %320, %321 : vector<1x128xf32>
    %323 = math.tanh %322 : vector<1x128xf32>
    %324 = arith.mulf %319, %323 : vector<1x128xf32>
    %c2 = arith.constant 2 : index
    %c0_64 = arith.constant 0 : index
    %325 = vector.load %arg10[%c2, %c0_64] : memref<8x128xf32, #tpu.memory_space<vmem>>, vector<1x128xf32>
    tpu.vector_store %arg10[%c2, %c0_64], %324 {strides = array<i32>} : memref<8x128xf32, #tpu.memory_space<vmem>>, vector<1x128xf32>,
    %cst_65 = arith.constant dense<0.000000e+00> : vector<1x512xf32>
    %326 = tpu.matmul %324, %2, %cst_65 {dimension_numbers = #tpu.dot_dimension_numbers<[1], [0], [0], [1], [0, 0, 1, 1], [], []>} : vector<1x128xf32>, vector<128x512xf32>, vector<1x512xf32> -> vector<1x512xf32>
    %327 = arith.addf %239, %326 : vector<1x512xf32>
    %328 = vector.extract_strided_slice %327 {offsets = [0, 0], sizes = [1, 128], strides = [1, 1]} : vector<1x512xf32> to vector<1x128xf32>
    %329 = arith.negf %328 : vector<1x128xf32>
    %330 = math.exp %329 : vector<1x128xf32>
    %cst_66 = arith.constant 1.000000e+00 : f32
    %331 = vector.broadcast %cst_66 : f32 to vector<1x128xf32>
    %332 = arith.addf %331, %330 : vector<1x128xf32>
    %333 = arith.divf %331, %332 : vector<1x128xf32>
    %334 = vector.extract_strided_slice %327 {offsets = [0, 128], sizes = [1, 128], strides = [1, 1]} : vector<1x512xf32> to vector<1x128xf32>
    %335 = arith.negf %334 : vector<1x128xf32>
    %336 = math.exp %335 : vector<1x128xf32>
    %cst_67 = arith.constant 1.000000e+00 : f32
    %337 = vector.broadcast %cst_67 : f32 to vector<1x128xf32>
    %338 = arith.addf %337, %336 : vector<1x128xf32>
    %339 = arith.divf %337, %338 : vector<1x128xf32>
    %340 = vector.extract_strided_slice %327 {offsets = [0, 256], sizes = [1, 128], strides = [1, 1]} : vector<1x512xf32> to vector<1x128xf32>
    %341 = math.tanh %340 : vector<1x128xf32>
    %342 = vector.extract_strided_slice %327 {offsets = [0, 384], sizes = [1, 128], strides = [1, 1]} : vector<1x512xf32> to vector<1x128xf32>
    %343 = arith.negf %342 : vector<1x128xf32>
    %344 = math.exp %343 : vector<1x128xf32>
    %cst_68 = arith.constant 1.000000e+00 : f32
    %345 = vector.broadcast %cst_68 : f32 to vector<1x128xf32>
    %346 = arith.addf %345, %344 : vector<1x128xf32>
    %347 = arith.divf %345, %346 : vector<1x128xf32>
    %348 = arith.mulf %339, %322 : vector<1x128xf32>
    %349 = arith.mulf %333, %341 : vector<1x128xf32>
    %350 = arith.addf %348, %349 : vector<1x128xf32>
    %351 = math.tanh %350 : vector<1x128xf32>
    %352 = arith.mulf %347, %351 : vector<1x128xf32>
    %c3 = arith.constant 3 : index
    %c0_69 = arith.constant 0 : index
    %353 = vector.load %arg10[%c3, %c0_69] : memref<8x128xf32, #tpu.memory_space<vmem>>, vector<1x128xf32>
    tpu.vector_store %arg10[%c3, %c0_69], %352 {strides = array<i32>} : memref<8x128xf32, #tpu.memory_space<vmem>>, vector<1x128xf32>,
    %cst_70 = arith.constant dense<0.000000e+00> : vector<1x512xf32>
    %354 = tpu.matmul %352, %2, %cst_70 {dimension_numbers = #tpu.dot_dimension_numbers<[1], [0], [0], [1], [0, 0, 1, 1], [], []>} : vector<1x128xf32>, vector<128x512xf32>, vector<1x512xf32> -> vector<1x512xf32>
    %355 = arith.addf %239, %354 : vector<1x512xf32>
    %356 = vector.extract_strided_slice %355 {offsets = [0, 0], sizes = [1, 128], strides = [1, 1]} : vector<1x512xf32> to vector<1x128xf32>
    %357 = arith.negf %356 : vector<1x128xf32>
    %358 = math.exp %357 : vector<1x128xf32>
    %cst_71 = arith.constant 1.000000e+00 : f32
    %359 = vector.broadcast %cst_71 : f32 to vector<1x128xf32>
    %360 = arith.addf %359, %358 : vector<1x128xf32>
    %361 = arith.divf %359, %360 : vector<1x128xf32>
    %362 = vector.extract_strided_slice %355 {offsets = [0, 128], sizes = [1, 128], strides = [1, 1]} : vector<1x512xf32> to vector<1x128xf32>
    %363 = arith.negf %362 : vector<1x128xf32>
    %364 = math.exp %363 : vector<1x128xf32>
    %cst_72 = arith.constant 1.000000e+00 : f32
    %365 = vector.broadcast %cst_72 : f32 to vector<1x128xf32>
    %366 = arith.addf %365, %364 : vector<1x128xf32>
    %367 = arith.divf %365, %366 : vector<1x128xf32>
    %368 = vector.extract_strided_slice %355 {offsets = [0, 256], sizes = [1, 128], strides = [1, 1]} : vector<1x512xf32> to vector<1x128xf32>
    %369 = math.tanh %368 : vector<1x128xf32>
    %370 = vector.extract_strided_slice %355 {offsets = [0, 384], sizes = [1, 128], strides = [1, 1]} : vector<1x512xf32> to vector<1x128xf32>
    %371 = arith.negf %370 : vector<1x128xf32>
    %372 = math.exp %371 : vector<1x128xf32>
    %cst_73 = arith.constant 1.000000e+00 : f32
    %373 = vector.broadcast %cst_73 : f32 to vector<1x128xf32>
    %374 = arith.addf %373, %372 : vector<1x128xf32>
    %375 = arith.divf %373, %374 : vector<1x128xf32>
    %376 = arith.mulf %367, %350 : vector<1x128xf32>
    %377 = arith.mulf %361, %369 : vector<1x128xf32>
    %378 = arith.addf %376, %377 : vector<1x128xf32>
    %379 = math.tanh %378 : vector<1x128xf32>
    %380 = arith.mulf %375, %379 : vector<1x128xf32>
    %c4 = arith.constant 4 : index
    %c0_74 = arith.constant 0 : index
    %381 = vector.load %arg10[%c4, %c0_74] : memref<8x128xf32, #tpu.memory_space<vmem>>, vector<1x128xf32>
    tpu.vector_store %arg10[%c4, %c0_74], %380 {strides = array<i32>} : memref<8x128xf32, #tpu.memory_space<vmem>>, vector<1x128xf32>,
    %cst_75 = arith.constant dense<0.000000e+00> : vector<1x512xf32>
    %382 = tpu.matmul %380, %2, %cst_75 {dimension_numbers = #tpu.dot_dimension_numbers<[1], [0], [0], [1], [0, 0, 1, 1], [], []>} : vector<1x128xf32>, vector<128x512xf32>, vector<1x512xf32> -> vector<1x512xf32>
    %383 = arith.addf %239, %382 : vector<1x512xf32>
    %384 = vector.extract_strided_slice %383 {offsets = [0, 0], sizes = [1, 128], strides = [1, 1]} : vector<1x512xf32> to vector<1x128xf32>
    %385 = arith.negf %384 : vector<1x128xf32>
    %386 = math.exp %385 : vector<1x128xf32>
    %cst_76 = arith.constant 1.000000e+00 : f32
    %387 = vector.broadcast %cst_76 : f32 to vector<1x128xf32>
    %388 = arith.addf %387, %386 : vector<1x128xf32>
    %389 = arith.divf %387, %388 : vector<1x128xf32>
    %390 = vector.extract_strided_slice %383 {offsets = [0, 128], sizes = [1, 128], strides = [1, 1]} : vector<1x512xf32> to vector<1x128xf32>
    %391 = arith.negf %390 : vector<1x128xf32>
    %392 = math.exp %391 : vector<1x128xf32>
    %cst_77 = arith.constant 1.000000e+00 : f32
    %393 = vector.broadcast %cst_77 : f32 to vector<1x128xf32>
    %394 = arith.addf %393, %392 : vector<1x128xf32>
    %395 = arith.divf %393, %394 : vector<1x128xf32>
    %396 = vector.extract_strided_slice %383 {offsets = [0, 256], sizes = [1, 128], strides = [1, 1]} : vector<1x512xf32> to vector<1x128xf32>
    %397 = math.tanh %396 : vector<1x128xf32>
    %398 = vector.extract_strided_slice %383 {offsets = [0, 384], sizes = [1, 128], strides = [1, 1]} : vector<1x512xf32> to vector<1x128xf32>
    %399 = arith.negf %398 : vector<1x128xf32>
    %400 = math.exp %399 : vector<1x128xf32>
    %cst_78 = arith.constant 1.000000e+00 : f32
    %401 = vector.broadcast %cst_78 : f32 to vector<1x128xf32>
    %402 = arith.addf %401, %400 : vector<1x128xf32>
    %403 = arith.divf %401, %402 : vector<1x128xf32>
    %404 = arith.mulf %395, %378 : vector<1x128xf32>
    %405 = arith.mulf %389, %397 : vector<1x128xf32>
    %406 = arith.addf %404, %405 : vector<1x128xf32>
    %407 = math.tanh %406 : vector<1x128xf32>
    %408 = arith.mulf %403, %407 : vector<1x128xf32>
    %c5 = arith.constant 5 : index
    %c0_79 = arith.constant 0 : index
    %409 = vector.load %arg10[%c5, %c0_79] : memref<8x128xf32, #tpu.memory_space<vmem>>, vector<1x128xf32>
    tpu.vector_store %arg10[%c5, %c0_79], %408 {strides = array<i32>} : memref<8x128xf32, #tpu.memory_space<vmem>>, vector<1x128xf32>,
    %cst_80 = arith.constant dense<0.000000e+00> : vector<1x512xf32>
    %410 = tpu.matmul %408, %2, %cst_80 {dimension_numbers = #tpu.dot_dimension_numbers<[1], [0], [0], [1], [0, 0, 1, 1], [], []>} : vector<1x128xf32>, vector<128x512xf32>, vector<1x512xf32> -> vector<1x512xf32>
    %411 = arith.addf %239, %410 : vector<1x512xf32>
    %412 = vector.extract_strided_slice %411 {offsets = [0, 0], sizes = [1, 128], strides = [1, 1]} : vector<1x512xf32> to vector<1x128xf32>
    %413 = arith.negf %412 : vector<1x128xf32>
    %414 = math.exp %413 : vector<1x128xf32>
    %cst_81 = arith.constant 1.000000e+00 : f32
    %415 = vector.broadcast %cst_81 : f32 to vector<1x128xf32>
    %416 = arith.addf %415, %414 : vector<1x128xf32>
    %417 = arith.divf %415, %416 : vector<1x128xf32>
    %418 = vector.extract_strided_slice %411 {offsets = [0, 128], sizes = [1, 128], strides = [1, 1]} : vector<1x512xf32> to vector<1x128xf32>
    %419 = arith.negf %418 : vector<1x128xf32>
    %420 = math.exp %419 : vector<1x128xf32>
    %cst_82 = arith.constant 1.000000e+00 : f32
    %421 = vector.broadcast %cst_82 : f32 to vector<1x128xf32>
    %422 = arith.addf %421, %420 : vector<1x128xf32>
    %423 = arith.divf %421, %422 : vector<1x128xf32>
    %424 = vector.extract_strided_slice %411 {offsets = [0, 256], sizes = [1, 128], strides = [1, 1]} : vector<1x512xf32> to vector<1x128xf32>
    %425 = math.tanh %424 : vector<1x128xf32>
    %426 = vector.extract_strided_slice %411 {offsets = [0, 384], sizes = [1, 128], strides = [1, 1]} : vector<1x512xf32> to vector<1x128xf32>
    %427 = arith.negf %426 : vector<1x128xf32>
    %428 = math.exp %427 : vector<1x128xf32>
    %cst_83 = arith.constant 1.000000e+00 : f32
    %429 = vector.broadcast %cst_83 : f32 to vector<1x128xf32>
    %430 = arith.addf %429, %428 : vector<1x128xf32>
    %431 = arith.divf %429, %430 : vector<1x128xf32>
    %432 = arith.mulf %423, %406 : vector<1x128xf32>
    %433 = arith.mulf %417, %425 : vector<1x128xf32>
    %434 = arith.addf %432, %433 : vector<1x128xf32>
    %435 = math.tanh %434 : vector<1x128xf32>
    %436 = arith.mulf %431, %435 : vector<1x128xf32>
    %c6 = arith.constant 6 : index
    %c0_84 = arith.constant 0 : index
    %437 = vector.load %arg10[%c6, %c0_84] : memref<8x128xf32, #tpu.memory_space<vmem>>, vector<1x128xf32>
    tpu.vector_store %arg10[%c6, %c0_84], %436 {strides = array<i32>} : memref<8x128xf32, #tpu.memory_space<vmem>>, vector<1x128xf32>,
    %cst_85 = arith.constant dense<0.000000e+00> : vector<1x512xf32>
    %438 = tpu.matmul %436, %2, %cst_85 {dimension_numbers = #tpu.dot_dimension_numbers<[1], [0], [0], [1], [0, 0, 1, 1], [], []>} : vector<1x128xf32>, vector<128x512xf32>, vector<1x512xf32> -> vector<1x512xf32>
    %439 = arith.addf %239, %438 : vector<1x512xf32>
    %440 = vector.extract_strided_slice %439 {offsets = [0, 0], sizes = [1, 128], strides = [1, 1]} : vector<1x512xf32> to vector<1x128xf32>
    %441 = arith.negf %440 : vector<1x128xf32>
    %442 = math.exp %441 : vector<1x128xf32>
    %cst_86 = arith.constant 1.000000e+00 : f32
    %443 = vector.broadcast %cst_86 : f32 to vector<1x128xf32>
    %444 = arith.addf %443, %442 : vector<1x128xf32>
    %445 = arith.divf %443, %444 : vector<1x128xf32>
    %446 = vector.extract_strided_slice %439 {offsets = [0, 128], sizes = [1, 128], strides = [1, 1]} : vector<1x512xf32> to vector<1x128xf32>
    %447 = arith.negf %446 : vector<1x128xf32>
    %448 = math.exp %447 : vector<1x128xf32>
    %cst_87 = arith.constant 1.000000e+00 : f32
    %449 = vector.broadcast %cst_87 : f32 to vector<1x128xf32>
    %450 = arith.addf %449, %448 : vector<1x128xf32>
    %451 = arith.divf %449, %450 : vector<1x128xf32>
    %452 = vector.extract_strided_slice %439 {offsets = [0, 256], sizes = [1, 128], strides = [1, 1]} : vector<1x512xf32> to vector<1x128xf32>
    %453 = math.tanh %452 : vector<1x128xf32>
    %454 = vector.extract_strided_slice %439 {offsets = [0, 384], sizes = [1, 128], strides = [1, 1]} : vector<1x512xf32> to vector<1x128xf32>
    %455 = arith.negf %454 : vector<1x128xf32>
    %456 = math.exp %455 : vector<1x128xf32>
    %cst_88 = arith.constant 1.000000e+00 : f32
    %457 = vector.broadcast %cst_88 : f32 to vector<1x128xf32>
    %458 = arith.addf %457, %456 : vector<1x128xf32>
    %459 = arith.divf %457, %458 : vector<1x128xf32>
    %460 = arith.mulf %451, %434 : vector<1x128xf32>
    %461 = arith.mulf %445, %453 : vector<1x128xf32>
    %462 = arith.addf %460, %461 : vector<1x128xf32>
    %463 = math.tanh %462 : vector<1x128xf32>
    %464 = arith.mulf %459, %463 : vector<1x128xf32>
    %c7 = arith.constant 7 : index
    %c0_89 = arith.constant 0 : index
    %465 = vector.load %arg10[%c7, %c0_89] : memref<8x128xf32, #tpu.memory_space<vmem>>, vector<1x128xf32>
    tpu.vector_store %arg10[%c7, %c0_89], %464 {strides = array<i32>} : memref<8x128xf32, #tpu.memory_space<vmem>>, vector<1x128xf32>,
    %c0_90 = arith.constant 0 : index
    %c0_91 = arith.constant 0 : index
    %466 = vector.load %arg10[%c0_90, %c0_91] : memref<8x128xf32, #tpu.memory_space<vmem>>, vector<8x128xf32>
    %c0_92 = arith.constant 0 : index
    %c0_93 = arith.constant 0 : index
    %467 = vector.load %arg7[%c0_92, %c0_93] : memref<1x128xf32, #tpu.memory_space<vmem>>, vector<1x128xf32>
    %468 = vector.broadcast %467 : vector<1x128xf32> to vector<8x128xf32>
    %469 = arith.mulf %466, %468 : vector<8x128xf32>
    %cst_94 = arith.constant dense<0.000000e+00> : vector<8xf32>
    %470 = vector.multi_reduction <add>, %469, %cst_94 [1] : vector<8x128xf32> to vector<8xf32>
    %471 = vector.shape_cast %470 : vector<8xf32> to vector<8x1xf32>
    %c0_95 = arith.constant 0 : index
    %c0_96 = arith.constant 0 : index
    %472 = vector.load %arg8[%c0_95, %c0_96] : memref<1x1xf32, #tpu.memory_space<vmem>>, vector<1x1xf32>
    %473 = vector.broadcast %472 : vector<1x1xf32> to vector<8x1xf32>
    %474 = arith.addf %471, %473 : vector<8x1xf32>
    %c0_97 = arith.constant 0 : index
    %c0_98 = arith.constant 0 : index
    %475 = vector.load %arg9[%c0_97, %c0_98] : memref<8x1xf32, #tpu.memory_space<vmem>>, vector<8x1xf32>
    tpu.vector_store %arg9[%c0_97, %c0_98], %474 {strides = array<i32>} : memref<8x1xf32, #tpu.memory_space<vmem>>, vector<8x1xf32>,
    return
  }
}

</mosaic_0001>

<bundles_post_ra>
// kernel: tpu_custom_call.1
= control target key start
LH: loop header
LB: loop body
LE: loop exit
PB: predicated region body
PF: predicated region fallthrough
CT: control target
= control target key end

     0   :  { %s5802_s0 = inlined_call_operand.vmem [shape: f32[8,1], index: 0, kind: input, shape index: {}]   ;;  %s5803_s1 = inlined_call_operand.vmem [shape: f32[1,512], index: 1, kind: input, shape index: {}]   ;;  %s5804_s2 = inlined_call_operand.hbm [shape: f32[128,512], index: 2, kind: input, shape index: {}]   ;;  %s5805_s3 = inlined_call_operand.vmem [shape: f32[1,512], index: 3, kind: input, shape index: {}]   ;;  %s5806_s4 = inlined_call_operand.hbm [shape: f32[128,512], index: 4, kind: input, shape index: {}]   ;;  %s5807_s5 = inlined_call_operand.hbm [shape: f32[128,512], index: 5, kind: input, shape index: {}]   ;;  %s5808_s6 = inlined_call_operand.vmem [shape: f32[1,512], index: 6, kind: input, shape index: {}]   ;;  %s5809_s7 = inlined_call_operand.vmem [shape: f32[1,128], index: 7, kind: input, shape index: {}]   ;;  %s5810_s8 = inlined_call_operand.<no memory space> [shape: f32[1,1], index: 8, kind: input, shape index: {}]   ;;  %s5811_s9 = inlined_call_operand.vmem [shape: f32[8,1], index: 9, kind: output, shape index: {}]  }
   0x1   :  { %v14_v0 = vstv %s5810_s8 }
   0x2   :  { %15 = vst [vmem:[#allocation3] sm:$0x1] %v14_v0 }
   0x3   :  { %16 = vsyncpa [#allocation5], 0 }
   0x4   :  { %17 = vsyncpa [#allocation7], 0  ;;  %s4842_s11 = smov [#allocation6]   ;;  %s4843_s13 = smov [#allocation4]  }
   0x5   :  { %s41_s12 = sshll.u32 %s4842_s11, 4  ;;  %s27_s14 = sshll.u32 %s4843_s13, 4  ;;  %s42_s12 = int_to_ptr.vmem [resolvable:$true] %s41_s12  ;;  %s4902_s14 = int_to_ptr.vmem [resolvable:$true] %s27_s14 }
   0x6   :  { %s4772_s17 = scalar_lea.hbm %s5806_s4, 8192 }
   0x7   :  { %p4773_p0 = scmp.ne.s32.totalorder %s5806_s4, %s4772_s17  ;;  %p4776_p1 = scmp.lt.u32.totalorder %s4772_s17, %s5806_s4 }
   0x9   :  { %p4778_p2 = pnand %p4776_p1, %p4773_p0 }
   0xb   :  { %4781 = shalt.err (!%p4778_p2)
}
   0xc   :  { %s4782_s21 = scalar_lea.vmem %s42_s12, 8192  ;;  %p4787_p4 = scmp.lt.s32.totalorder %s42_s12, %s42_s12 }
   0xd   :  { %p4783_p3 = scmp.ne.s32.totalorder %s42_s12, %s4782_s21  ;;  %p4788_p5 = scmp.lt.s32.totalorder %s4782_s21, %s4782_s21 }
   0xf   :  { %p4789_p6 = por %p4788_p5, %p4787_p4 }
  0x11   :  { %p4790_p7 = pnand %p4789_p6, %p4783_p3 }
  0x13   :  { %4793 = shalt.err (!%p4790_p7)
}
  0x14   :  { %s4844_s22 = smov 512   ;;  %s4845_s23 = smov 32  }
  0x15   :  { %47 = dma.hbm_to_vmem [thread:$0]  %s5806_s4, 8192, %s42_s12, [#allocation7], %s4844_s22, %s4844_s22, %s4845_s23  }
  0x16   :  { %s4794_s28 = scalar_lea.hbm %s5804_s2, 8192 }
  0x17   :  { %p4795_p8 = scmp.ne.s32.totalorder %s5804_s2, %s4794_s28  ;;  %p4798_p9 = scmp.lt.u32.totalorder %s4794_s28, %s5804_s2 }
  0x19   :  { %p4800_p10 = pnand %p4798_p9, %p4795_p8 }
  0x1b   :  { %4803 = shalt.err (!%p4800_p10)
}
  0x1c   :  { %s4804_s13 = scalar_lea.vmem %s4902_s14, 8192  ;;  %p4809_p12 = scmp.lt.s32.totalorder %s4902_s14, %s4902_s14 }
  0x1d   :  { %p4805_p11 = scmp.ne.s32.totalorder %s4902_s14, %s4804_s13  ;;  %p4810_p13 = scmp.lt.s32.totalorder %s4804_s13, %s4804_s13 }
  0x1f   :  { %p4811_p0 = por %p4810_p13, %p4809_p12 }
  0x21   :  { %p4812_p1 = pnand %p4811_p0, %p4805_p11 }
  0x23   :  { %4815 = shalt.err (!%p4812_p1)
}
  0x24   :  { %33 = dma.hbm_to_vmem [thread:$0]  %s5804_s2, 8192, %s4902_s14, [#allocation5], %s4844_s22, %s4844_s22, %s4845_s23  }
  0x25   :  { %s4846_s15 = smov [#allocation8]   ;;  %s4816_s19 = scalar_lea.hbm %s5807_s5, 8192 }
  0x26   :  { %s53_s16 = sshll.u32 %s4846_s15, 4  ;;  %p4817_p2 = scmp.ne.s32.totalorder %s5807_s5, %s4816_s19  ;;  %s54_s16 = int_to_ptr.vmem [resolvable:$true] %s53_s16 }
  0x27   :  { %p4820_p3 = scmp.lt.u32.totalorder %s4816_s19, %s5807_s5 }
  0x29   :  { %p4822_p4 = pnand %p4820_p3, %p4817_p2 }
  0x2b   :  { %4825 = shalt.err (!%p4822_p4)
}
  0x2c   :  { %s4826_s25 = scalar_lea.vmem %s54_s16, 8192  ;;  %p4831_p6 = scmp.lt.s32.totalorder %s54_s16, %s54_s16 }
  0x2d   :  { %p4827_p5 = scmp.ne.s32.totalorder %s54_s16, %s4826_s25  ;;  %p4832_p7 = scmp.lt.s32.totalorder %s4826_s25, %s4826_s25 }
  0x2f   :  { %p4833_p8 = por %p4832_p7, %p4831_p6 }
  0x31   :  { %p4834_p9 = pnand %p4833_p8, %p4827_p5 }
  0x33   :  { %4837 = shalt.err (!%p4834_p9)
}
  0x34   :  { %59 = dma.hbm_to_vmem [thread:$0]  %s5807_s5, 8192, %s54_s16, [#allocation7], %s4844_s22, %s4844_s22, %s4845_s23  }
  0x35   :  { %4838 = dma.done.wait [#allocation5], 8192  }
  0x36   :  { %4839 = vsyncadd [#allocation5], 4294959104 }
  0x37   :  { %4840 = dma.done.wait [#allocation7], 16384  }
  0x38   :  { %4841 = vsyncadd [#allocation7], 4294950912  ;;  %v4847_v1 = vmov 0.0   ;;  %v4848_v2 = vmov 0   ;;  %v77_v3 = vld [vmem:[#allocation4 + $0x8] sm:$0xff]  ;;  %v79_v5 = vld [vmem:[#allocation4 + $0x18] sm:$0xff] }
  0x39   :  { %325 = vmatprep.mubr.f32.mxu0 %v4847_v1  ;;  %396 = vmatprep.mubr.f32.mxu1 %v4847_v1  ;;  %v81_v4 = vld [vmem:[#allocation4 + $0x28] sm:$0xff]  ;;  %v83_v7 = vld [vmem:[#allocation4 + $0x38] sm:$0xff]  ;;  %v76_v8 = vld [vmem:[#allocation4] sm:$0xff]  ;;  %vm3362_vm0 = vcmask 7168  }
  0x3a   :  { %4515 = vset.pattern.permute.xlu0 %v4848_v2  ;;  %v4956_v6 = vpack.c.bf16 %v81_v4, %v77_v3  ;;  %v80_v9 = vld [vmem:[#allocation4 + $0x20] sm:$0xff]  ;;  %v4958_v10 = vpack.c.bf16 %v83_v7, %v79_v5  ;;  %v78_v12 = vld [vmem:[#allocation4 + $0x10] sm:$0xff]  ;;  %v85_v14 = vld [vmem:[#allocation4 + $0x48] sm:$0xff] }
  0x3b   :  { %v4960_v11 = vpack.c.bf16 %v80_v9, %v76_v8  ;;  %v82_v13 = vld [vmem:[#allocation4 + $0x30] sm:$0xff]  ;;  %v89_v16 = vld [vmem:[#allocation4 + $0x68] sm:$0xff]  ;;  %v87_v17 = vld [vmem:[#allocation4 + $0x58] sm:$0xff] }
  0x3c   :  { %3421 = vmatprep.subr.bf16.mxu0 %v4956_v6  ;;  %v4963_v15 = vpack.c.bf16 %v82_v13, %v78_v12  ;;  %v91_v18 = vld [vmem:[#allocation4 + $0x78] sm:$0xff]  ;;  %3453 = vmatprep.subr.bf16.mxu1 %v4958_v10  ;;  %v4967_v19 = vpack.c.bf16 %v89_v16, %v85_v14  ;;  %v84_v21 = vld [vmem:[#allocation4 + $0x40] sm:$0xff]  ;;  %v86_v23 = vld [vmem:[#allocation4 + $0x50] sm:$0xff] }
  0x3d   :  { %3423 = vmatpush1.bf16.msra.mxu0 %v4960_v11  ;;  %v4969_v20 = vpack.c.bf16 %v91_v18, %v87_v17  ;;  %v88_v22 = vld [vmem:[#allocation4 + $0x60] sm:$0xff]  ;;  %v90_v25 = vld [vmem:[#allocation4 + $0x70] sm:$0xff]  ;;  %v93_v26 = vld [vmem:[#allocation4 + $0x88] sm:$0xff] }
  0x3e   :  { %3455 = vmatpush1.bf16.msra.mxu1 %v4963_v15  ;;  %v4972_v24 = vpack.c.bf16 %v88_v22, %v84_v21  ;;  %v97_v27 = vld [vmem:[#allocation4 + $0xa8] sm:$0xff]  ;;  %3425 = vmatprep.subr.bf16.mxu0 %v4967_v19  ;;  %v4976_v28 = vpack.c.bf16 %v90_v25, %v86_v23  ;;  %v95_v30 = vld [vmem:[#allocation4 + $0x98] sm:$0xff]  ;;  %v92_v32 = vld [vmem:[#allocation4 + $0x80] sm:$0xff] }
  0x3f   :  { %3457 = vmatprep.subr.bf16.mxu1 %v4969_v20  ;;  %v4978_v29 = vpack.c.bf16 %v97_v27, %v93_v26  ;;  %v99_v31 = vld [vmem:[#allocation4 + $0xb8] sm:$0xff]  ;;  %v96_v34 = vld [vmem:[#allocation4 + $0xa0] sm:$0xff]  ;;  %v94_v35 = vld [vmem:[#allocation4 + $0x90] sm:$0xff] }
  0x40   :  { %v4980_v33 = vpack.c.bf16 %v99_v31, %v95_v30  ;;  %v98_v36 = vld [vmem:[#allocation4 + $0xb0] sm:$0xff]  ;;  %v4983_v37 = vpack.c.bf16 %v96_v34, %v92_v32  ;;  %v101_v38 = vld [vmem:[#allocation4 + $0xc8] sm:$0xff]  ;;  %v103_v40 = vld [vmem:[#allocation4 + $0xd8] sm:$0xff] }
  0x41   :  { %3427 = vmatpush1.bf16.msra.mxu0 %v4972_v24  ;;  %v105_v39 = vld [vmem:[#allocation4 + $0xe8] sm:$0xff]  ;;  %v4987_v41 = vpack.c.bf16 %v98_v36, %v94_v35  ;;  %v107_v43 = vld [vmem:[#allocation4 + $0xf8] sm:$0xff]  ;;  %v100_v44 = vld [vmem:[#allocation4 + $0xc0] sm:$0xff] }
  0x42   :  { %3459 = vmatpush1.bf16.msra.mxu1 %v4976_v28  ;;  %3429 = vmatprep.subr.bf16.mxu0 %v4978_v29  ;;  %v4989_v42 = vpack.c.bf16 %v105_v39, %v101_v38  ;;  %v104_v45 = vld [vmem:[#allocation4 + $0xe0] sm:$0xff]  ;;  %v4992_v46 = vpack.c.bf16 %v107_v43, %v103_v40  ;;  %v102_v47 = vld [vmem:[#allocation4 + $0xd0] sm:$0xff]  ;;  %v109_v49 = vld [vmem:[#allocation4 + $0x108] sm:$0xff] }
  0x43   :  { %3461 = vmatprep.subr.bf16.mxu1 %v4980_v33  ;;  %v106_v48 = vld [vmem:[#allocation4 + $0xf0] sm:$0xff]  ;;  %v113_v50 = vld [vmem:[#allocation4 + $0x128] sm:$0xff]  ;;  %v111_v51 = vld [vmem:[#allocation4 + $0x118] sm:$0xff]  ;;  %v4995_v53 = vpack.c.bf16 %v104_v45, %v100_v44 }
  0x44   :  { %v115_v52 = vld [vmem:[#allocation4 + $0x138] sm:$0xff]  ;;  %v4999_v54 = vpack.c.bf16 %v106_v48, %v102_v47  ;;  %v5001_v55 = vpack.c.bf16 %v113_v50, %v109_v49  ;;  %v108_v56 = vld [vmem:[#allocation4 + $0x100] sm:$0xff]  ;;  %v110_v58 = vld [vmem:[#allocation4 + $0x110] sm:$0xff] }
  0x45   :  { %3431 = vmatpush1.bf16.msra.mxu0 %v4983_v37  ;;  %v112_v57 = vld [vmem:[#allocation4 + $0x120] sm:$0xff]  ;;  %v5004_v59 = vpack.c.bf16 %v115_v52, %v111_v51  ;;  %v114_v60 = vld [vmem:[#allocation4 + $0x130] sm:$0xff]  ;;  %v117_v61 = vld [vmem:[#allocation4 + $0x148] sm:$0xff]  ;;  %v211_v51 = vlaneseq }
  0x46   :  { %3463 = vmatpush1.bf16.msra.mxu1 %v4987_v41  ;;  %3433 = vmatprep.subr.bf16.mxu0 %v4989_v42  ;;  %v121_v62 = vld [vmem:[#allocation4 + $0x168] sm:$0xff]  ;;  %v119_v63 = vld [vmem:[#allocation4 + $0x158] sm:$0xff]  ;;  %v5007_v2 = vpack.c.bf16 %v112_v57, %v108_v56  ;;  %v5011_v3 = vpack.c.bf16 %v114_v60, %v110_v58  ;;  %v116_v5 = vld [vmem:[#allocation4 + $0x140] sm:$0xff] }
  0x47   :  { %3465 = vmatprep.subr.bf16.mxu1 %v4992_v46  ;;  %v123_v0 = vld [vmem:[#allocation4 + $0x178] sm:$0xff]  ;;  %v5013_v4 = vpack.c.bf16 %v121_v62, %v117_v61  ;;  %v120_v7 = vld [vmem:[#allocation4 + $0x160] sm:$0xff]  ;;  %v118_v8 = vld [vmem:[#allocation4 + $0x150] sm:$0xff]  ;;  %v212_v52 = vshrl.u32 %v211_v51, 7 }
  0x48   :  { %v5016_v9 = vpack.c.bf16 %v123_v0, %v119_v63  ;;  %v122_v12 = vld [vmem:[#allocation4 + $0x170] sm:$0xff]  ;;  %v125_v13 = vld [vmem:[#allocation4 + $0x188] sm:$0xff]  ;;  %v127_v16 = vld [vmem:[#allocation4 + $0x198] sm:$0xff]  ;;  %v5019_v18 = vpack.c.bf16 %v120_v7, %v116_v5 }
  0x49   :  { %3435 = vmatpush1.bf16.msra.mxu0 %v4995_v53  ;;  %v129_v14 = vld [vmem:[#allocation4 + $0x1a8] sm:$0xff]  ;;  %v131_v17 = vld [vmem:[#allocation4 + $0x1b8] sm:$0xff]  ;;  %v124_v21 = vld [vmem:[#allocation4 + $0x180] sm:$0xff]  ;;  %v5023_v22 = vpack.c.bf16 %v122_v12, %v118_v8  ;;  %v5093_v56 = vsub.s32 0, %v212_v52  ;;  %v5095_v57 = vsub.s32 1, %v212_v52  ;;  %v5105_v0 = vsub.s32 3, %v212_v52 }
  0x4a   :  { %3467 = vmatpush1.bf16.msra.mxu1 %v4999_v54  ;;  %3437 = vmatprep.subr.bf16.mxu0 %v5001_v55  ;;  %v5025_v23 = vpack.c.bf16 %v129_v14, %v125_v13  ;;  %v128_v25 = vld [vmem:[#allocation4 + $0x1a0] sm:$0xff]  ;;  %v126_v26 = vld [vmem:[#allocation4 + $0x190] sm:$0xff]  ;;  %v5031_v30 = vpack.c.bf16 %v131_v17, %v127_v16  ;;  %v133_v32 = vld [vmem:[#allocation4 + $0x1c8] sm:$0xff]  ;;  %v5110_v14 = vsub.s32 2, %v212_v52 }
  0x4b   :  { %3469 = vmatprep.subr.bf16.mxu1 %v5004_v59  ;;  %v204_v27 = vld [vmem:[%s5802_s0] sm:$0xff]  ;;  %v137_v34 = vld [vmem:[#allocation4 + $0x1e8] sm:$0xff]  ;;  %v5034_v38 = vpack.c.bf16 %v128_v25, %v124_v21  ;;  %v132_v43 = vld [vmem:[#allocation4 + $0x1c0] sm:$0xff] }
  0x4c   :  { %v130_v31 = vld [vmem:[#allocation4 + $0x1b0] sm:$0xff]  ;;  %207 = vperm.xlu0 %4515, %v204_v27   ;;  %v135_v35 = vld [vmem:[#allocation4 + $0x1d8] sm:$0xff]  ;;  %v5040_v40 = vpack.c.bf16 %v137_v34, %v133_v32  ;;  %v136_v44 = vld [vmem:[#allocation4 + $0x1e0] sm:$0xff] }
  0x4d   :  { %3439 = vmatpush1.bf16.msra.mxu0 %v5007_v2  ;;  %v139_v36 = vld [vmem:[#allocation4 + $0x1f8] sm:$0xff]  ;;  %v5038_v39 = vpack.c.bf16 %v130_v31, %v126_v26  ;;  %v134_v47 = vld [vmem:[#allocation4 + $0x1d0] sm:$0xff]  ;;  %v5046_v49 = vpack.c.bf16 %v136_v44, %v132_v43 }
  0x4e   :  { %3471 = vmatpush1.bf16.msra.mxu1 %v5011_v3  ;;  %3441 = vmatprep.subr.bf16.mxu0 %v5013_v4  ;;  %v5043_v45 = vpack.c.bf16 %v139_v36, %v135_v35  ;;  %v138_v48 = vld [vmem:[#allocation4 + $0x1f0] sm:$0xff] }
  0x4f   :  { %3473 = vmatprep.subr.bf16.mxu1 %v5016_v9  ;;  %v5050_v50 = vpack.c.bf16 %v138_v48, %v134_v47  ;;  %v75_v58 = vld [vmem:[%s5803_s1] sm:$0xf] }
  0x50   :  { %v214_v60 = vrot.slane %v75_v58, %v5093_v56  ;;  %v235_v61 = vld [vmem:[%s5805_s3] sm:$0xf]  ;;  %v218_v63 = vrot.slane %v75_v58, %v5095_v57  ;;  %v226_v13 = vrot.slane %v75_v58, %v5105_v0  ;;  %v222_v27 = vrot.slane %v75_v58, %v5110_v14 }
  0x51   :  { %3443 = vmatpush1.bf16.msra.mxu0 %v5019_v18  ;;  %v240_v5 = vrot.slane %v235_v61, %v5093_v56  ;;  %v244_v8 = vrot.slane %v235_v61, %v5095_v57  ;;  %v252_v21 = vrot.slane %v235_v61, %v5105_v0  ;;  %v248_v48 = vrot.slane %v235_v61, %v5110_v14 }
  0x52   :  { %3475 = vmatpush1.bf16.msra.mxu1 %v5023_v22  ;;  %3445 = vmatprep.subr.bf16.mxu0 %v5025_v23 }
  0x53   :  { %3477 = vmatprep.subr.bf16.mxu1 %v5031_v30 }
  0x55   :  { %3447 = vmatpush1.bf16.msra.mxu0 %v5034_v38 }
  0x56   :  { %3479 = vmatpush1.bf16.msra.mxu1 %v5038_v39  ;;  %3449 = vmatprep.subr.bf16.mxu0 %v5040_v40 }
  0x57   :  { %3481 = vmatprep.subr.bf16.mxu1 %v5043_v45 }
  0x59   :  { %3451 = vmatpush1.bf16.msra.mxu0 %v5046_v49 }
  0x5a   :  { %3483 = vmatpush1.bf16.msra.mxu1 %v5050_v50  ;;  %3485 = vmatprep.subr.bf16.mxu0 %v4956_v6 }
  0x5b   :  { %3517 = vmatprep.subr.bf16.mxu1 %v4958_v10 }
  0x5c   :  { %326 = vmatmul.mubr.f32.vlgmr.msra.gmra.mrb[0].mxu0 %v4847_v1 }
  0x5d   :  { %397 = vmatmul.mubr.f32.vlgmr.msra.gmra.mrb[0].mxu1 %v4847_v1  ;;  %3487 = vmatpush1.bf16.msra.mxu0 %v4960_v11 }
  0x5e   :  { %3519 = vmatpush1.bf16.msra.mxu1 %v4963_v15  ;;  %3489 = vmatprep.subr.bf16.mxu0 %v4967_v19 }
  0x5f   :  { %3521 = vmatprep.subr.bf16.mxu1 %v4969_v20  ;;  %495 = vmatprep.mubr.f32.mxu0 %v4847_v1 }
  0x60   :  { %566 = vmatprep.mubr.f32.mxu1 %v4847_v1 }
  0x61   :  { %3491 = vmatpush1.bf16.msra.mxu0 %v4972_v24 }
  0x62   :  { %3523 = vmatpush1.bf16.msra.mxu1 %v4976_v28  ;;  %3493 = vmatprep.subr.bf16.mxu0 %v4978_v29 }
  0x63   :  { %3525 = vmatprep.subr.bf16.mxu1 %v4980_v33 }
  0x65   :  { %3495 = vmatpush1.bf16.msra.mxu0 %v4983_v37 }
  0x66   :  { %3527 = vmatpush1.bf16.msra.mxu1 %v4987_v41  ;;  %3497 = vmatprep.subr.bf16.mxu0 %v4989_v42 }
  0x67   :  { %3529 = vmatprep.subr.bf16.mxu1 %v4992_v46 }
  0x69   :  { %3499 = vmatpush1.bf16.msra.mxu0 %v4995_v53 }
  0x6a   :  { %3531 = vmatpush1.bf16.msra.mxu1 %v4999_v54  ;;  %3501 = vmatprep.subr.bf16.mxu0 %v5001_v55 }
  0x6b   :  { %3533 = vmatprep.subr.bf16.mxu1 %v5004_v59 }
  0x6d   :  { %3503 = vmatpush1.bf16.msra.mxu0 %v5007_v2 }
  0x6e   :  { %3535 = vmatpush1.bf16.msra.mxu1 %v5011_v3  ;;  %3505 = vmatprep.subr.bf16.mxu0 %v5013_v4 }
  0x6f   :  { %3537 = vmatprep.subr.bf16.mxu1 %v5016_v9 }
  0x71   :  { %3507 = vmatpush1.bf16.msra.mxu0 %v5019_v18 }
  0x72   :  { %3539 = vmatpush1.bf16.msra.mxu1 %v5023_v22  ;;  %3509 = vmatprep.subr.bf16.mxu0 %v5025_v23 }
  0x73   :  { %3541 = vmatprep.subr.bf16.mxu1 %v5031_v30 }
  0x75   :  { %3511 = vmatpush1.bf16.msra.mxu0 %v5034_v38 }
  0x76   :  { %3543 = vmatpush1.bf16.msra.mxu1 %v5038_v39  ;;  %3513 = vmatprep.subr.bf16.mxu0 %v5040_v40 }
  0x77   :  { %3545 = vmatprep.subr.bf16.mxu1 %v5043_v45 }
  0x79   :  { %3515 = vmatpush1.bf16.msra.mxu0 %v5046_v49 }
  0x7a   :  { %3547 = vmatpush1.bf16.msra.mxu1 %v5050_v50  ;;  %3549 = vmatprep.subr.bf16.mxu0 %v4956_v6 }
  0x7b   :  { %3581 = vmatprep.subr.bf16.mxu1 %v4958_v10 }
  0xcb   :  { %v208_v62 = vpop.permute.xlu0 %207 }
  0xcc   :  { %v231_v7 = vmul.f32 %v214_v60, %v208_v62  ;;  %v232_v12 = vmul.f32 %v218_v63, %v208_v62  ;;  %v234_v25 = vmul.f32 %v226_v13, %v208_v62  ;;  %v233_v51 = vmul.f32 %v222_v27, %v208_v62 }
  0xce   :  { %v5112_v16 = vadd.f32 %v240_v5, %v231_v7  ;;  %v5114_v17 = vadd.f32 %v244_v8, %v232_v12  ;;  %v5120_v44 = vadd.f32 %v252_v21, %v234_v25  ;;  %v5124_v60 = vadd.f32 %v248_v48, %v233_v51 }
 0x12f   :  { %v327_v26 = vpop.f32.mrb[0].mxu0 }
 0x130   :  { %v403_v31 = vadd.f32 %v327_v26, %v5112_v16  ;;  %v398_v32 = vpop.f32.mrb[0].mxu1  ;;  %v329_v34 = vpop.f32.mrb[1].mxu0 }
 0x131   :  { %v404_v35 = vadd.f32 %v329_v34, %v5114_v17  ;;  %v400_v36 = vpop.f32.mrb[1].mxu1  ;;  %v405_v63 = vadd.f32 %v398_v32, %v5124_v60 }
 0x132   :  { %v3370_v43 = vmul.f32 -1.442695, %v403_v31  ;;  %v406_v52 = vadd.f32 %v400_v36, %v5120_v44 }
 0x133   :  { %v3371_v47 = vmul.f32 -1.442695, %v404_v35 }
 0x134   :  { %4516 = vpow2.f32 %v3370_v43  ;;  %v3372_v58 = vmul.f32 -1.442695, %v406_v52 }
 0x135   :  { %4518 = vpow2.f32 %v3371_v47 }
 0x136   :  { %4520 = vpow2.f32 %v3372_v58 }
 0x137   :  { %4522 = vtanh.f32 %v405_v63 }
 0x13e   :  { %v4517_v5 = vpop.eup %4516 }
 0x13f   :  { %v4519_v7 = vpop.eup %4518  ;;  %v410_v8 = vadd.f32 1.0, %v4517_v5 }
 0x140   :  { %v416_v12 = vadd.f32 1.0, %v4519_v7  ;;  %v4521_v13 = vpop.eup %4520 }
 0x141   :  { %4524 = vrcp.f32 %v410_v8  ;;  %v4523_v61 = vpop.eup %4522  ;;  %v423_v26 = vadd.f32 1.0, %v4521_v13 }
 0x142   :  { %4526 = vrcp.f32 %v416_v12 }
 0x143   :  { %4528 = vrcp.f32 %v423_v26 }
 0x14b   :  { %v4525_v62 = vpop.eup %4524 }
 0x14c   :  { %v4527_v21 = vpop.eup %4526  ;;  %v427_v25 = vmul.f32 %v4525_v62, %v4523_v61 }
 0x14d   :  { %v426_v27 = vmul.f32 0.0, %v4527_v21  ;;  %v4529_v32 = vpop.eup %4528 }
 0x14f   :  { %v5127_v31 = vadd.f32 %v427_v25, %v426_v27 }
 0x151   :  { %4530 = vtanh.f32 %v5127_v31 }
 0x15b   :  { %v4531_v34 = vpop.eup %4530 }
 0x15c   :  { %v430_v35 = vmul.f32 %v4531_v34, %v4529_v32 }
 0x15e   :  { %496 = vmatmul.mubr.f32.vlgmr.msra.gmra.mrb[2].mxu0 %v430_v35  ;;  %567 = vmatmul.mubr.f32.vlgmr.msra.gmra.mrb[2].mxu1 %v430_v35 }
 0x15f   :  { %3551 = vmatpush1.bf16.msra.mxu0 %v4960_v11  ;;  %3583 = vmatpush1.bf16.msra.mxu1 %v4963_v15 }
 0x160   :  { %3553 = vmatprep.subr.bf16.mxu0 %v4967_v19  ;;  %3585 = vmatprep.subr.bf16.mxu1 %v4969_v20 }
 0x161   :  { %683 = vmatprep.mubr.f32.mxu0 %v4847_v1  ;;  %754 = vmatprep.mubr.f32.mxu1 %v4847_v1 }
 0x163   :  { %3555 = vmatpush1.bf16.msra.mxu0 %v4972_v24  ;;  %3587 = vmatpush1.bf16.msra.mxu1 %v4976_v28 }
 0x164   :  { %3557 = vmatprep.subr.bf16.mxu0 %v4978_v29  ;;  %3589 = vmatprep.subr.bf16.mxu1 %v4980_v33 }
 0x167   :  { %3559 = vmatpush1.bf16.msra.mxu0 %v4983_v37  ;;  %3591 = vmatpush1.bf16.msra.mxu1 %v4987_v41 }
 0x168   :  { %3561 = vmatprep.subr.bf16.mxu0 %v4989_v42  ;;  %3593 = vmatprep.subr.bf16.mxu1 %v4992_v46 }
 0x16b   :  { %3563 = vmatpush1.bf16.msra.mxu0 %v4995_v53  ;;  %3595 = vmatpush1.bf16.msra.mxu1 %v4999_v54 }
 0x16c   :  { %3565 = vmatprep.subr.bf16.mxu0 %v5001_v55  ;;  %3597 = vmatprep.subr.bf16.mxu1 %v5004_v59 }
 0x16f   :  { %3567 = vmatpush1.bf16.msra.mxu0 %v5007_v2  ;;  %3599 = vmatpush1.bf16.msra.mxu1 %v5011_v3 }
 0x170   :  { %3569 = vmatprep.subr.bf16.mxu0 %v5013_v4  ;;  %3601 = vmatprep.subr.bf16.mxu1 %v5016_v9 }
 0x173   :  { %3571 = vmatpush1.bf16.msra.mxu0 %v5019_v18  ;;  %3603 = vmatpush1.bf16.msra.mxu1 %v5023_v22 }
 0x174   :  { %3573 = vmatprep.subr.bf16.mxu0 %v5025_v23  ;;  %3605 = vmatprep.subr.bf16.mxu1 %v5031_v30 }
 0x177   :  { %3575 = vmatpush1.bf16.msra.mxu0 %v5034_v38  ;;  %3607 = vmatpush1.bf16.msra.mxu1 %v5038_v39 }
 0x178   :  { %3577 = vmatprep.subr.bf16.mxu0 %v5040_v40  ;;  %3609 = vmatprep.subr.bf16.mxu1 %v5043_v45 }
 0x17b   :  { %3579 = vmatpush1.bf16.msra.mxu0 %v5046_v49  ;;  %3611 = vmatpush1.bf16.msra.mxu1 %v5050_v50 }
 0x17c   :  { %3613 = vmatprep.subr.bf16.mxu0 %v4956_v6  ;;  %3645 = vmatprep.subr.bf16.mxu1 %v4958_v10 }
 0x231   :  { %v497_v36 = vpop.f32.mrb[2].mxu0  ;;  %v568_v43 = vpop.f32.mrb[2].mxu1 }
 0x232   :  { %v577_v47 = vrot.slane %v497_v36, 7  ;;  %v499_v48 = vpop.f32.mrb[3].mxu0  ;;  %v570_v51 = vpop.f32.mrb[3].mxu1  ;;  %v579_v13 = vrot.slane %v568_v43, 7  ;;  %v609_v36 = vrot.slane %v5127_v31, 7 }
 0x233   :  { %v578_v52 = vrot.slane %v499_v48, 7  ;;  %v580_v8 = vrot.slane %v570_v51, 7 }
 0x234   :  { %v585_v58 = vadd.f32 %v577_v47, %v5112_v16  ;;  %v587_v62 = vadd.f32 %v579_v13, %v5124_v60 }
 0x235   :  { %v586_v63 = vadd.f32 %v578_v52, %v5114_v17  ;;  %v588_v12 = vadd.f32 %v580_v8, %v5120_v44 }
 0x236   :  { %v3373_v5 = vmul.f32 -1.442695, %v585_v58 }
 0x237   :  { %v3374_v7 = vmul.f32 -1.442695, %v586_v63  ;;  %v3375_v61 = vmul.f32 -1.442695, %v588_v12 }
 0x238   :  { %4532 = vpow2.f32 %v3373_v5 }
 0x239   :  { %4534 = vpow2.f32 %v3374_v7 }
 0x23a   :  { %4536 = vpow2.f32 %v3375_v61 }
 0x23b   :  { %4538 = vtanh.f32 %v587_v62 }
 0x242   :  { %v4533_v21 = vpop.eup %4532 }
 0x243   :  { %v4535_v25 = vpop.eup %4534  ;;  %v592_v26 = vadd.f32 1.0, %v4533_v21 }
 0x244   :  { %v598_v27 = vadd.f32 1.0, %v4535_v25  ;;  %v4537_v32 = vpop.eup %4536 }
 0x245   :  { %4540 = vrcp.f32 %v592_v26  ;;  %v4539_v34 = vpop.eup %4538  ;;  %v605_v51 = vadd.f32 1.0, %v4537_v32 }
 0x246   :  { %4542 = vrcp.f32 %v598_v27 }
 0x247   :  { %4544 = vrcp.f32 %v605_v51 }
 0x24f   :  { %v4541_v35 = vpop.eup %4540 }
 0x250   :  { %v4543_v47 = vpop.eup %4542  ;;  %v612_v48 = vmul.f32 %v4541_v35, %v4539_v34 }
 0x251   :  { %v611_v43 = vmul.f32 %v4543_v47, %v609_v36  ;;  %v4545_v58 = vpop.eup %4544 }
 0x253   :  { %v5169_v52 = vadd.f32 %v612_v48, %v611_v43 }
 0x255   :  { %4546 = vtanh.f32 %v5169_v52 }
 0x25f   :  { %v4547_v63 = vpop.eup %4546 }
 0x260   :  { %v615_v5 = vmul.f32 %v4547_v63, %v4545_v58 }
 0x262   :  { %v617_v7 = vrot.slane %v615_v5, 1 }
 0x264   :  { %684 = vmatmul.mubr.f32.vlgmr.msra.gmra.mrb[4].mxu0 %v617_v7  ;;  %755 = vmatmul.mubr.f32.vlgmr.msra.gmra.mrb[4].mxu1 %v617_v7 }
 0x265   :  { %3615 = vmatpush1.bf16.msra.mxu0 %v4960_v11  ;;  %3647 = vmatpush1.bf16.msra.mxu1 %v4963_v15 }
 0x266   :  { %3617 = vmatprep.subr.bf16.mxu0 %v4967_v19  ;;  %3649 = vmatprep.subr.bf16.mxu1 %v4969_v20 }
 0x267   :  { %871 = vmatprep.mubr.f32.mxu0 %v4847_v1  ;;  %942 = vmatprep.mubr.f32.mxu1 %v4847_v1 }
 0x269   :  { %3619 = vmatpush1.bf16.msra.mxu0 %v4972_v24  ;;  %3651 = vmatpush1.bf16.msra.mxu1 %v4976_v28 }
 0x26a   :  { %3621 = vmatprep.subr.bf16.mxu0 %v4978_v29  ;;  %3653 = vmatprep.subr.bf16.mxu1 %v4980_v33 }
 0x26d   :  { %3623 = vmatpush1.bf16.msra.mxu0 %v4983_v37  ;;  %3655 = vmatpush1.bf16.msra.mxu1 %v4987_v41 }
 0x26e   :  { %3625 = vmatprep.subr.bf16.mxu0 %v4989_v42  ;;  %3657 = vmatprep.subr.bf16.mxu1 %v4992_v46 }
 0x271   :  { %3627 = vmatpush1.bf16.msra.mxu0 %v4995_v53  ;;  %3659 = vmatpush1.bf16.msra.mxu1 %v4999_v54 }
 0x272   :  { %3629 = vmatprep.subr.bf16.mxu0 %v5001_v55  ;;  %3661 = vmatprep.subr.bf16.mxu1 %v5004_v59 }
 0x275   :  { %3631 = vmatpush1.bf16.msra.mxu0 %v5007_v2  ;;  %3663 = vmatpush1.bf16.msra.mxu1 %v5011_v3 }
 0x276   :  { %3633 = vmatprep.subr.bf16.mxu0 %v5013_v4  ;;  %3665 = vmatprep.subr.bf16.mxu1 %v5016_v9 }
 0x279   :  { %3635 = vmatpush1.bf16.msra.mxu0 %v5019_v18  ;;  %3667 = vmatpush1.bf16.msra.mxu1 %v5023_v22 }
 0x27a   :  { %3637 = vmatprep.subr.bf16.mxu0 %v5025_v23  ;;  %3669 = vmatprep.subr.bf16.mxu1 %v5031_v30 }
 0x27d   :  { %3639 = vmatpush1.bf16.msra.mxu0 %v5034_v38  ;;  %3671 = vmatpush1.bf16.msra.mxu1 %v5038_v39 }
 0x27e   :  { %3641 = vmatprep.subr.bf16.mxu0 %v5040_v40  ;;  %3673 = vmatprep.subr.bf16.mxu1 %v5043_v45 }
 0x281   :  { %3643 = vmatpush1.bf16.msra.mxu0 %v5046_v49  ;;  %3675 = vmatpush1.bf16.msra.mxu1 %v5050_v50 }
 0x282   :  { %3677 = vmatprep.subr.bf16.mxu0 %v4956_v6  ;;  %3709 = vmatprep.subr.bf16.mxu1 %v4958_v10 }
 0x337   :  { %v685_v31 = vpop.f32.mrb[4].mxu0  ;;  %v756_v8 = vpop.f32.mrb[4].mxu1 }
 0x338   :  { %v765_v12 = vrot.slane %v685_v31, 6  ;;  %v687_v13 = vpop.f32.mrb[5].mxu0  ;;  %v758_v61 = vpop.f32.mrb[5].mxu1  ;;  %v767_v35 = vrot.slane %v756_v8, 6  ;;  %v797_v31 = vrot.slane %v5169_v52, 7 }
 0x339   :  { %v766_v62 = vrot.slane %v687_v13, 6  ;;  %v768_v32 = vrot.slane %v758_v61, 6 }
 0x33a   :  { %v773_v21 = vadd.f32 %v765_v12, %v5112_v16  ;;  %v775_v47 = vadd.f32 %v767_v35, %v5124_v60 }
 0x33b   :  { %v774_v25 = vadd.f32 %v766_v62, %v5114_v17  ;;  %v776_v34 = vadd.f32 %v768_v32, %v5120_v44 }
 0x33c   :  { %v3376_v26 = vmul.f32 -1.442695, %v773_v21 }
 0x33d   :  { %v3377_v27 = vmul.f32 -1.442695, %v774_v25  ;;  %v3378_v36 = vmul.f32 -1.442695, %v776_v34 }
 0x33e   :  { %4548 = vpow2.f32 %v3376_v26 }
 0x33f   :  { %4550 = vpow2.f32 %v3377_v27 }
 0x340   :  { %4552 = vpow2.f32 %v3378_v36 }
 0x341   :  { %4554 = vtanh.f32 %v775_v47 }
 0x348   :  { %v4549_v48 = vpop.eup %4548 }
 0x349   :  { %v4551_v51 = vpop.eup %4550  ;;  %v780_v43 = vadd.f32 1.0, %v4549_v48 }
 0x34a   :  { %v786_v58 = vadd.f32 1.0, %v4551_v51  ;;  %v4553_v63 = vpop.eup %4552 }
 0x34b   :  { %4556 = vrcp.f32 %v780_v43  ;;  %v4555_v5 = vpop.eup %4554  ;;  %v793_v61 = vadd.f32 1.0, %v4553_v63 }
 0x34c   :  { %4558 = vrcp.f32 %v786_v58 }
 0x34d   :  { %4560 = vrcp.f32 %v793_v61 }
 0x355   :  { %v4557_v7 = vpop.eup %4556 }
 0x356   :  { %v4559_v12 = vpop.eup %4558  ;;  %v800_v13 = vmul.f32 %v4557_v7, %v4555_v5 }
 0x357   :  { %v799_v8 = vmul.f32 %v4559_v12, %v797_v31  ;;  %v4561_v21 = vpop.eup %4560 }
 0x359   :  { %v5211_v62 = vadd.f32 %v800_v13, %v799_v8 }
 0x35b   :  { %4562 = vtanh.f32 %v5211_v62 }
 0x365   :  { %v4563_v25 = vpop.eup %4562 }
 0x366   :  { %v803_v26 = vmul.f32 %v4563_v25, %v4561_v21 }
 0x368   :  { %v805_v27 = vrot.slane %v803_v26, 2 }
 0x36a   :  { %872 = vmatmul.mubr.f32.vlgmr.msra.gmra.mrb[6].mxu0 %v805_v27  ;;  %943 = vmatmul.mubr.f32.vlgmr.msra.gmra.mrb[6].mxu1 %v805_v27 }
 0x36b   :  { %3679 = vmatpush1.bf16.msra.mxu0 %v4960_v11  ;;  %3711 = vmatpush1.bf16.msra.mxu1 %v4963_v15 }
 0x36c   :  { %3681 = vmatprep.subr.bf16.mxu0 %v4967_v19  ;;  %3713 = vmatprep.subr.bf16.mxu1 %v4969_v20 }
 0x36d   :  { %1059 = vmatprep.mubr.f32.mxu0 %v4847_v1  ;;  %1130 = vmatprep.mubr.f32.mxu1 %v4847_v1 }
 0x36f   :  { %3683 = vmatpush1.bf16.msra.mxu0 %v4972_v24  ;;  %3715 = vmatpush1.bf16.msra.mxu1 %v4976_v28 }
 0x370   :  { %3685 = vmatprep.subr.bf16.mxu0 %v4978_v29  ;;  %3717 = vmatprep.subr.bf16.mxu1 %v4980_v33 }
 0x373   :  { %3687 = vmatpush1.bf16.msra.mxu0 %v4983_v37  ;;  %3719 = vmatpush1.bf16.msra.mxu1 %v4987_v41 }
 0x374   :  { %3689 = vmatprep.subr.bf16.mxu0 %v4989_v42  ;;  %3721 = vmatprep.subr.bf16.mxu1 %v4992_v46 }
 0x377   :  { %3691 = vmatpush1.bf16.msra.mxu0 %v4995_v53  ;;  %3723 = vmatpush1.bf16.msra.mxu1 %v4999_v54 }
 0x378   :  { %3693 = vmatprep.subr.bf16.mxu0 %v5001_v55  ;;  %3725 = vmatprep.subr.bf16.mxu1 %v5004_v59 }
 0x37b   :  { %3695 = vmatpush1.bf16.msra.mxu0 %v5007_v2  ;;  %3727 = vmatpush1.bf16.msra.mxu1 %v5011_v3 }
 0x37c   :  { %3697 = vmatprep.subr.bf16.mxu0 %v5013_v4  ;;  %3729 = vmatprep.subr.bf16.mxu1 %v5016_v9 }
 0x37f   :  { %3699 = vmatpush1.bf16.msra.mxu0 %v5019_v18  ;;  %3731 = vmatpush1.bf16.msra.mxu1 %v5023_v22 }
 0x380   :  { %3701 = vmatprep.subr.bf16.mxu0 %v5025_v23  ;;  %3733 = vmatprep.subr.bf16.mxu1 %v5031_v30 }
 0x383   :  { %3703 = vmatpush1.bf16.msra.mxu0 %v5034_v38  ;;  %3735 = vmatpush1.bf16.msra.mxu1 %v5038_v39 }
 0x384   :  { %3705 = vmatprep.subr.bf16.mxu0 %v5040_v40  ;;  %3737 = vmatprep.subr.bf16.mxu1 %v5043_v45 }
 0x387   :  { %3707 = vmatpush1.bf16.msra.mxu0 %v5046_v49  ;;  %3739 = vmatpush1.bf16.msra.mxu1 %v5050_v50 }
 0x388   :  { %3741 = vmatprep.subr.bf16.mxu0 %v4956_v6  ;;  %3773 = vmatprep.subr.bf16.mxu1 %v4958_v10 }
 0x43d   :  { %v873_v52 = vpop.f32.mrb[6].mxu0  ;;  %v944_v32 = vpop.f32.mrb[6].mxu1 }
 0x43e   :  { %v953_v34 = vrot.slane %v873_v52, 5  ;;  %v875_v35 = vpop.f32.mrb[7].mxu0  ;;  %v946_v36 = vpop.f32.mrb[7].mxu1  ;;  %v955_v7 = vrot.slane %v944_v32, 5  ;;  %v985_v52 = vrot.slane %v5211_v62, 7 }
 0x43f   :  { %v954_v47 = vrot.slane %v875_v35, 5  ;;  %v956_v63 = vrot.slane %v946_v36, 5 }
 0x440   :  { %v961_v48 = vadd.f32 %v953_v34, %v5112_v16  ;;  %v963_v12 = vadd.f32 %v955_v7, %v5124_v60 }
 0x441   :  { %v962_v51 = vadd.f32 %v954_v47, %v5114_v17  ;;  %v964_v5 = vadd.f32 %v956_v63, %v5120_v44 }
 0x442   :  { %v3379_v43 = vmul.f32 -1.442695, %v961_v48 }
 0x443   :  { %v3380_v58 = vmul.f32 -1.442695, %v962_v51  ;;  %v3381_v31 = vmul.f32 -1.442695, %v964_v5 }
 0x444   :  { %4564 = vpow2.f32 %v3379_v43 }
 0x445   :  { %4566 = vpow2.f32 %v3380_v58 }
 0x446   :  { %4568 = vpow2.f32 %v3381_v31 }
 0x447   :  { %4570 = vtanh.f32 %v963_v12 }
 0x44e   :  { %v4565_v13 = vpop.eup %4564 }
 0x44f   :  { %v4567_v61 = vpop.eup %4566  ;;  %v968_v8 = vadd.f32 1.0, %v4565_v13 }
 0x450   :  { %v974_v21 = vadd.f32 1.0, %v4567_v61  ;;  %v4569_v25 = vpop.eup %4568 }
 0x451   :  { %4572 = vrcp.f32 %v968_v8  ;;  %v4571_v26 = vpop.eup %4570  ;;  %v981_v36 = vadd.f32 1.0, %v4569_v25 }
 0x452   :  { %4574 = vrcp.f32 %v974_v21 }
 0x453   :  { %4576 = vrcp.f32 %v981_v36 }
 0x45b   :  { %v4573_v27 = vpop.eup %4572 }
 0x45c   :  { %v4575_v34 = vpop.eup %4574  ;;  %v988_v35 = vmul.f32 %v4573_v27, %v4571_v26 }
 0x45d   :  { %v987_v32 = vmul.f32 %v4575_v34, %v985_v52  ;;  %v4577_v48 = vpop.eup %4576 }
 0x45f   :  { %v5253_v47 = vadd.f32 %v988_v35, %v987_v32 }
 0x461   :  { %4578 = vtanh.f32 %v5253_v47 }
 0x46b   :  { %v4579_v51 = vpop.eup %4578 }
 0x46c   :  { %v991_v43 = vmul.f32 %v4579_v51, %v4577_v48 }
 0x46e   :  { %v993_v58 = vrot.slane %v991_v43, 3 }
 0x470   :  { %1060 = vmatmul.mubr.f32.vlgmr.msra.gmra.mrb[8].mxu0 %v993_v58  ;;  %1131 = vmatmul.mubr.f32.vlgmr.msra.gmra.mrb[8].mxu1 %v993_v58 }
 0x471   :  { %3743 = vmatpush1.bf16.msra.mxu0 %v4960_v11  ;;  %3775 = vmatpush1.bf16.msra.mxu1 %v4963_v15 }
 0x472   :  { %3745 = vmatprep.subr.bf16.mxu0 %v4967_v19  ;;  %3777 = vmatprep.subr.bf16.mxu1 %v4969_v20 }
 0x473   :  { %1247 = vmatprep.mubr.f32.mxu0 %v4847_v1  ;;  %1318 = vmatprep.mubr.f32.mxu1 %v4847_v1 }
 0x475   :  { %3747 = vmatpush1.bf16.msra.mxu0 %v4972_v24  ;;  %3779 = vmatpush1.bf16.msra.mxu1 %v4976_v28 }
 0x476   :  { %3749 = vmatprep.subr.bf16.mxu0 %v4978_v29  ;;  %3781 = vmatprep.subr.bf16.mxu1 %v4980_v33 }
 0x479   :  { %3751 = vmatpush1.bf16.msra.mxu0 %v4983_v37  ;;  %3783 = vmatpush1.bf16.msra.mxu1 %v4987_v41 }
 0x47a   :  { %3753 = vmatprep.subr.bf16.mxu0 %v4989_v42  ;;  %3785 = vmatprep.subr.bf16.mxu1 %v4992_v46 }
 0x47d   :  { %3755 = vmatpush1.bf16.msra.mxu0 %v4995_v53  ;;  %3787 = vmatpush1.bf16.msra.mxu1 %v4999_v54 }
 0x47e   :  { %3757 = vmatprep.subr.bf16.mxu0 %v5001_v55  ;;  %3789 = vmatprep.subr.bf16.mxu1 %v5004_v59 }
 0x481   :  { %3759 = vmatpush1.bf16.msra.mxu0 %v5007_v2  ;;  %3791 = vmatpush1.bf16.msra.mxu1 %v5011_v3 }
 0x482   :  { %3761 = vmatprep.subr.bf16.mxu0 %v5013_v4  ;;  %3793 = vmatprep.subr.bf16.mxu1 %v5016_v9 }
 0x485   :  { %3763 = vmatpush1.bf16.msra.mxu0 %v5019_v18  ;;  %3795 = vmatpush1.bf16.msra.mxu1 %v5023_v22 }
 0x486   :  { %3765 = vmatprep.subr.bf16.mxu0 %v5025_v23  ;;  %3797 = vmatprep.subr.bf16.mxu1 %v5031_v30 }
 0x489   :  { %3767 = vmatpush1.bf16.msra.mxu0 %v5034_v38  ;;  %3799 = vmatpush1.bf16.msra.mxu1 %v5038_v39 }
 0x48a   :  { %3769 = vmatprep.subr.bf16.mxu0 %v5040_v40  ;;  %3801 = vmatprep.subr.bf16.mxu1 %v5043_v45 }
 0x48d   :  { %3771 = vmatpush1.bf16.msra.mxu0 %v5046_v49  ;;  %3803 = vmatpush1.bf16.msra.mxu1 %v5050_v50 }
 0x48e   :  { %3805 = vmatprep.subr.bf16.mxu0 %v4956_v6  ;;  %3837 = vmatprep.subr.bf16.mxu1 %v4958_v10 }
 0x543   :  { %v1061_v62 = vpop.f32.mrb[8].mxu0  ;;  %v1132_v63 = vpop.f32.mrb[8].mxu1 }
 0x544   :  { %v1141_v5 = vrot.slane %v1061_v62, 4  ;;  %v1063_v7 = vpop.f32.mrb[9].mxu0  ;;  %v1134_v31 = vpop.f32.mrb[9].mxu1  ;;  %v1143_v27 = vrot.slane %v1132_v63, 4  ;;  %v1173_v62 = vrot.slane %v5253_v47, 7 }
 0x545   :  { %v1142_v12 = vrot.slane %v1063_v7, 4  ;;  %v1144_v25 = vrot.slane %v1134_v31, 4 }
 0x546   :  { %v1149_v13 = vadd.f32 %v1141_v5, %v5112_v16  ;;  %v1151_v34 = vadd.f32 %v1143_v27, %v5124_v60 }
 0x547   :  { %v1150_v61 = vadd.f32 %v1142_v12, %v5114_v17  ;;  %v1152_v26 = vadd.f32 %v1144_v25, %v5120_v44 }
 0x548   :  { %v3382_v8 = vmul.f32 -1.442695, %v1149_v13 }
 0x549   :  { %v3383_v21 = vmul.f32 -1.442695, %v1150_v61  ;;  %v3384_v52 = vmul.f32 -1.442695, %v1152_v26 }
 0x54a   :  { %4580 = vpow2.f32 %v3382_v8 }
 0x54b   :  { %4582 = vpow2.f32 %v3383_v21 }
 0x54c   :  { %4584 = vpow2.f32 %v3384_v52 }
 0x54d   :  { %4586 = vtanh.f32 %v1151_v34 }
 0x554   :  { %v4581_v35 = vpop.eup %4580 }
 0x555   :  { %v4583_v36 = vpop.eup %4582  ;;  %v1156_v32 = vadd.f32 1.0, %v4581_v35 }
 0x556   :  { %v1162_v48 = vadd.f32 1.0, %v4583_v36  ;;  %v4585_v51 = vpop.eup %4584 }
 0x557   :  { %4588 = vrcp.f32 %v1156_v32  ;;  %v4587_v43 = vpop.eup %4586  ;;  %v1169_v31 = vadd.f32 1.0, %v4585_v51 }
 0x558   :  { %4590 = vrcp.f32 %v1162_v48 }
 0x559   :  { %4592 = vrcp.f32 %v1169_v31 }
 0x561   :  { %v4589_v58 = vpop.eup %4588 }
 0x562   :  { %v4591_v5 = vpop.eup %4590  ;;  %v1176_v7 = vmul.f32 %v4589_v58, %v4587_v43 }
 0x563   :  { %v1175_v63 = vmul.f32 %v4591_v5, %v1173_v62  ;;  %v4593_v13 = vpop.eup %4592 }
 0x565   :  { %v5295_v12 = vadd.f32 %v1176_v7, %v1175_v63 }
 0x567   :  { %4594 = vtanh.f32 %v5295_v12 }
 0x571   :  { %v4595_v61 = vpop.eup %4594 }
 0x572   :  { %v1179_v8 = vmul.f32 %v4595_v61, %v4593_v13 }
 0x574   :  { %v1181_v21 = vrot.slane %v1179_v8, 4  ;;  %v1361_v8 = vrot.slane %v5295_v12, 7 }
 0x576   :  { %1248 = vmatmul.mubr.f32.vlgmr.msra.gmra.mrb[10].mxu0 %v1181_v21  ;;  %1319 = vmatmul.mubr.f32.vlgmr.msra.gmra.mrb[10].mxu1 %v1181_v21 }
 0x577   :  { %3807 = vmatpush1.bf16.msra.mxu0 %v4960_v11  ;;  %3839 = vmatpush1.bf16.msra.mxu1 %v4963_v15 }
 0x578   :  { %3809 = vmatprep.subr.bf16.mxu0 %v4967_v19  ;;  %3841 = vmatprep.subr.bf16.mxu1 %v4969_v20 }
 0x579   :  { %1435 = vmatprep.mubr.f32.mxu0 %v4847_v1  ;;  %1506 = vmatprep.mubr.f32.mxu1 %v4847_v1 }
 0x57b   :  { %3811 = vmatpush1.bf16.msra.mxu0 %v4972_v24  ;;  %3843 = vmatpush1.bf16.msra.mxu1 %v4976_v28 }
 0x57c   :  { %3813 = vmatprep.subr.bf16.mxu0 %v4978_v29  ;;  %3845 = vmatprep.subr.bf16.mxu1 %v4980_v33 }
 0x57f   :  { %3815 = vmatpush1.bf16.msra.mxu0 %v4983_v37  ;;  %3847 = vmatpush1.bf16.msra.mxu1 %v4987_v41 }
 0x580   :  { %3817 = vmatprep.subr.bf16.mxu0 %v4989_v42  ;;  %3849 = vmatprep.subr.bf16.mxu1 %v4992_v46 }
 0x583   :  { %3819 = vmatpush1.bf16.msra.mxu0 %v4995_v53  ;;  %3851 = vmatpush1.bf16.msra.mxu1 %v4999_v54 }
 0x584   :  { %3821 = vmatprep.subr.bf16.mxu0 %v5001_v55  ;;  %3853 = vmatprep.subr.bf16.mxu1 %v5004_v59 }
 0x587   :  { %3823 = vmatpush1.bf16.msra.mxu0 %v5007_v2  ;;  %3855 = vmatpush1.bf16.msra.mxu1 %v5011_v3 }
 0x588   :  { %3825 = vmatprep.subr.bf16.mxu0 %v5013_v4  ;;  %3857 = vmatprep.subr.bf16.mxu1 %v5016_v9 }
 0x58b   :  { %3827 = vmatpush1.bf16.msra.mxu0 %v5019_v18  ;;  %3859 = vmatpush1.bf16.msra.mxu1 %v5023_v22 }
 0x58c   :  { %3829 = vmatprep.subr.bf16.mxu0 %v5025_v23  ;;  %3861 = vmatprep.subr.bf16.mxu1 %v5031_v30 }
 0x58f   :  { %3831 = vmatpush1.bf16.msra.mxu0 %v5034_v38  ;;  %3863 = vmatpush1.bf16.msra.mxu1 %v5038_v39 }
 0x590   :  { %3833 = vmatprep.subr.bf16.mxu0 %v5040_v40  ;;  %3865 = vmatprep.subr.bf16.mxu1 %v5043_v45 }
 0x593   :  { %3835 = vmatpush1.bf16.msra.mxu0 %v5046_v49  ;;  %3867 = vmatpush1.bf16.msra.mxu1 %v5050_v50 }
 0x594   :  { %3869 = vmatprep.subr.bf16.mxu0 %v4956_v6  ;;  %3901 = vmatprep.subr.bf16.mxu1 %v4958_v10 }
 0x649   :  { %v1249_v47 = vpop.f32.mrb[10].mxu0  ;;  %v1320_v25 = vpop.f32.mrb[10].mxu1 }
 0x64a   :  { %v1329_v26 = vrot.slane %v1249_v47, 3  ;;  %v1251_v27 = vpop.f32.mrb[11].mxu0  ;;  %v1322_v52 = vpop.f32.mrb[11].mxu1  ;;  %v1331_v6 = vrot.slane %v1320_v25, 3 }
 0x64b   :  { %v1330_v34 = vrot.slane %v1251_v27, 3  ;;  %v1332_v51 = vrot.slane %v1322_v52, 3 }
 0x64c   :  { %v1337_v35 = vadd.f32 %v1329_v26, %v5112_v16  ;;  %v1339_v10 = vadd.f32 %v1331_v6, %v5124_v60 }
 0x64d   :  { %v1338_v36 = vadd.f32 %v1330_v34, %v5114_v17  ;;  %v1340_v43 = vadd.f32 %v1332_v51, %v5120_v44  ;;  %v1749_v51 = vld [vmem:[#allocation6 + $0x28] sm:$0xff] }
 0x64e   :  { %v3385_v32 = vmul.f32 -1.442695, %v1337_v35 }
 0x64f   :  { %v3386_v48 = vmul.f32 -1.442695, %v1338_v36  ;;  %v3387_v58 = vmul.f32 -1.442695, %v1340_v43  ;;  %v1747_v43 = vld [vmem:[#allocation6 + $0x18] sm:$0xff] }
 0x650   :  { %4596 = vpow2.f32 %v3385_v32 }
 0x651   :  { %4598 = vpow2.f32 %v3386_v48  ;;  %v1745_v48 = vld [vmem:[#allocation6 + $0x8] sm:$0xff] }
 0x652   :  { %4600 = vpow2.f32 %v3387_v58  ;;  %v3932_v6 = vpack.c.bf16 %v1749_v51, %v1745_v48  ;;  %v1751_v58 = vld [vmem:[#allocation6 + $0x38] sm:$0xff]  ;;  %v1780_v48 = vld [vmem:[#allocation6 + $0x120] sm:$0xff] }
 0x653   :  { %4602 = vtanh.f32 %v1339_v10  ;;  %v1744_v10 = vld [vmem:[#allocation6] sm:$0xff] }
 0x65a   :  { %v4597_v62 = vpop.eup %4596 }
 0x65b   :  { %v4599_v5 = vpop.eup %4598  ;;  %v1344_v7 = vadd.f32 1.0, %v4597_v62  ;;  %v1748_v62 = vld [vmem:[#allocation6 + $0x20] sm:$0xff] }
 0x65c   :  { %v1350_v31 = vadd.f32 1.0, %v4599_v5  ;;  %v4601_v63 = vpop.eup %4600  ;;  %v3964_v5 = vpack.c.bf16 %v1751_v58, %v1747_v43  ;;  %v1782_v58 = vld [vmem:[#allocation6 + $0x130] sm:$0xff] }
 0x65d   :  { %4604 = vrcp.f32 %v1344_v7  ;;  %v4603_v13 = vpop.eup %4602  ;;  %v1357_v26 = vadd.f32 1.0, %v4601_v63  ;;  %v3934_v7 = vpack.c.bf16 %v1748_v62, %v1744_v10  ;;  %v1750_v63 = vld [vmem:[#allocation6 + $0x30] sm:$0xff]  ;;  %v1785_v10 = vld [vmem:[#allocation6 + $0x148] sm:$0xff] }
 0x65e   :  { %4606 = vrcp.f32 %v1350_v31  ;;  %v1746_v31 = vld [vmem:[#allocation6 + $0x10] sm:$0xff] }
 0x65f   :  { %4608 = vrcp.f32 %v1357_v26  ;;  %v1759_v26 = vld [vmem:[#allocation6 + $0x78] sm:$0xff] }
 0x667   :  { %v4605_v61 = vpop.eup %4604 }
 0x668   :  { %v4607_v21 = vpop.eup %4606  ;;  %v1364_v47 = vmul.f32 %v4605_v61, %v4603_v13  ;;  %v3966_v13 = vpack.c.bf16 %v1750_v63, %v1746_v31  ;;  %v1753_v61 = vld [vmem:[#allocation6 + $0x48] sm:$0xff]  ;;  %v1791_v31 = vld [vmem:[#allocation6 + $0x178] sm:$0xff] }
 0x669   :  { %v1363_v25 = vmul.f32 %v4607_v21, %v1361_v8  ;;  %v4609_v52 = vpop.eup %4608  ;;  %v1757_v8 = vld [vmem:[#allocation6 + $0x68] sm:$0xff]  ;;  %v1755_v21 = vld [vmem:[#allocation6 + $0x58] sm:$0xff] }
 0x66b   :  { %v5337_v27 = vadd.f32 %v1364_v47, %v1363_v25  ;;  %v3936_v47 = vpack.c.bf16 %v1757_v8, %v1753_v61  ;;  %v1752_v25 = vld [vmem:[#allocation6 + $0x40] sm:$0xff] }
 0x66c   :  { %v1784_v61 = vld [vmem:[#allocation6 + $0x140] sm:$0xff] }
 0x66d   :  { %4610 = vtanh.f32 %v5337_v27  ;;  %v1788_v8 = vld [vmem:[#allocation6 + $0x160] sm:$0xff] }
 0x677   :  { %v4611_v34 = vpop.eup %4610 }
 0x678   :  { %v1367_v35 = vmul.f32 %v4611_v34, %v4609_v52  ;;  %v3968_v52 = vpack.c.bf16 %v1759_v26, %v1755_v21  ;;  %v1786_v21 = vld [vmem:[#allocation6 + $0x150] sm:$0xff] }
 0x679   :  { %v1790_v26 = vld [vmem:[#allocation6 + $0x170] sm:$0xff] }
 0x67a   :  { %v1369_v36 = vrot.slane %v1367_v35, 5  ;;  %v1754_v35 = vld [vmem:[#allocation6 + $0x50] sm:$0xff] }
 0x67c   :  { %1436 = vmatmul.mubr.f32.vlgmr.msra.gmra.mrb[12].mxu0 %v1369_v36  ;;  %1507 = vmatmul.mubr.f32.vlgmr.msra.gmra.mrb[12].mxu1 %v1369_v36  ;;  %v1758_v36 = vld [vmem:[#allocation6 + $0x70] sm:$0xff] }
 0x67d   :  { %3871 = vmatpush1.bf16.msra.mxu0 %v4960_v11  ;;  %3903 = vmatpush1.bf16.msra.mxu1 %v4963_v15 }
 0x67e   :  { %3873 = vmatprep.subr.bf16.mxu0 %v4967_v19  ;;  %3905 = vmatprep.subr.bf16.mxu1 %v4969_v20 }
 0x67f   :  { %1623 = vmatprep.mubr.f32.mxu0 %v4847_v1  ;;  %1694 = vmatprep.mubr.f32.mxu1 %v4847_v1 }
 0x681   :  { %3875 = vmatpush1.bf16.msra.mxu0 %v4972_v24  ;;  %3907 = vmatpush1.bf16.msra.mxu1 %v4976_v28 }
 0x682   :  { %3877 = vmatprep.subr.bf16.mxu0 %v4978_v29  ;;  %3909 = vmatprep.subr.bf16.mxu1 %v4980_v33 }
 0x685   :  { %3879 = vmatpush1.bf16.msra.mxu0 %v4983_v37  ;;  %3911 = vmatpush1.bf16.msra.mxu1 %v4987_v41 }
 0x686   :  { %3881 = vmatprep.subr.bf16.mxu0 %v4989_v42  ;;  %3913 = vmatprep.subr.bf16.mxu1 %v4992_v46 }
 0x689   :  { %3883 = vmatpush1.bf16.msra.mxu0 %v4995_v53  ;;  %3915 = vmatpush1.bf16.msra.mxu1 %v4999_v54 }
 0x68a   :  { %3885 = vmatprep.subr.bf16.mxu0 %v5001_v55  ;;  %3917 = vmatprep.subr.bf16.mxu1 %v5004_v59 }
 0x68d   :  { %3887 = vmatpush1.bf16.msra.mxu0 %v5007_v2  ;;  %3919 = vmatpush1.bf16.msra.mxu1 %v5011_v3 }
 0x68e   :  { %3889 = vmatprep.subr.bf16.mxu0 %v5013_v4  ;;  %3921 = vmatprep.subr.bf16.mxu1 %v5016_v9 }
 0x691   :  { %3891 = vmatpush1.bf16.msra.mxu0 %v5019_v18  ;;  %3923 = vmatpush1.bf16.msra.mxu1 %v5023_v22 }
 0x692   :  { %3893 = vmatprep.subr.bf16.mxu0 %v5025_v23  ;;  %3925 = vmatprep.subr.bf16.mxu1 %v5031_v30  ;;  %v1549_v23 = vrot.slane %v5337_v27, 7  ;;  %v1756_v27 = vld [vmem:[#allocation6 + $0x60] sm:$0xff] }
 0x693   :  { %v3938_v34 = vpack.c.bf16 %v1756_v27, %v1752_v25  ;;  %v1793_v25 = vld [vmem:[#allocation6 + $0x188] sm:$0xff] }
 0x694   :  { %v1797_v27 = vld [vmem:[#allocation6 + $0x1a8] sm:$0xff] }
 0x695   :  { %3895 = vmatpush1.bf16.msra.mxu0 %v5034_v38  ;;  %3927 = vmatpush1.bf16.msra.mxu1 %v5038_v39 }
 0x696   :  { %3897 = vmatprep.subr.bf16.mxu0 %v5040_v40  ;;  %3929 = vmatprep.subr.bf16.mxu1 %v5043_v45 }
 0x699   :  { %3899 = vmatpush1.bf16.msra.mxu0 %v5046_v49  ;;  %3931 = vmatpush1.bf16.msra.mxu1 %v5050_v50 }
 0x69a   :  { %3933 = vmatprep.subr.bf16.mxu0 %v3932_v6  ;;  %3965 = vmatprep.subr.bf16.mxu1 %v3964_v5  ;;  %v1778_v6 = vld [vmem:[#allocation6 + $0x110] sm:$0xff]  ;;  %v1789_v5 = vld [vmem:[#allocation6 + $0x168] sm:$0xff] }
 0x69b   :  { %v3982_v62 = vpack.c.bf16 %v1782_v58, %v1778_v6  ;;  %v3952_v63 = vpack.c.bf16 %v1789_v5, %v1785_v10 }
 0x74f   :  { %v1437_v11 = vpop.f32.mrb[12].mxu0  ;;  %v1508_v15 = vpop.f32.mrb[12].mxu1 }
 0x750   :  { %v1517_v19 = vrot.slane %v1437_v11, 2  ;;  %v1439_v20 = vpop.f32.mrb[13].mxu0  ;;  %v1510_v24 = vpop.f32.mrb[13].mxu1  ;;  %v1519_v53 = vrot.slane %v1508_v15, 2  ;;  %v3970_v11 = vpack.c.bf16 %v1758_v36, %v1754_v35  ;;  %v1761_v15 = vld [vmem:[#allocation6 + $0x88] sm:$0xff]  ;;  %v1795_v35 = vld [vmem:[#allocation6 + $0x198] sm:$0xff] }
 0x751   :  { %v1518_v28 = vrot.slane %v1439_v20, 2  ;;  %v1520_v42 = vrot.slane %v1510_v24, 2  ;;  %v1763_v20 = vld [vmem:[#allocation6 + $0x98] sm:$0xff] }
 0x752   :  { %v1525_v29 = vadd.f32 %v1517_v19, %v5112_v16  ;;  %v1527_v55 = vadd.f32 %v1519_v53, %v5124_v60  ;;  %v1765_v19 = vld [vmem:[#allocation6 + $0xa8] sm:$0xff]  ;;  %v1799_v36 = vld [vmem:[#allocation6 + $0x1b8] sm:$0xff] }
 0x753   :  { %v1526_v33 = vadd.f32 %v1518_v28, %v5114_v17  ;;  %v1528_v46 = vadd.f32 %v1520_v42, %v5120_v44  ;;  %v3940_v24 = vpack.c.bf16 %v1765_v19, %v1761_v15  ;;  %v1767_v28 = vld [vmem:[#allocation6 + $0xb8] sm:$0xff]  ;;  %v1762_v42 = vld [vmem:[#allocation6 + $0x90] sm:$0xff]  ;;  %v3988_v15 = vpack.c.bf16 %v1799_v36, %v1795_v35  ;;  %v1796_v19 = vld [vmem:[#allocation6 + $0x1a0] sm:$0xff] }
 0x754   :  { %v3388_v37 = vmul.f32 -1.442695, %v1525_v29  ;;  %v1760_v29 = vld [vmem:[#allocation6 + $0x80] sm:$0xff]  ;;  %v142_v35 = vld [vmem:[#allocation8 + $0x10] sm:$0xff] }
 0x755   :  { %v3389_v41 = vmul.f32 -1.442695, %v1526_v33  ;;  %v3390_v54 = vmul.f32 -1.442695, %v1528_v46  ;;  %v1764_v33 = vld [vmem:[#allocation6 + $0xa0] sm:$0xff]  ;;  %v1766_v46 = vld [vmem:[#allocation6 + $0xb0] sm:$0xff] }
 0x756   :  { %4612 = vpow2.f32 %v3388_v37  ;;  %v3972_v37 = vpack.c.bf16 %v1767_v28, %v1763_v20  ;;  %v3974_v53 = vpack.c.bf16 %v1766_v46, %v1762_v42  ;;  %v1794_v20 = vld [vmem:[#allocation6 + $0x190] sm:$0xff]  ;;  %v1807_v46 = vld [vmem:[#allocation6 + $0x1f8] sm:$0xff] }
 0x757   :  { %4614 = vpow2.f32 %v3389_v41  ;;  %v3942_v41 = vpack.c.bf16 %v1764_v33, %v1760_v29  ;;  %v1801_v29 = vld [vmem:[#allocation6 + $0x1c8] sm:$0xff]  ;;  %v146_v36 = vld [vmem:[#allocation8 + $0x30] sm:$0xff] }
 0x758   :  { %4616 = vpow2.f32 %v3390_v54  ;;  %v1769_v54 = vld [vmem:[#allocation6 + $0xc8] sm:$0xff] }
 0x759   :  { %4618 = vtanh.f32 %v1527_v55  ;;  %v1773_v55 = vld [vmem:[#allocation6 + $0xe8] sm:$0xff] }
 0x75a   :  { %v1805_v33 = vld [vmem:[#allocation6 + $0x1e8] sm:$0xff] }
 0x75b   :  { %v3960_v42 = vpack.c.bf16 %v1805_v33, %v1801_v29  ;;  %v148_v33 = vld [vmem:[#allocation8 + $0x40] sm:$0xff] }
 0x760   :  { %v4613_v59 = vpop.eup %4612 }
 0x761   :  { %v4615_v2 = vpop.eup %4614  ;;  %v1532_v3 = vadd.f32 1.0, %v4613_v59  ;;  %v1771_v59 = vld [vmem:[#allocation6 + $0xd8] sm:$0xff] }
 0x762   :  { %v1538_v4 = vadd.f32 1.0, %v4615_v2  ;;  %v4617_v9 = vpop.eup %4616  ;;  %v3944_v2 = vpack.c.bf16 %v1773_v55, %v1769_v54  ;;  %v1804_v54 = vld [vmem:[#allocation6 + $0x1e0] sm:$0xff] }
 0x763   :  { %4620 = vrcp.f32 %v1532_v3  ;;  %v4619_v18 = vpop.eup %4618  ;;  %v1545_v39 = vadd.f32 1.0, %v4617_v9  ;;  %v1775_v3 = vld [vmem:[#allocation6 + $0xf8] sm:$0xff]  ;;  %v1772_v9 = vld [vmem:[#allocation6 + $0xe0] sm:$0xff] }
 0x764   :  { %4622 = vrcp.f32 %v1538_v4  ;;  %v1768_v4 = vld [vmem:[#allocation6 + $0xc0] sm:$0xff] }
 0x765   :  { %4624 = vrcp.f32 %v1545_v39  ;;  %v1777_v39 = vld [vmem:[#allocation6 + $0x108] sm:$0xff] }
 0x76d   :  { %v4621_v22 = vpop.eup %4620 }
 0x76e   :  { %v4623_v30 = vpop.eup %4622  ;;  %v1552_v38 = vmul.f32 %v4621_v22, %v4619_v18  ;;  %v3976_v18 = vpack.c.bf16 %v1775_v3, %v1771_v59  ;;  %v3946_v22 = vpack.c.bf16 %v1772_v9, %v1768_v4  ;;  %v1802_v59 = vld [vmem:[#allocation6 + $0x1d0] sm:$0xff]  ;;  %v141_v3 = vld [vmem:[#allocation8 + $0x8] sm:$0xff]  ;;  %v143_v9 = vld [vmem:[#allocation8 + $0x18] sm:$0xff] }
 0x76f   :  { %v1551_v40 = vmul.f32 %v4623_v30, %v1549_v23  ;;  %v4625_v49 = vpop.eup %4624  ;;  %v1770_v23 = vld [vmem:[#allocation6 + $0xd0] sm:$0xff]  ;;  %v145_v4 = vld [vmem:[#allocation8 + $0x28] sm:$0xff] }
 0x770   :  { %v1774_v30 = vld [vmem:[#allocation6 + $0xf0] sm:$0xff] }
 0x771   :  { %v5377_v45 = vadd.f32 %v1552_v38, %v1551_v40  ;;  %v3978_v38 = vpack.c.bf16 %v1774_v30, %v1770_v23  ;;  %v1781_v40 = vld [vmem:[#allocation6 + $0x128] sm:$0xff]  ;;  %v5382_v30 = vpack.c.bf16 %v145_v4, %v141_v3  ;;  %v163_v3 = vld [vmem:[#allocation8 + $0xb8] sm:$0xff] }
 0x773   :  { %4626 = vtanh.f32 %v5377_v45 }
 0x77d   :  { %v4627_v50 = vpop.eup %4626 }
 0x77e   :  { %v1555_v12 = vmul.f32 %v4627_v50, %v4625_v49  ;;  %v1779_v49 = vld [vmem:[#allocation6 + $0x118] sm:$0xff]  ;;  %v3948_v50 = vpack.c.bf16 %v1781_v40, %v1777_v39 }
 0x780   :  { %v1557_v32 = vrot.slane %v1555_v12, 6  ;;  %v1783_v12 = vld [vmem:[#allocation6 + $0x138] sm:$0xff] }
 0x781   :  { %v3980_v51 = vpack.c.bf16 %v1783_v12, %v1779_v49 }
 0x782   :  { %1624 = vmatmul.mubr.f32.vlgmr.msra.gmra.mrb[14].mxu0 %v1557_v32  ;;  %1695 = vmatmul.mubr.f32.vlgmr.msra.gmra.mrb[14].mxu1 %v1557_v32  ;;  %v1776_v32 = vld [vmem:[#allocation6 + $0x100] sm:$0xff] }
 0x783   :  { %1897 = vmatprep.mubr.f32.mxu0 %v4847_v1  ;;  %1968 = vmatprep.mubr.f32.mxu1 %v4847_v1  ;;  %v3950_v43 = vpack.c.bf16 %v1780_v48, %v1776_v32 }
 0x784   :  { %3935 = vmatpush1.bf16.msra.mxu0 %v3934_v7  ;;  %3967 = vmatpush1.bf16.msra.mxu1 %v3966_v13  ;;  %v1787_v7 = vld [vmem:[#allocation6 + $0x158] sm:$0xff] }
 0x785   :  { %3937 = vmatprep.subr.bf16.mxu0 %v3936_v47  ;;  %3969 = vmatprep.subr.bf16.mxu1 %v3968_v52  ;;  %v3984_v13 = vpack.c.bf16 %v1791_v31, %v1787_v7  ;;  %v3954_v47 = vpack.c.bf16 %v1788_v8, %v1784_v61  ;;  %v3986_v52 = vpack.c.bf16 %v1790_v26, %v1786_v21  ;;  %v1737_v21 = vrot.slane %v5377_v45, 7 }
 0x786   :  { %v5395_v45 = vpack.c.bf16 %v146_v36, %v142_v35 }
 0x788   :  { %3939 = vmatpush1.bf16.msra.mxu0 %v3938_v34  ;;  %3971 = vmatpush1.bf16.msra.mxu1 %v3970_v11  ;;  %v3956_v34 = vpack.c.bf16 %v1797_v27, %v1793_v25  ;;  %v1792_v11 = vld [vmem:[#allocation6 + $0x180] sm:$0xff] }
 0x789   :  { %3941 = vmatprep.subr.bf16.mxu0 %v3940_v24  ;;  %3973 = vmatprep.subr.bf16.mxu1 %v3972_v37  ;;  %v1798_v24 = vld [vmem:[#allocation6 + $0x1b0] sm:$0xff]  ;;  %v3958_v28 = vpack.c.bf16 %v1796_v19, %v1792_v11  ;;  %v1803_v37 = vld [vmem:[#allocation6 + $0x1d8] sm:$0xff]  ;;  %v149_v11 = vld [vmem:[#allocation8 + $0x48] sm:$0xff] }
 0x78a   :  { %v3992_v55 = vpack.c.bf16 %v1807_v46, %v1803_v37  ;;  %v153_v19 = vld [vmem:[#allocation8 + $0x68] sm:$0xff]  ;;  %v152_v37 = vld [vmem:[#allocation8 + $0x60] sm:$0xff] }
 0x78b   :  { %v5403_v4 = vpack.c.bf16 %v152_v37, %v148_v33  ;;  %v189_v33 = vld [vmem:[#allocation8 + $0x188] sm:$0xff] }
 0x78c   :  { %3943 = vmatpush1.bf16.msra.mxu0 %v3942_v41  ;;  %3975 = vmatpush1.bf16.msra.mxu1 %v3974_v53  ;;  %v3990_v41 = vpack.c.bf16 %v1798_v24, %v1794_v20  ;;  %v1800_v53 = vld [vmem:[#allocation6 + $0x1c0] sm:$0xff]  ;;  %v151_v20 = vld [vmem:[#allocation8 + $0x58] sm:$0xff]  ;;  %v193_v37 = vld [vmem:[#allocation8 + $0x1a8] sm:$0xff] }
 0x78d   :  { %3945 = vmatprep.subr.bf16.mxu0 %v3944_v2  ;;  %3977 = vmatprep.subr.bf16.mxu1 %v3976_v18  ;;  %v1806_v2 = vld [vmem:[#allocation6 + $0x1f0] sm:$0xff]  ;;  %v147_v18 = vld [vmem:[#allocation8 + $0x38] sm:$0xff] }
 0x78e   :  { %v3994_v23 = vpack.c.bf16 %v1806_v2, %v1802_v59  ;;  %v155_v24 = vld [vmem:[#allocation8 + $0x78] sm:$0xff]  ;;  %v161_v59 = vld [vmem:[#allocation8 + $0xa8] sm:$0xff] }
 0x78f   :  { %v5399_v46 = vpack.c.bf16 %v155_v24, %v151_v20  ;;  %v159_v2 = vld [vmem:[#allocation8 + $0x98] sm:$0xff]  ;;  %v182_v24 = vld [vmem:[#allocation8 + $0x150] sm:$0xff] }
 0x790   :  { %3947 = vmatpush1.bf16.msra.mxu0 %v3946_v22  ;;  %3979 = vmatpush1.bf16.msra.mxu1 %v3978_v38  ;;  %v3962_v22 = vpack.c.bf16 %v1804_v54, %v1800_v53  ;;  %v5384_v38 = vpack.c.bf16 %v147_v18, %v143_v9  ;;  %v150_v53 = vld [vmem:[#allocation8 + $0x50] sm:$0xff]  ;;  %v156_v18 = vld [vmem:[#allocation8 + $0x80] sm:$0xff] }
 0x791   :  { %3949 = vmatprep.subr.bf16.mxu0 %v3948_v50  ;;  %3981 = vmatprep.subr.bf16.mxu1 %v3980_v51  ;;  %v154_v54 = vld [vmem:[#allocation8 + $0x70] sm:$0xff] }
 0x792   :  { %v5405_v9 = vpack.c.bf16 %v154_v54, %v150_v53  ;;  %v195_v53 = vld [vmem:[#allocation8 + $0x1b8] sm:$0xff] }
 0x794   :  { %3951 = vmatpush1.bf16.msra.mxu0 %v3950_v43  ;;  %3983 = vmatpush1.bf16.msra.mxu1 %v3982_v62 }
 0x795   :  { %3953 = vmatprep.subr.bf16.mxu0 %v3952_v63  ;;  %3985 = vmatprep.subr.bf16.mxu1 %v3984_v13 }
 0x798   :  { %3955 = vmatpush1.bf16.msra.mxu0 %v3954_v47  ;;  %3987 = vmatpush1.bf16.msra.mxu1 %v3986_v52  ;;  %v144_v52 = vld [vmem:[#allocation8 + $0x20] sm:$0xff] }
 0x799   :  { %3957 = vmatprep.subr.bf16.mxu0 %v3956_v34  ;;  %3989 = vmatprep.subr.bf16.mxu1 %v3988_v15 }
 0x79c   :  { %3959 = vmatpush1.bf16.msra.mxu0 %v3958_v28  ;;  %3991 = vmatpush1.bf16.msra.mxu1 %v3990_v41 }
 0x79d   :  { %3961 = vmatprep.subr.bf16.mxu0 %v3960_v42  ;;  %3993 = vmatprep.subr.bf16.mxu1 %v3992_v55  ;;  %v5397_v42 = vpack.c.bf16 %v153_v19, %v149_v11  ;;  %v157_v55 = vld [vmem:[#allocation8 + $0x88] sm:$0xff]  ;;  %v180_v11 = vld [vmem:[#allocation8 + $0x140] sm:$0xff] }
 0x7a0   :  { %3963 = vmatpush1.bf16.msra.mxu0 %v3962_v22  ;;  %3995 = vmatpush1.bf16.msra.mxu1 %v3994_v23  ;;  %v160_v22 = vld [vmem:[#allocation8 + $0xa0] sm:$0xff]  ;;  %v5409_v23 = vpack.c.bf16 %v161_v59, %v157_v55 }
 0x7a1   :  { %3997 = vmatprep.subr.bf16.mxu0 %v5382_v30  ;;  %4029 = vmatprep.subr.bf16.mxu1 %v5384_v38  ;;  %v188_v59 = vld [vmem:[#allocation8 + $0x180] sm:$0xff] }
 0x855   :  { %v1625_v39 = vpop.f32.mrb[14].mxu0  ;;  %v1696_v40 = vpop.f32.mrb[14].mxu1 }
 0x856   :  { %v1705_v49 = vrot.slane %v1625_v39, 1  ;;  %v1627_v50 = vpop.f32.mrb[15].mxu0  ;;  %v1698_v12 = vpop.f32.mrb[15].mxu1  ;;  %v1707_v62 = vrot.slane %v1696_v40, 1  ;;  %v5411_v39 = vpack.c.bf16 %v163_v3, %v159_v2  ;;  %v158_v40 = vld [vmem:[#allocation8 + $0x90] sm:$0xff]  ;;  %v192_v2 = vld [vmem:[#allocation8 + $0x1a0] sm:$0xff]  ;;  %v5459_v3 = vpack.c.bf16 %v193_v37, %v189_v33 }
 0x857   :  { %v1706_v32 = vrot.slane %v1627_v50, 1  ;;  %v1708_v58 = vrot.slane %v1698_v12, 1  ;;  %v165_v50 = vld [vmem:[#allocation8 + $0xc8] sm:$0xff] }
 0x858   :  { %v1713_v48 = vadd.f32 %v1705_v49, %v5112_v16  ;;  %v1715_v7 = vadd.f32 %v1707_v62, %v5124_v60  ;;  %v140_v60 = vld [vmem:[#allocation8] sm:$0xff]  ;;  %v162_v49 = vld [vmem:[#allocation8 + $0xb0] sm:$0xff]  ;;  %v169_v12 = vld [vmem:[#allocation8 + $0xe8] sm:$0xff] }
 0x859   :  { %v1714_v51 = vadd.f32 %v1706_v32, %v5114_v17  ;;  %v1716_v10 = vadd.f32 %v1708_v58, %v5120_v44  ;;  %v5393_v29 = vpack.c.bf16 %v144_v52, %v140_v60  ;;  %v167_v32 = vld [vmem:[#allocation8 + $0xd8] sm:$0xff]  ;;  %v168_v58 = vld [vmem:[#allocation8 + $0xe0] sm:$0xff]  ;;  %v185_v60 = vld [vmem:[#allocation8 + $0x168] sm:$0xff] }
 0x85a   :  { %v3391_v43 = vmul.f32 -1.442695, %v1713_v48  ;;  %v171_v48 = vld [vmem:[#allocation8 + $0xf8] sm:$0xff] }
 0x85b   :  { %v3392_v6 = vmul.f32 -1.442695, %v1714_v51  ;;  %v3393_v5 = vmul.f32 -1.442695, %v1716_v10  ;;  %v5417_v51 = vpack.c.bf16 %v160_v22, %v156_v18  ;;  %v5423_v10 = vpack.c.bf16 %v169_v12, %v165_v50  ;;  %v183_v52 = vld [vmem:[#allocation8 + $0x158] sm:$0xff]  ;;  %v190_v22 = vld [vmem:[#allocation8 + $0x190] sm:$0xff] }
 0x85c   :  { %4628 = vpow2.f32 %v3391_v43  ;;  %v5419_v43 = vpack.c.bf16 %v162_v49, %v158_v40  ;;  %v5425_v62 = vpack.c.bf16 %v171_v48, %v167_v32  ;;  %v194_v40 = vld [vmem:[#allocation8 + $0x1b0] sm:$0xff]  ;;  %v197_v49 = vld [vmem:[#allocation8 + $0x1c8] sm:$0xff]  ;;  %v199_v12 = vld [vmem:[#allocation8 + $0x1d8] sm:$0xff]  ;;  %v5465_v48 = vpack.c.bf16 %v192_v2, %v188_v59 }
 0x85d   :  { %4630 = vpow2.f32 %v3392_v6  ;;  %v164_v6 = vld [vmem:[#allocation8 + $0xc0] sm:$0xff]  ;;  %v201_v50 = vld [vmem:[#allocation8 + $0x1e8] sm:$0xff]  ;;  %v203_v32 = vld [vmem:[#allocation8 + $0x1f8] sm:$0xff] }
 0x85e   :  { %4632 = vpow2.f32 %v3393_v5  ;;  %v166_v5 = vld [vmem:[#allocation8 + $0xd0] sm:$0xff] }
 0x85f   :  { %4634 = vtanh.f32 %v1715_v7  ;;  %v170_v7 = vld [vmem:[#allocation8 + $0xf0] sm:$0xff] }
 0x866   :  { %v4629_v31 = vpop.eup %4628 }
 0x867   :  { %v4631_v63 = vpop.eup %4630  ;;  %v1720_v13 = vadd.f32 1.0, %v4629_v31  ;;  %v173_v31 = vld [vmem:[#allocation8 + $0x108] sm:$0xff] }
 0x868   :  { %v1726_v61 = vadd.f32 1.0, %v4631_v63  ;;  %v4633_v16 = vpop.eup %4632  ;;  %v177_v63 = vld [vmem:[#allocation8 + $0x128] sm:$0xff] }
 0x869   :  { %4636 = vrcp.f32 %v1720_v13  ;;  %v4635_v17 = vpop.eup %4634  ;;  %v1733_v44 = vadd.f32 1.0, %v4633_v16  ;;  %v175_v13 = vld [vmem:[#allocation8 + $0x118] sm:$0xff]  ;;  %v5429_v16 = vpack.c.bf16 %v168_v58, %v164_v6  ;;  %v5467_v6 = vpack.c.bf16 %v194_v40, %v190_v22  ;;  %v196_v58 = vld [vmem:[#allocation8 + $0x1c0] sm:$0xff] }
 0x86a   :  { %4638 = vrcp.f32 %v1726_v61  ;;  %v179_v61 = vld [vmem:[#allocation8 + $0x138] sm:$0xff] }
 0x86b   :  { %4640 = vrcp.f32 %v1733_v44  ;;  %v174_v44 = vld [vmem:[#allocation8 + $0x110] sm:$0xff] }
 0x873   :  { %v4637_v8 = vpop.eup %4636 }
 0x874   :  { %v4639_v47 = vpop.eup %4638  ;;  %v1740_v26 = vmul.f32 %v4637_v8, %v4635_v17  ;;  %v5431_v17 = vpack.c.bf16 %v170_v7, %v166_v5  ;;  %v172_v8 = vld [vmem:[#allocation8 + $0x100] sm:$0xff]  ;;  %v5471_v5 = vpack.c.bf16 %v201_v50, %v197_v49  ;;  %v5473_v7 = vpack.c.bf16 %v203_v32, %v199_v12 }
 0x875   :  { %v1739_v25 = vmul.f32 %v4639_v47, %v1737_v21  ;;  %v4641_v34 = vpop.eup %4640  ;;  %v176_v21 = vld [vmem:[#allocation8 + $0x120] sm:$0xff]  ;;  %v5435_v47 = vpack.c.bf16 %v177_v63, %v173_v31  ;;  %v198_v63 = vld [vmem:[#allocation8 + $0x1d0] sm:$0xff] }
 0x876   :  { %v5441_v35 = vpack.c.bf16 %v176_v21, %v172_v8  ;;  %v200_v31 = vld [vmem:[#allocation8 + $0x1e0] sm:$0xff] }
 0x877   :  { %v1741_v27 = vadd.f32 %v1740_v26, %v1739_v25  ;;  %v5437_v26 = vpack.c.bf16 %v179_v61, %v175_v13  ;;  %v178_v25 = vld [vmem:[#allocation8 + $0x130] sm:$0xff]  ;;  %v5477_v61 = vpack.c.bf16 %v200_v31, %v196_v58 }
 0x878   :  { %v5443_v36 = vpack.c.bf16 %v178_v25, %v174_v44  ;;  %v202_v13 = vld [vmem:[#allocation8 + $0x1f0] sm:$0xff] }
 0x879   :  { %4642 = vtanh.f32 %v1741_v27  ;;  %v181_v27 = vld [vmem:[#allocation8 + $0x148] sm:$0xff]  ;;  %v5479_v8 = vpack.c.bf16 %v202_v13, %v198_v63 }
 0x87a   :  { %v5447_v19 = vpack.c.bf16 %v185_v60, %v181_v27  ;;  %v1808_v60 = vld [vmem:[%s5808_s6] sm:$0xf] }
 0x883   :  { %v4643_v15 = vpop.eup %4642 }
 0x884   :  { %v1743_v28 = vmul.f32 %v4643_v15, %v4641_v34  ;;  %v187_v34 = vld [vmem:[#allocation8 + $0x178] sm:$0xff]  ;;  %v184_v15 = vld [vmem:[#allocation8 + $0x160] sm:$0xff] }
 0x885   :  { %v5449_v20 = vpack.c.bf16 %v187_v34, %v183_v52  ;;  %v5453_v54 = vpack.c.bf16 %v184_v15, %v180_v11  ;;  %v1816_v52 = vrot.slane %v1808_v60, %v5093_v56  ;;  %v1820_v34 = vrot.slane %v1808_v60, %v5095_v57 }
 0x886   :  { %v1810_v41 = vrot.slane %v1743_v28, 7  ;;  %v186_v28 = vld [vmem:[#allocation8 + $0x170] sm:$0xff]  ;;  %v1824_v57 = vrot.slane %v1808_v60, %v5110_v14 }
 0x887   :  { %v5455_v55 = vpack.c.bf16 %v186_v28, %v182_v24 }
 0x888   :  { %1898 = vmatmul.mubr.f32.vlgmr.msra.gmra.mrb[16].mxu0 %v1810_v41  ;;  %1969 = vmatmul.mubr.f32.vlgmr.msra.gmra.mrb[16].mxu1 %v1810_v41  ;;  %v191_v41 = vld [vmem:[#allocation8 + $0x198] sm:$0xff] }
 0x889   :  { %3999 = vmatpush1.bf16.msra.mxu0 %v5393_v29  ;;  %4031 = vmatpush1.bf16.msra.mxu1 %v5395_v45  ;;  %v5461_v18 = vpack.c.bf16 %v195_v53, %v191_v41  ;;  %v1828_v53 = vrot.slane %v1808_v60, %v5105_v0 }
 0x88a   :  { %4001 = vmatprep.subr.bf16.mxu0 %v5397_v42  ;;  %4033 = vmatprep.subr.bf16.mxu1 %v5399_v46 }
 0x88b   :  { %2039 = vmatprep.mubr.f32.mxu0 %v4847_v1  ;;  %2110 = vmatprep.mubr.f32.mxu1 %v4847_v1 }
 0x88d   :  { %4003 = vmatpush1.bf16.msra.mxu0 %v5403_v4  ;;  %4035 = vmatpush1.bf16.msra.mxu1 %v5405_v9 }
 0x88e   :  { %4005 = vmatprep.subr.bf16.mxu0 %v5409_v23  ;;  %4037 = vmatprep.subr.bf16.mxu1 %v5411_v39 }
 0x891   :  { %4007 = vmatpush1.bf16.msra.mxu0 %v5417_v51  ;;  %4039 = vmatpush1.bf16.msra.mxu1 %v5419_v43 }
 0x892   :  { %4009 = vmatprep.subr.bf16.mxu0 %v5423_v10  ;;  %4041 = vmatprep.subr.bf16.mxu1 %v5425_v62 }
 0x895   :  { %4011 = vmatpush1.bf16.msra.mxu0 %v5429_v16  ;;  %4043 = vmatpush1.bf16.msra.mxu1 %v5431_v17 }
 0x896   :  { %4013 = vmatprep.subr.bf16.mxu0 %v5435_v47  ;;  %4045 = vmatprep.subr.bf16.mxu1 %v5437_v26 }
 0x899   :  { %4015 = vmatpush1.bf16.msra.mxu0 %v5441_v35  ;;  %4047 = vmatpush1.bf16.msra.mxu1 %v5443_v36 }
 0x89a   :  { %4017 = vmatprep.subr.bf16.mxu0 %v5447_v19  ;;  %4049 = vmatprep.subr.bf16.mxu1 %v5449_v20 }
 0x89d   :  { %4019 = vmatpush1.bf16.msra.mxu0 %v5453_v54  ;;  %4051 = vmatpush1.bf16.msra.mxu1 %v5455_v55 }
 0x89e   :  { %4021 = vmatprep.subr.bf16.mxu0 %v5459_v3  ;;  %4053 = vmatprep.subr.bf16.mxu1 %v5461_v18 }
 0x8a1   :  { %4023 = vmatpush1.bf16.msra.mxu0 %v5465_v48  ;;  %4055 = vmatpush1.bf16.msra.mxu1 %v5467_v6 }
 0x8a2   :  { %4025 = vmatprep.subr.bf16.mxu0 %v5471_v5  ;;  %4057 = vmatprep.subr.bf16.mxu1 %v5473_v7 }
 0x8a5   :  { %4027 = vmatpush1.bf16.msra.mxu0 %v5477_v61  ;;  %4059 = vmatpush1.bf16.msra.mxu1 %v5479_v8 }
 0x8a6   :  { %4061 = vmatprep.subr.bf16.mxu0 %v5382_v30  ;;  %4093 = vmatprep.subr.bf16.mxu1 %v5384_v38 }
 0x8a8   :  { %2040 = vmatmul.mubr.f32.vlgmr.msra.gmra.mrb[18].mxu0 %v4847_v1  ;;  %2111 = vmatmul.mubr.f32.vlgmr.msra.gmra.mrb[18].mxu1 %v4847_v1 }
 0x8a9   :  { %4063 = vmatpush1.bf16.msra.mxu0 %v5393_v29  ;;  %4095 = vmatpush1.bf16.msra.mxu1 %v5395_v45 }
 0x8aa   :  { %4065 = vmatprep.subr.bf16.mxu0 %v5397_v42  ;;  %4097 = vmatprep.subr.bf16.mxu1 %v5399_v46 }
 0x8ab   :  { %2210 = vmatprep.mubr.f32.mxu0 %v4847_v1  ;;  %2281 = vmatprep.mubr.f32.mxu1 %v4847_v1 }
 0x8ad   :  { %4067 = vmatpush1.bf16.msra.mxu0 %v5403_v4  ;;  %4099 = vmatpush1.bf16.msra.mxu1 %v5405_v9 }
 0x8ae   :  { %4069 = vmatprep.subr.bf16.mxu0 %v5409_v23  ;;  %4101 = vmatprep.subr.bf16.mxu1 %v5411_v39 }
 0x8b1   :  { %4071 = vmatpush1.bf16.msra.mxu0 %v5417_v51  ;;  %4103 = vmatpush1.bf16.msra.mxu1 %v5419_v43 }
 0x8b2   :  { %4073 = vmatprep.subr.bf16.mxu0 %v5423_v10  ;;  %4105 = vmatprep.subr.bf16.mxu1 %v5425_v62 }
 0x8b5   :  { %4075 = vmatpush1.bf16.msra.mxu0 %v5429_v16  ;;  %4107 = vmatpush1.bf16.msra.mxu1 %v5431_v17 }
 0x8b6   :  { %4077 = vmatprep.subr.bf16.mxu0 %v5435_v47  ;;  %4109 = vmatprep.subr.bf16.mxu1 %v5437_v26 }
 0x8b9   :  { %4079 = vmatpush1.bf16.msra.mxu0 %v5441_v35  ;;  %4111 = vmatpush1.bf16.msra.mxu1 %v5443_v36 }
 0x8ba   :  { %4081 = vmatprep.subr.bf16.mxu0 %v5447_v19  ;;  %4113 = vmatprep.subr.bf16.mxu1 %v5449_v20 }
 0x8bd   :  { %4083 = vmatpush1.bf16.msra.mxu0 %v5453_v54  ;;  %4115 = vmatpush1.bf16.msra.mxu1 %v5455_v55 }
 0x8be   :  { %4085 = vmatprep.subr.bf16.mxu0 %v5459_v3  ;;  %4117 = vmatprep.subr.bf16.mxu1 %v5461_v18 }
 0x8c1   :  { %4087 = vmatpush1.bf16.msra.mxu0 %v5465_v48  ;;  %4119 = vmatpush1.bf16.msra.mxu1 %v5467_v6 }
 0x8c2   :  { %4089 = vmatprep.subr.bf16.mxu0 %v5471_v5  ;;  %4121 = vmatprep.subr.bf16.mxu1 %v5473_v7 }
 0x8c5   :  { %4091 = vmatpush1.bf16.msra.mxu0 %v5477_v61  ;;  %4123 = vmatpush1.bf16.msra.mxu1 %v5479_v8 }
 0x8c6   :  { %4125 = vmatprep.subr.bf16.mxu0 %v5382_v30  ;;  %4157 = vmatprep.subr.bf16.mxu1 %v5384_v38 }
 0x95b   :  { %v1899_v21 = vpop.f32.mrb[16].mxu0  ;;  %v1970_v44 = vpop.f32.mrb[16].mxu1 }
 0x95c   :  { %v1901_v25 = vpop.f32.mrb[17].mxu0  ;;  %v1972_v27 = vpop.f32.mrb[17].mxu1  ;;  %v5528_v11 = vadd.f32 %v1899_v21, %v1816_v52  ;;  %v5539_v49 = vadd.f32 %v1970_v44, %v1824_v57 }
 0x95d   :  { %v5530_v15 = vadd.f32 %v1901_v25, %v1820_v34  ;;  %v5535_v56 = vadd.f32 %v1972_v27, %v1828_v53 }
 0x97b   :  { %v2041_v24 = vpop.f32.mrb[18].mxu0  ;;  %v2112_v28 = vpop.f32.mrb[18].mxu1 }
 0x97c   :  { %v2117_v33 = vadd.f32 %v2041_v24, %v5528_v11  ;;  %v2043_v37 = vpop.f32.mrb[19].mxu0  ;;  %v2114_v41 = vpop.f32.mrb[19].mxu1  ;;  %v2119_v12 = vadd.f32 %v2112_v28, %v5539_v49 }
 0x97d   :  { %v2118_v59 = vadd.f32 %v2043_v37, %v5530_v15  ;;  %v2120_v40 = vadd.f32 %v2114_v41, %v5535_v56 }
 0x97e   :  { %v3394_v2 = vmul.f32 -1.442695, %v2117_v33 }
 0x97f   :  { %v3395_v22 = vmul.f32 -1.442695, %v2118_v59  ;;  %v3396_v50 = vmul.f32 -1.442695, %v2120_v40 }
 0x980   :  { %4644 = vpow2.f32 %v3394_v2 }
 0x981   :  { %4646 = vpow2.f32 %v3395_v22 }
 0x982   :  { %4648 = vpow2.f32 %v3396_v50 }
 0x983   :  { %4650 = vtanh.f32 %v2119_v12 }
 0x98a   :  { %v4645_v32 = vpop.eup %4644 }
 0x98b   :  { %v4647_v58 = vpop.eup %4646  ;;  %v2124_v0 = vadd.f32 1.0, %v4645_v32 }
 0x98c   :  { %v2130_v31 = vadd.f32 1.0, %v4647_v58  ;;  %v4649_v63 = vpop.eup %4648 }
 0x98d   :  { %4652 = vrcp.f32 %v2124_v0  ;;  %v4651_v13 = vpop.eup %4650  ;;  %v2137_v27 = vadd.f32 1.0, %v4649_v63 }
 0x98e   :  { %4654 = vrcp.f32 %v2130_v31 }
 0x98f   :  { %4656 = vrcp.f32 %v2137_v27 }
 0x997   :  { %v4653_v21 = vpop.eup %4652 }
 0x998   :  { %v4655_v25 = vpop.eup %4654  ;;  %v2141_v14 = vmul.f32 %v4653_v21, %v4651_v13 }
 0x999   :  { %v2140_v60 = vmul.f32 0.0, %v4655_v25  ;;  %v4657_v52 = vpop.eup %4656 }
 0x99b   :  { %v5542_v44 = vadd.f32 %v2141_v14, %v2140_v60 }
 0x99d   :  { %4658 = vtanh.f32 %v5542_v44 }
 0x9a7   :  { %v4659_v34 = vpop.eup %4658 }
 0x9a8   :  { %v2144_v24 = vmul.f32 %v4659_v34, %v4657_v52 }
 0x9aa   :  { %2145 = vst [vmem:[#allocation2] sm:$0x1] %v2144_v24  ;;  %2211 = vmatmul.mubr.f32.vlgmr.msra.gmra.mrb[20].mxu0 %v2144_v24  ;;  %2282 = vmatmul.mubr.f32.vlgmr.msra.gmra.mrb[20].mxu1 %v2144_v24 }
 0x9ab   :  { %4127 = vmatpush1.bf16.msra.mxu0 %v5393_v29  ;;  %4159 = vmatpush1.bf16.msra.mxu1 %v5395_v45 }
 0x9ac   :  { %4129 = vmatprep.subr.bf16.mxu0 %v5397_v42  ;;  %4161 = vmatprep.subr.bf16.mxu1 %v5399_v46 }
 0x9ad   :  { %2381 = vmatprep.mubr.f32.mxu0 %v4847_v1  ;;  %2452 = vmatprep.mubr.f32.mxu1 %v4847_v1 }
 0x9af   :  { %4131 = vmatpush1.bf16.msra.mxu0 %v5403_v4  ;;  %4163 = vmatpush1.bf16.msra.mxu1 %v5405_v9 }
 0x9b0   :  { %4133 = vmatprep.subr.bf16.mxu0 %v5409_v23  ;;  %4165 = vmatprep.subr.bf16.mxu1 %v5411_v39 }
 0x9b3   :  { %4135 = vmatpush1.bf16.msra.mxu0 %v5417_v51  ;;  %4167 = vmatpush1.bf16.msra.mxu1 %v5419_v43 }
 0x9b4   :  { %4137 = vmatprep.subr.bf16.mxu0 %v5423_v10  ;;  %4169 = vmatprep.subr.bf16.mxu1 %v5425_v62 }
 0x9b7   :  { %4139 = vmatpush1.bf16.msra.mxu0 %v5429_v16  ;;  %4171 = vmatpush1.bf16.msra.mxu1 %v5431_v17 }
 0x9b8   :  { %4141 = vmatprep.subr.bf16.mxu0 %v5435_v47  ;;  %4173 = vmatprep.subr.bf16.mxu1 %v5437_v26 }
 0x9bb   :  { %4143 = vmatpush1.bf16.msra.mxu0 %v5441_v35  ;;  %4175 = vmatpush1.bf16.msra.mxu1 %v5443_v36 }
 0x9bc   :  { %4145 = vmatprep.subr.bf16.mxu0 %v5447_v19  ;;  %4177 = vmatprep.subr.bf16.mxu1 %v5449_v20 }
 0x9bf   :  { %4147 = vmatpush1.bf16.msra.mxu0 %v5453_v54  ;;  %4179 = vmatpush1.bf16.msra.mxu1 %v5455_v55 }
 0x9c0   :  { %4149 = vmatprep.subr.bf16.mxu0 %v5459_v3  ;;  %4181 = vmatprep.subr.bf16.mxu1 %v5461_v18 }
 0x9c3   :  { %4151 = vmatpush1.bf16.msra.mxu0 %v5465_v48  ;;  %4183 = vmatpush1.bf16.msra.mxu1 %v5467_v6 }
 0x9c4   :  { %4153 = vmatprep.subr.bf16.mxu0 %v5471_v5  ;;  %4185 = vmatprep.subr.bf16.mxu1 %v5473_v7 }
 0x9c7   :  { %4155 = vmatpush1.bf16.msra.mxu0 %v5477_v61  ;;  %4187 = vmatpush1.bf16.msra.mxu1 %v5479_v8 }
 0x9c8   :  { %4189 = vmatprep.subr.bf16.mxu0 %v5382_v30  ;;  %4221 = vmatprep.subr.bf16.mxu1 %v5384_v38 }
 0xa7d   :  { %v2212_v28 = vpop.f32.mrb[20].mxu0  ;;  %v2283_v33 = vpop.f32.mrb[20].mxu1 }
 0xa7e   :  { %v2288_v37 = vadd.f32 %v2212_v28, %v5528_v11  ;;  %v2214_v41 = vpop.f32.mrb[21].mxu0  ;;  %v2285_v53 = vpop.f32.mrb[21].mxu1  ;;  %v2290_v50 = vadd.f32 %v2283_v33, %v5539_v49 }
 0xa7f   :  { %v2289_v59 = vadd.f32 %v2214_v41, %v5530_v15  ;;  %v2291_v57 = vadd.f32 %v2285_v53, %v5535_v56 }
 0xa80   :  { %v3397_v2 = vmul.f32 -1.442695, %v2288_v37 }
 0xa81   :  { %v3398_v22 = vmul.f32 -1.442695, %v2289_v59  ;;  %v3399_v40 = vmul.f32 -1.442695, %v2291_v57 }
 0xa82   :  { %4660 = vpow2.f32 %v3397_v2 }
 0xa83   :  { %4662 = vpow2.f32 %v3398_v22 }
 0xa84   :  { %4664 = vpow2.f32 %v3399_v40 }
 0xa85   :  { %4666 = vtanh.f32 %v2290_v50 }
 0xa8c   :  { %v4661_v12 = vpop.eup %4660 }
 0xa8d   :  { %v4663_v32 = vpop.eup %4662  ;;  %v2295_v58 = vadd.f32 1.0, %v4661_v12 }
 0xa8e   :  { %v2301_v0 = vadd.f32 1.0, %v4663_v32  ;;  %v4665_v31 = vpop.eup %4664 }
 0xa8f   :  { %4668 = vrcp.f32 %v2295_v58  ;;  %v4667_v63 = vpop.eup %4666  ;;  %v2308_v14 = vadd.f32 1.0, %v4665_v31 }
 0xa90   :  { %4670 = vrcp.f32 %v2301_v0 }
 0xa91   :  { %4672 = vrcp.f32 %v2308_v14 }
 0xa99   :  { %v4669_v13 = vpop.eup %4668 }
 0xa9a   :  { %v4671_v21 = vpop.eup %4670  ;;  %v2312_v25 = vmul.f32 %v4669_v13, %v4667_v63 }
 0xa9b   :  { %v2311_v27 = vmul.f32 %v4671_v21, %v5542_v44  ;;  %v4673_v52 = vpop.eup %4672 }
 0xa9d   :  { %v5584_v60 = vadd.f32 %v2312_v25, %v2311_v27 }
 0xa9f   :  { %4674 = vtanh.f32 %v5584_v60 }
 0xaa9   :  { %v4675_v34 = vpop.eup %4674 }
 0xaaa   :  { %v2315_v24 = vmul.f32 %v4675_v34, %v4673_v52 }
 0xaac   :  { %2316 = vst [vmem:[#allocation2 + $0x1] sm:$0x1] %v2315_v24  ;;  %2382 = vmatmul.mubr.f32.vlgmr.msra.gmra.mrb[22].mxu0 %v2315_v24  ;;  %2453 = vmatmul.mubr.f32.vlgmr.msra.gmra.mrb[22].mxu1 %v2315_v24 }
 0xaad   :  { %4191 = vmatpush1.bf16.msra.mxu0 %v5393_v29  ;;  %4223 = vmatpush1.bf16.msra.mxu1 %v5395_v45 }
 0xaae   :  { %4193 = vmatprep.subr.bf16.mxu0 %v5397_v42  ;;  %4225 = vmatprep.subr.bf16.mxu1 %v5399_v46 }
 0xaaf   :  { %2552 = vmatprep.mubr.f32.mxu0 %v4847_v1  ;;  %2623 = vmatprep.mubr.f32.mxu1 %v4847_v1 }
 0xab1   :  { %4195 = vmatpush1.bf16.msra.mxu0 %v5403_v4  ;;  %4227 = vmatpush1.bf16.msra.mxu1 %v5405_v9 }
 0xab2   :  { %4197 = vmatprep.subr.bf16.mxu0 %v5409_v23  ;;  %4229 = vmatprep.subr.bf16.mxu1 %v5411_v39 }
 0xab5   :  { %4199 = vmatpush1.bf16.msra.mxu0 %v5417_v51  ;;  %4231 = vmatpush1.bf16.msra.mxu1 %v5419_v43 }
 0xab6   :  { %4201 = vmatprep.subr.bf16.mxu0 %v5423_v10  ;;  %4233 = vmatprep.subr.bf16.mxu1 %v5425_v62 }
 0xab9   :  { %4203 = vmatpush1.bf16.msra.mxu0 %v5429_v16  ;;  %4235 = vmatpush1.bf16.msra.mxu1 %v5431_v17 }
 0xaba   :  { %4205 = vmatprep.subr.bf16.mxu0 %v5435_v47  ;;  %4237 = vmatprep.subr.bf16.mxu1 %v5437_v26 }
 0xabd   :  { %4207 = vmatpush1.bf16.msra.mxu0 %v5441_v35  ;;  %4239 = vmatpush1.bf16.msra.mxu1 %v5443_v36 }
 0xabe   :  { %4209 = vmatprep.subr.bf16.mxu0 %v5447_v19  ;;  %4241 = vmatprep.subr.bf16.mxu1 %v5449_v20 }
 0xac1   :  { %4211 = vmatpush1.bf16.msra.mxu0 %v5453_v54  ;;  %4243 = vmatpush1.bf16.msra.mxu1 %v5455_v55 }
 0xac2   :  { %4213 = vmatprep.subr.bf16.mxu0 %v5459_v3  ;;  %4245 = vmatprep.subr.bf16.mxu1 %v5461_v18 }
 0xac5   :  { %4215 = vmatpush1.bf16.msra.mxu0 %v5465_v48  ;;  %4247 = vmatpush1.bf16.msra.mxu1 %v5467_v6 }
 0xac6   :  { %4217 = vmatprep.subr.bf16.mxu0 %v5471_v5  ;;  %4249 = vmatprep.subr.bf16.mxu1 %v5473_v7 }
 0xac9   :  { %4219 = vmatpush1.bf16.msra.mxu0 %v5477_v61  ;;  %4251 = vmatpush1.bf16.msra.mxu1 %v5479_v8 }
 0xaca   :  { %4253 = vmatprep.subr.bf16.mxu0 %v5382_v30  ;;  %4285 = vmatprep.subr.bf16.mxu1 %v5384_v38 }
 0xb7f   :  { %v2383_v44 = vpop.f32.mrb[22].mxu0  ;;  %v2454_v28 = vpop.f32.mrb[22].mxu1 }
 0xb80   :  { %v2459_v33 = vadd.f32 %v2383_v44, %v5528_v11  ;;  %v2385_v37 = vpop.f32.mrb[23].mxu0  ;;  %v2456_v41 = vpop.f32.mrb[23].mxu1  ;;  %v2461_v40 = vadd.f32 %v2454_v28, %v5539_v49 }
 0xb81   :  { %v2460_v53 = vadd.f32 %v2385_v37, %v5530_v15  ;;  %v2462_v22 = vadd.f32 %v2456_v41, %v5535_v56 }
 0xb82   :  { %v3400_v59 = vmul.f32 -1.442695, %v2459_v33 }
 0xb83   :  { %v3401_v2 = vmul.f32 -1.442695, %v2460_v53  ;;  %v3402_v57 = vmul.f32 -1.442695, %v2462_v22 }
 0xb84   :  { %4676 = vpow2.f32 %v3400_v59 }
 0xb85   :  { %4678 = vpow2.f32 %v3401_v2 }
 0xb86   :  { %4680 = vpow2.f32 %v3402_v57 }
 0xb87   :  { %4682 = vtanh.f32 %v2461_v40 }
 0xb8e   :  { %v4677_v50 = vpop.eup %4676 }
 0xb8f   :  { %v4679_v12 = vpop.eup %4678  ;;  %v2466_v32 = vadd.f32 1.0, %v4677_v50 }
 0xb90   :  { %v2472_v58 = vadd.f32 1.0, %v4679_v12  ;;  %v4681_v0 = vpop.eup %4680 }
 0xb91   :  { %4684 = vrcp.f32 %v2466_v32  ;;  %v4683_v31 = vpop.eup %4682  ;;  %v2479_v25 = vadd.f32 1.0, %v4681_v0 }
 0xb92   :  { %4686 = vrcp.f32 %v2472_v58 }
 0xb93   :  { %4688 = vrcp.f32 %v2479_v25 }
 0xb9b   :  { %v4685_v63 = vpop.eup %4684 }
 0xb9c   :  { %v4687_v13 = vpop.eup %4686  ;;  %v2483_v21 = vmul.f32 %v4685_v63, %v4683_v31 }
 0xb9d   :  { %v2482_v14 = vmul.f32 %v4687_v13, %v5584_v60  ;;  %v4689_v52 = vpop.eup %4688 }
 0xb9f   :  { %v5626_v27 = vadd.f32 %v2483_v21, %v2482_v14 }
 0xba1   :  { %4690 = vtanh.f32 %v5626_v27 }
 0xbab   :  { %v4691_v34 = vpop.eup %4690 }
 0xbac   :  { %v2486_v24 = vmul.f32 %v4691_v34, %v4689_v52 }
 0xbae   :  { %2487 = vst [vmem:[#allocation2 + $0x2] sm:$0x1] %v2486_v24  ;;  %2553 = vmatmul.mubr.f32.vlgmr.msra.gmra.mrb[24].mxu0 %v2486_v24  ;;  %2624 = vmatmul.mubr.f32.vlgmr.msra.gmra.mrb[24].mxu1 %v2486_v24 }
 0xbaf   :  { %4255 = vmatpush1.bf16.msra.mxu0 %v5393_v29  ;;  %4287 = vmatpush1.bf16.msra.mxu1 %v5395_v45 }
 0xbb0   :  { %4257 = vmatprep.subr.bf16.mxu0 %v5397_v42  ;;  %4289 = vmatprep.subr.bf16.mxu1 %v5399_v46 }
 0xbb1   :  { %2723 = vmatprep.mubr.f32.mxu0 %v4847_v1  ;;  %2794 = vmatprep.mubr.f32.mxu1 %v4847_v1 }
 0xbb3   :  { %4259 = vmatpush1.bf16.msra.mxu0 %v5403_v4  ;;  %4291 = vmatpush1.bf16.msra.mxu1 %v5405_v9 }
 0xbb4   :  { %4261 = vmatprep.subr.bf16.mxu0 %v5409_v23  ;;  %4293 = vmatprep.subr.bf16.mxu1 %v5411_v39 }
 0xbb7   :  { %4263 = vmatpush1.bf16.msra.mxu0 %v5417_v51  ;;  %4295 = vmatpush1.bf16.msra.mxu1 %v5419_v43 }
 0xbb8   :  { %4265 = vmatprep.subr.bf16.mxu0 %v5423_v10  ;;  %4297 = vmatprep.subr.bf16.mxu1 %v5425_v62 }
 0xbbb   :  { %4267 = vmatpush1.bf16.msra.mxu0 %v5429_v16  ;;  %4299 = vmatpush1.bf16.msra.mxu1 %v5431_v17 }
 0xbbc   :  { %4269 = vmatprep.subr.bf16.mxu0 %v5435_v47  ;;  %4301 = vmatprep.subr.bf16.mxu1 %v5437_v26 }
 0xbbf   :  { %4271 = vmatpush1.bf16.msra.mxu0 %v5441_v35  ;;  %4303 = vmatpush1.bf16.msra.mxu1 %v5443_v36 }
 0xbc0   :  { %4273 = vmatprep.subr.bf16.mxu0 %v5447_v19  ;;  %4305 = vmatprep.subr.bf16.mxu1 %v5449_v20 }
 0xbc3   :  { %4275 = vmatpush1.bf16.msra.mxu0 %v5453_v54  ;;  %4307 = vmatpush1.bf16.msra.mxu1 %v5455_v55 }
 0xbc4   :  { %4277 = vmatprep.subr.bf16.mxu0 %v5459_v3  ;;  %4309 = vmatprep.subr.bf16.mxu1 %v5461_v18 }
 0xbc7   :  { %4279 = vmatpush1.bf16.msra.mxu0 %v5465_v48  ;;  %4311 = vmatpush1.bf16.msra.mxu1 %v5467_v6 }
 0xbc8   :  { %4281 = vmatprep.subr.bf16.mxu0 %v5471_v5  ;;  %4313 = vmatprep.subr.bf16.mxu1 %v5473_v7 }
 0xbcb   :  { %4283 = vmatpush1.bf16.msra.mxu0 %v5477_v61  ;;  %4315 = vmatpush1.bf16.msra.mxu1 %v5479_v8 }
 0xbcc   :  { %4317 = vmatprep.subr.bf16.mxu0 %v5382_v30  ;;  %4349 = vmatprep.subr.bf16.mxu1 %v5384_v38 }
 0xc81   :  { %v2554_v60 = vpop.f32.mrb[24].mxu0  ;;  %v2625_v44 = vpop.f32.mrb[24].mxu1 }
 0xc82   :  { %v2630_v28 = vadd.f32 %v2554_v60, %v5528_v11  ;;  %v2556_v33 = vpop.f32.mrb[25].mxu0  ;;  %v2627_v37 = vpop.f32.mrb[25].mxu1  ;;  %v2632_v57 = vadd.f32 %v2625_v44, %v5539_v49 }
 0xc83   :  { %v2631_v41 = vadd.f32 %v2556_v33, %v5530_v15  ;;  %v2633_v2 = vadd.f32 %v2627_v37, %v5535_v56 }
 0xc84   :  { %v3403_v53 = vmul.f32 -1.442695, %v2630_v28 }
 0xc85   :  { %v3404_v59 = vmul.f32 -1.442695, %v2631_v41  ;;  %v3405_v22 = vmul.f32 -1.442695, %v2633_v2 }
 0xc86   :  { %4692 = vpow2.f32 %v3403_v53 }
 0xc87   :  { %4694 = vpow2.f32 %v3404_v59 }
 0xc88   :  { %4696 = vpow2.f32 %v3405_v22 }
 0xc89   :  { %4698 = vtanh.f32 %v2632_v57 }
 0xc90   :  { %v4693_v40 = vpop.eup %4692 }
 0xc91   :  { %v4695_v50 = vpop.eup %4694  ;;  %v2637_v12 = vadd.f32 1.0, %v4693_v40 }
 0xc92   :  { %v2643_v32 = vadd.f32 1.0, %v4695_v50  ;;  %v4697_v58 = vpop.eup %4696 }
 0xc93   :  { %4700 = vrcp.f32 %v2637_v12  ;;  %v4699_v0 = vpop.eup %4698  ;;  %v2650_v21 = vadd.f32 1.0, %v4697_v58 }
 0xc94   :  { %4702 = vrcp.f32 %v2643_v32 }
 0xc95   :  { %4704 = vrcp.f32 %v2650_v21 }
 0xc9d   :  { %v4701_v31 = vpop.eup %4700 }
 0xc9e   :  { %v4703_v63 = vpop.eup %4702  ;;  %v2654_v13 = vmul.f32 %v4701_v31, %v4699_v0 }
 0xc9f   :  { %v2653_v25 = vmul.f32 %v4703_v63, %v5626_v27  ;;  %v4705_v52 = vpop.eup %4704 }
 0xca1   :  { %v5668_v14 = vadd.f32 %v2654_v13, %v2653_v25 }
 0xca3   :  { %4706 = vtanh.f32 %v5668_v14 }
 0xcad   :  { %v4707_v34 = vpop.eup %4706 }
 0xcae   :  { %v2657_v24 = vmul.f32 %v4707_v34, %v4705_v52 }
 0xcb0   :  { %2658 = vst [vmem:[#allocation2 + $0x3] sm:$0x1] %v2657_v24  ;;  %2724 = vmatmul.mubr.f32.vlgmr.msra.gmra.mrb[26].mxu0 %v2657_v24  ;;  %2795 = vmatmul.mubr.f32.vlgmr.msra.gmra.mrb[26].mxu1 %v2657_v24 }
 0xcb1   :  { %4319 = vmatpush1.bf16.msra.mxu0 %v5393_v29  ;;  %4351 = vmatpush1.bf16.msra.mxu1 %v5395_v45 }
 0xcb2   :  { %4321 = vmatprep.subr.bf16.mxu0 %v5397_v42  ;;  %4353 = vmatprep.subr.bf16.mxu1 %v5399_v46 }
 0xcb3   :  { %2894 = vmatprep.mubr.f32.mxu0 %v4847_v1  ;;  %2965 = vmatprep.mubr.f32.mxu1 %v4847_v1 }
 0xcb5   :  { %4323 = vmatpush1.bf16.msra.mxu0 %v5403_v4  ;;  %4355 = vmatpush1.bf16.msra.mxu1 %v5405_v9 }
 0xcb6   :  { %4325 = vmatprep.subr.bf16.mxu0 %v5409_v23  ;;  %4357 = vmatprep.subr.bf16.mxu1 %v5411_v39 }
 0xcb9   :  { %4327 = vmatpush1.bf16.msra.mxu0 %v5417_v51  ;;  %4359 = vmatpush1.bf16.msra.mxu1 %v5419_v43 }
 0xcba   :  { %4329 = vmatprep.subr.bf16.mxu0 %v5423_v10  ;;  %4361 = vmatprep.subr.bf16.mxu1 %v5425_v62 }
 0xcbd   :  { %4331 = vmatpush1.bf16.msra.mxu0 %v5429_v16  ;;  %4363 = vmatpush1.bf16.msra.mxu1 %v5431_v17 }
 0xcbe   :  { %4333 = vmatprep.subr.bf16.mxu0 %v5435_v47  ;;  %4365 = vmatprep.subr.bf16.mxu1 %v5437_v26 }
 0xcc1   :  { %4335 = vmatpush1.bf16.msra.mxu0 %v5441_v35  ;;  %4367 = vmatpush1.bf16.msra.mxu1 %v5443_v36 }
 0xcc2   :  { %4337 = vmatprep.subr.bf16.mxu0 %v5447_v19  ;;  %4369 = vmatprep.subr.bf16.mxu1 %v5449_v20 }
 0xcc5   :  { %4339 = vmatpush1.bf16.msra.mxu0 %v5453_v54  ;;  %4371 = vmatpush1.bf16.msra.mxu1 %v5455_v55 }
 0xcc6   :  { %4341 = vmatprep.subr.bf16.mxu0 %v5459_v3  ;;  %4373 = vmatprep.subr.bf16.mxu1 %v5461_v18 }
 0xcc9   :  { %4343 = vmatpush1.bf16.msra.mxu0 %v5465_v48  ;;  %4375 = vmatpush1.bf16.msra.mxu1 %v5467_v6 }
 0xcca   :  { %4345 = vmatprep.subr.bf16.mxu0 %v5471_v5  ;;  %4377 = vmatprep.subr.bf16.mxu1 %v5473_v7 }
 0xccd   :  { %4347 = vmatpush1.bf16.msra.mxu0 %v5477_v61  ;;  %4379 = vmatpush1.bf16.msra.mxu1 %v5479_v8 }
 0xcce   :  { %4381 = vmatprep.subr.bf16.mxu0 %v5382_v30  ;;  %4413 = vmatprep.subr.bf16.mxu1 %v5384_v38 }
 0xd83   :  { %v2725_v27 = vpop.f32.mrb[26].mxu0  ;;  %v2796_v60 = vpop.f32.mrb[26].mxu1 }
 0xd84   :  { %v2801_v44 = vadd.f32 %v2725_v27, %v5528_v11  ;;  %v2727_v28 = vpop.f32.mrb[27].mxu0  ;;  %v2798_v33 = vpop.f32.mrb[27].mxu1  ;;  %v2803_v22 = vadd.f32 %v2796_v60, %v5539_v49 }
 0xd85   :  { %v2802_v37 = vadd.f32 %v2727_v28, %v5530_v15  ;;  %v2804_v59 = vadd.f32 %v2798_v33, %v5535_v56 }
 0xd86   :  { %v3406_v41 = vmul.f32 -1.442695, %v2801_v44 }
 0xd87   :  { %v3407_v53 = vmul.f32 -1.442695, %v2802_v37  ;;  %v3408_v2 = vmul.f32 -1.442695, %v2804_v59 }
 0xd88   :  { %4708 = vpow2.f32 %v3406_v41 }
 0xd89   :  { %4710 = vpow2.f32 %v3407_v53 }
 0xd8a   :  { %4712 = vpow2.f32 %v3408_v2 }
 0xd8b   :  { %4714 = vtanh.f32 %v2803_v22 }
 0xd92   :  { %v4709_v57 = vpop.eup %4708 }
 0xd93   :  { %v4711_v40 = vpop.eup %4710  ;;  %v2808_v50 = vadd.f32 1.0, %v4709_v57 }
 0xd94   :  { %v2814_v12 = vadd.f32 1.0, %v4711_v40  ;;  %v4713_v32 = vpop.eup %4712 }
 0xd95   :  { %4716 = vrcp.f32 %v2808_v50  ;;  %v4715_v58 = vpop.eup %4714  ;;  %v2821_v13 = vadd.f32 1.0, %v4713_v32 }
 0xd96   :  { %4718 = vrcp.f32 %v2814_v12 }
 0xd97   :  { %4720 = vrcp.f32 %v2821_v13 }
 0xd9f   :  { %v4717_v0 = vpop.eup %4716 }
 0xda0   :  { %v4719_v31 = vpop.eup %4718  ;;  %v2825_v63 = vmul.f32 %v4717_v0, %v4715_v58 }
 0xda1   :  { %v2824_v21 = vmul.f32 %v4719_v31, %v5668_v14  ;;  %v4721_v52 = vpop.eup %4720 }
 0xda3   :  { %v5710_v25 = vadd.f32 %v2825_v63, %v2824_v21 }
 0xda5   :  { %4722 = vtanh.f32 %v5710_v25 }
 0xdaf   :  { %v4723_v34 = vpop.eup %4722 }
 0xdb0   :  { %v2828_v24 = vmul.f32 %v4723_v34, %v4721_v52 }
 0xdb2   :  { %2829 = vst [vmem:[#allocation2 + $0x4] sm:$0x1] %v2828_v24  ;;  %2895 = vmatmul.mubr.f32.vlgmr.msra.gmra.mrb[28].mxu0 %v2828_v24  ;;  %2966 = vmatmul.mubr.f32.vlgmr.msra.gmra.mrb[28].mxu1 %v2828_v24 }
 0xdb3   :  { %4383 = vmatpush1.bf16.msra.mxu0 %v5393_v29  ;;  %4415 = vmatpush1.bf16.msra.mxu1 %v5395_v45 }
 0xdb4   :  { %4385 = vmatprep.subr.bf16.mxu0 %v5397_v42  ;;  %4417 = vmatprep.subr.bf16.mxu1 %v5399_v46 }
 0xdb5   :  { %3065 = vmatprep.mubr.f32.mxu0 %v4847_v1  ;;  %3136 = vmatprep.mubr.f32.mxu1 %v4847_v1 }
 0xdb7   :  { %4387 = vmatpush1.bf16.msra.mxu0 %v5403_v4  ;;  %4419 = vmatpush1.bf16.msra.mxu1 %v5405_v9 }
 0xdb8   :  { %4389 = vmatprep.subr.bf16.mxu0 %v5409_v23  ;;  %4421 = vmatprep.subr.bf16.mxu1 %v5411_v39 }
 0xdbb   :  { %4391 = vmatpush1.bf16.msra.mxu0 %v5417_v51  ;;  %4423 = vmatpush1.bf16.msra.mxu1 %v5419_v43 }
 0xdbc   :  { %4393 = vmatprep.subr.bf16.mxu0 %v5423_v10  ;;  %4425 = vmatprep.subr.bf16.mxu1 %v5425_v62 }
 0xdbf   :  { %4395 = vmatpush1.bf16.msra.mxu0 %v5429_v16  ;;  %4427 = vmatpush1.bf16.msra.mxu1 %v5431_v17 }
 0xdc0   :  { %4397 = vmatprep.subr.bf16.mxu0 %v5435_v47  ;;  %4429 = vmatprep.subr.bf16.mxu1 %v5437_v26 }
 0xdc3   :  { %4399 = vmatpush1.bf16.msra.mxu0 %v5441_v35  ;;  %4431 = vmatpush1.bf16.msra.mxu1 %v5443_v36 }
 0xdc4   :  { %4401 = vmatprep.subr.bf16.mxu0 %v5447_v19  ;;  %4433 = vmatprep.subr.bf16.mxu1 %v5449_v20 }
 0xdc7   :  { %4403 = vmatpush1.bf16.msra.mxu0 %v5453_v54  ;;  %4435 = vmatpush1.bf16.msra.mxu1 %v5455_v55 }
 0xdc8   :  { %4405 = vmatprep.subr.bf16.mxu0 %v5459_v3  ;;  %4437 = vmatprep.subr.bf16.mxu1 %v5461_v18 }
 0xdcb   :  { %4407 = vmatpush1.bf16.msra.mxu0 %v5465_v48  ;;  %4439 = vmatpush1.bf16.msra.mxu1 %v5467_v6 }
 0xdcc   :  { %4409 = vmatprep.subr.bf16.mxu0 %v5471_v5  ;;  %4441 = vmatprep.subr.bf16.mxu1 %v5473_v7 }
 0xdcf   :  { %4411 = vmatpush1.bf16.msra.mxu0 %v5477_v61  ;;  %4443 = vmatpush1.bf16.msra.mxu1 %v5479_v8 }
 0xdd0   :  { %4445 = vmatprep.subr.bf16.mxu0 %v5382_v30  ;;  %4477 = vmatprep.subr.bf16.mxu1 %v5384_v38 }
 0xe85   :  { %v2896_v14 = vpop.f32.mrb[28].mxu0  ;;  %v2967_v27 = vpop.f32.mrb[28].mxu1 }
 0xe86   :  { %v2972_v60 = vadd.f32 %v2896_v14, %v5528_v11  ;;  %v2898_v44 = vpop.f32.mrb[29].mxu0  ;;  %v2969_v28 = vpop.f32.mrb[29].mxu1  ;;  %v2974_v2 = vadd.f32 %v2967_v27, %v5539_v49 }
 0xe87   :  { %v2973_v33 = vadd.f32 %v2898_v44, %v5530_v15  ;;  %v2975_v53 = vadd.f32 %v2969_v28, %v5535_v56 }
 0xe88   :  { %v3409_v37 = vmul.f32 -1.442695, %v2972_v60 }
 0xe89   :  { %v3410_v41 = vmul.f32 -1.442695, %v2973_v33  ;;  %v3411_v59 = vmul.f32 -1.442695, %v2975_v53 }
 0xe8a   :  { %4724 = vpow2.f32 %v3409_v37 }
 0xe8b   :  { %4726 = vpow2.f32 %v3410_v41 }
 0xe8c   :  { %4728 = vpow2.f32 %v3411_v59 }
 0xe8d   :  { %4730 = vtanh.f32 %v2974_v2 }
 0xe94   :  { %v4725_v30 = vpop.eup %4724 }
 0xe95   :  { %v4727_v22 = vpop.eup %4726  ;;  %v2979_v38 = vadd.f32 1.0, %v4725_v30 }
 0xe96   :  { %v2985_v57 = vadd.f32 1.0, %v4727_v22  ;;  %v4729_v40 = vpop.eup %4728 }
 0xe97   :  { %4732 = vrcp.f32 %v2979_v38  ;;  %v4731_v50 = vpop.eup %4730  ;;  %v2992_v0 = vadd.f32 1.0, %v4729_v40 }
 0xe98   :  { %4734 = vrcp.f32 %v2985_v57  ;;  %v3418_v57 = vld [vmem:[%s5809_s7] ss:$0 sm:$0xff] }
 0xe99   :  { %4736 = vrcp.f32 %v2992_v0 }
 0xea1   :  { %v4733_v12 = vpop.eup %4732 }
 0xea2   :  { %v4735_v32 = vpop.eup %4734  ;;  %v2996_v58 = vmul.f32 %v4733_v12, %v4731_v50  ;;  %v3419_v12 = vld [vmem:[#allocation3] ss:$0 sm:$0xff] }
 0xea3   :  { %v2995_v31 = vmul.f32 %v4735_v32, %v5710_v25  ;;  %v4737_v13 = vpop.eup %4736 }
 0xea5   :  { %v5752_v63 = vadd.f32 %v2996_v58, %v2995_v31 }
 0xea7   :  { %4738 = vtanh.f32 %v5752_v63 }
 0xeb1   :  { %v4739_v21 = vpop.eup %4738 }
 0xeb2   :  { %v2999_v52 = vmul.f32 %v4739_v21, %v4737_v13 }
 0xeb4   :  { %3000 = vst [vmem:[#allocation2 + $0x5] sm:$0x1] %v2999_v52  ;;  %3066 = vmatmul.mubr.f32.vlgmr.msra.gmra.mrb[30].mxu0 %v2999_v52  ;;  %3137 = vmatmul.mubr.f32.vlgmr.msra.gmra.mrb[30].mxu1 %v2999_v52 }
 0xeb5   :  { %4447 = vmatpush1.bf16.msra.mxu0 %v5393_v29  ;;  %4479 = vmatpush1.bf16.msra.mxu1 %v5395_v45 }
 0xeb6   :  { %4449 = vmatprep.subr.bf16.mxu0 %v5397_v42  ;;  %4481 = vmatprep.subr.bf16.mxu1 %v5399_v46 }
 0xeb7   :  { %3236 = vmatprep.mubr.f32.mxu0 %v4847_v1  ;;  %3307 = vmatprep.mubr.f32.mxu1 %v4847_v1 }
 0xeb9   :  { %4451 = vmatpush1.bf16.msra.mxu0 %v5403_v4  ;;  %4483 = vmatpush1.bf16.msra.mxu1 %v5405_v9 }
 0xeba   :  { %4453 = vmatprep.subr.bf16.mxu0 %v5409_v23  ;;  %4485 = vmatprep.subr.bf16.mxu1 %v5411_v39 }
 0xebd   :  { %4455 = vmatpush1.bf16.msra.mxu0 %v5417_v51  ;;  %4487 = vmatpush1.bf16.msra.mxu1 %v5419_v43 }
 0xebe   :  { %4457 = vmatprep.subr.bf16.mxu0 %v5423_v10  ;;  %4489 = vmatprep.subr.bf16.mxu1 %v5425_v62 }
 0xec1   :  { %4459 = vmatpush1.bf16.msra.mxu0 %v5429_v16  ;;  %4491 = vmatpush1.bf16.msra.mxu1 %v5431_v17 }
 0xec2   :  { %4461 = vmatprep.subr.bf16.mxu0 %v5435_v47  ;;  %4493 = vmatprep.subr.bf16.mxu1 %v5437_v26 }
 0xec5   :  { %4463 = vmatpush1.bf16.msra.mxu0 %v5441_v35  ;;  %4495 = vmatpush1.bf16.msra.mxu1 %v5443_v36 }
 0xec6   :  { %4465 = vmatprep.subr.bf16.mxu0 %v5447_v19  ;;  %4497 = vmatprep.subr.bf16.mxu1 %v5449_v20 }
 0xec9   :  { %4467 = vmatpush1.bf16.msra.mxu0 %v5453_v54  ;;  %4499 = vmatpush1.bf16.msra.mxu1 %v5455_v55 }
 0xeca   :  { %4469 = vmatprep.subr.bf16.mxu0 %v5459_v3  ;;  %4501 = vmatprep.subr.bf16.mxu1 %v5461_v18 }
 0xecd   :  { %4471 = vmatpush1.bf16.msra.mxu0 %v5465_v48  ;;  %4503 = vmatpush1.bf16.msra.mxu1 %v5467_v6 }
 0xece   :  { %4473 = vmatprep.subr.bf16.mxu0 %v5471_v5  ;;  %4505 = vmatprep.subr.bf16.mxu1 %v5473_v7 }
 0xed1   :  { %4475 = vmatpush1.bf16.msra.mxu0 %v5477_v61  ;;  %4507 = vmatpush1.bf16.msra.mxu1 %v5479_v8 }
 0xf87   :  { %v3067_v1 = vpop.f32.mrb[30].mxu0  ;;  %v3138_v29 = vpop.f32.mrb[30].mxu1 }
 0xf88   :  { %v3143_v45 = vadd.f32 %v3067_v1, %v5528_v11  ;;  %v3069_v42 = vpop.f32.mrb[31].mxu0  ;;  %v3140_v46 = vpop.f32.mrb[31].mxu1  ;;  %v3145_v43 = vadd.f32 %v3138_v29, %v5539_v49 }
 0xf89   :  { %v3144_v4 = vadd.f32 %v3069_v42, %v5530_v15  ;;  %v3146_v39 = vadd.f32 %v3140_v46, %v5535_v56 }
 0xf8a   :  { %v3412_v9 = vmul.f32 -1.442695, %v3143_v45 }
 0xf8b   :  { %v3413_v23 = vmul.f32 -1.442695, %v3144_v4  ;;  %v3414_v51 = vmul.f32 -1.442695, %v3146_v39 }
 0xf8c   :  { %4740 = vpow2.f32 %v3412_v9 }
 0xf8d   :  { %4742 = vpow2.f32 %v3413_v23 }
 0xf8e   :  { %4744 = vpow2.f32 %v3414_v51 }
 0xf8f   :  { %4746 = vtanh.f32 %v3145_v43 }
 0xf96   :  { %v4741_v10 = vpop.eup %4740 }
 0xf97   :  { %v4743_v62 = vpop.eup %4742  ;;  %v3150_v16 = vadd.f32 1.0, %v4741_v10 }
 0xf98   :  { %v3156_v17 = vadd.f32 1.0, %v4743_v62  ;;  %v4745_v47 = vpop.eup %4744 }
 0xf99   :  { %4748 = vrcp.f32 %v3150_v16  ;;  %v4747_v26 = vpop.eup %4746  ;;  %v3163_v20 = vadd.f32 1.0, %v4745_v47 }
 0xf9a   :  { %4750 = vrcp.f32 %v3156_v17 }
 0xf9b   :  { %4752 = vrcp.f32 %v3163_v20 }
 0xfa3   :  { %v4749_v35 = vpop.eup %4748 }
 0xfa4   :  { %v4751_v36 = vpop.eup %4750  ;;  %v3167_v19 = vmul.f32 %v4749_v35, %v4747_v26 }
 0xfa5   :  { %v3166_v54 = vmul.f32 %v4751_v36, %v5752_v63  ;;  %v4753_v3 = vpop.eup %4752 }
 0xfa7   :  { %v3168_v55 = vadd.f32 %v3167_v19, %v3166_v54 }
 0xfa9   :  { %4754 = vtanh.f32 %v3168_v55 }
 0xfb3   :  { %v4755_v18 = vpop.eup %4754 }
 0xfb4   :  { %v3170_v48 = vmul.f32 %v4755_v18, %v4753_v3 }
 0xfb6   :  { %3171 = vst [vmem:[#allocation2 + $0x6] sm:$0x1] %v3170_v48  ;;  %3237 = vmatmul.mubr.f32.vlgmr.msra.gmra.mrb[32].mxu0 %v3170_v48  ;;  %3308 = vmatmul.mubr.f32.vlgmr.msra.gmra.mrb[32].mxu1 %v3170_v48 }
0x1089   :  { %v3238_v6 = vpop.f32.mrb[32].mxu0  ;;  %v3309_v5 = vpop.f32.mrb[32].mxu1 }
0x108a   :  { %v3314_v7 = vadd.f32 %v3238_v6, %v5528_v11  ;;  %v3240_v61 = vpop.f32.mrb[33].mxu0  ;;  %v3311_v8 = vpop.f32.mrb[33].mxu1  ;;  %v3316_v60 = vadd.f32 %v3309_v5, %v5539_v49 }
0x108b   :  { %v3315_v25 = vadd.f32 %v3240_v61, %v5530_v15  ;;  %v3317_v14 = vadd.f32 %v3311_v8, %v5535_v56 }
0x108c   :  { %v3415_v34 = vmul.f32 -1.442695, %v3314_v7 }
0x108d   :  { %v3416_v24 = vmul.f32 -1.442695, %v3315_v25  ;;  %v3417_v27 = vmul.f32 -1.442695, %v3317_v14 }
0x108e   :  { %4756 = vpow2.f32 %v3415_v34 }
0x108f   :  { %4758 = vpow2.f32 %v3416_v24 }
0x1090   :  { %4760 = vpow2.f32 %v3417_v27 }
0x1091   :  { %4762 = vtanh.f32 %v3316_v60 }
0x1098   :  { %v4757_v44 = vpop.eup %4756 }
0x1099   :  { %v4759_v28 = vpop.eup %4758  ;;  %v3321_v33 = vadd.f32 1.0, %v4757_v44 }
0x109a   :  { %v3327_v37 = vadd.f32 1.0, %v4759_v28  ;;  %v4761_v11 = vpop.eup %4760 }
0x109b   :  { %4764 = vrcp.f32 %v3321_v33  ;;  %v4763_v41 = vpop.eup %4762  ;;  %v3334_v2 = vadd.f32 1.0, %v4761_v11 }
0x109c   :  { %4766 = vrcp.f32 %v3327_v37 }
0x109d   :  { %4768 = vrcp.f32 %v3334_v2 }
0x10a5   :  { %v4765_v15 = vpop.eup %4764 }
0x10a6   :  { %v4767_v53 = vpop.eup %4766  ;;  %v3338_v59 = vmul.f32 %v4765_v15, %v4763_v41 }
0x10a7   :  { %v3337_v30 = vmul.f32 %v4767_v53, %v3168_v55  ;;  %v4769_v56 = vpop.eup %4768 }
0x10a9   :  { %v3339_v22 = vadd.f32 %v3338_v59, %v3337_v30 }
0x10ab   :  { %4770 = vtanh.f32 %v3339_v22 }
0x10b5   :  { %v4771_v49 = vpop.eup %4770 }
0x10b6   :  { %v3341_v38 = vmul.f32 %v4771_v49, %v4769_v56 }
0x10b8   :  { %3342 = vst [vmem:[#allocation2 + $0x7] sm:$0x1] %v3341_v38 }
0x10bf   :  { %v3343_v40 = vld [vmem:[#allocation2] sm:$0xff] }
0x10c0   :  { %v3351_v50 = vmul.f32 %v3418_v57, %v3343_v40 }
0x10c2   :  { %3352 = vadd.xlane.f32.xlu0 %v3351_v50 }
0x114f   :  { %v3353_v32 = vpop.xlane.xlu0 %3352 }
0x1150   :  { %v3361_v58 = vadd.f32 %v3419_v12, %v3353_v32 }
0x1152   :  { %3363 = vst.msk [vmem:[%s5811_s9] sm:$0xff] %vm3362_vm0, %v3361_v58 }
0x1153   :  { %3368 = vsyncpa [#allocation5], 1 }
0x1154   :  { %3369 = vsyncpa [#allocation7], 1 }

</bundles_post_ra>
